<compile_context>
chip_gen: v7x
topology: tpu7x:2x2x1
jax: 0.10.0
libtpu: 0.0.40
codegen_flags: <defaults>
</compile_context>

<pallas_src>
import jax
import jax.numpy as jnp
from jax import lax
from jax.experimental import pallas as pl
from jax.experimental.pallas import tpu as pltpu


# ----------------------------------------------------------------------------
# Fused kernel: L GRU layers + head, everything VMEM-resident.
# ----------------------------------------------------------------------------
def fused_policy_kernel(x_ref, w_ih0_ref, w_ihr_ref, b_i_ref,
                        w_hh_r_ref, w_hh_z_ref, w_hh_n_ref, b_hn_ref,
                        w1_ref, b1_ref, w2_ref, b2_ref,
                        w_h2_ref, b_h2_ref,
                        out_ref,
                        seq_a, seq_b):
    """Whole PolicyNetwork forward in one kernel.

    x_ref:      (T*B, F)     time-major input, row index = t*B + b
    w_ih0_ref:  (F, 3H)      layer-0 input->gate weights   [r | z | n]
    w_ihr_ref:  (L-1, H, 3H) layer-1.. input->gate weights
    b_i_ref:    (L, 1, 3H)   folded input-side gate biases
    w_hh_*_ref: (L, H, H)    per-gate hidden->gate weights (pre-split)
    b_hn_ref:   (L, 1, H)    hidden-side n-gate bias (stays inside r*(...))
    w1/b1:      (H, 32)/(1, 32)   head linear 1
    w2/b2:      (32, A)/(1, A)    head linear 2
    w_h2_ref:   (L,)  SMEM   Linear(L, 1) weight (one scalar per layer)
    b_h2_ref:   (1,)  SMEM   Linear(L, 1) bias
    out_ref:    (B, A)       softmax probabilities
    seq_a/b:    (T*B, H)     ping-pong VMEM buffers for inter-layer sequences
    """
    TB = x_ref.shape[0]
    L, H, _ = w_hh_r_ref.shape
    B = out_ref.shape[0]
    T = TB // B
    seq_bufs = (seq_a, seq_b)

    head_x = jnp.zeros((B, H), jnp.float32)

    for l in range(L):                                   # static unroll over layers
        # ---- hoisted (non-recurrent) input->gate projection, all timesteps ----
        if l == 0:
            x_all = x_ref[...]                           # (T*B, F)
            w_ih = w_ih0_ref[...]                        # (F, 3H)
        else:
            x_all = seq_bufs[(l - 1) % 2][...]           # (T*B, H), written by l-1
            w_ih = w_ihr_ref[l - 1]                      # (H, 3H)
        gi = jnp.dot(x_all, w_ih,
                     preferred_element_type=jnp.float32) + b_i_ref[l]   # (T*B, 3H)
        # Gate split once per layer; gi_* have no dependence on the recurrent
        # state, so the per-step row slices below are off the serial path.
        gi_r = gi[:, 0:H]
        gi_z = gi[:, H:2 * H]
        gi_n = gi[:, 2 * H:3 * H]

        w_hr = w_hh_r_ref[l]                             # (H, H)  -> in-loop matmuls
        w_hz = w_hh_z_ref[l]                             #           need no slicing
        w_hn = w_hh_n_ref[l]
        b_hn = b_hn_ref[l]                               # (1, H)
        out_seq = seq_bufs[l % 2] if l < L - 1 else None  # last layer: h_last only

        # ---- recurrence, fully unrolled (T is small & static) ----
        h = jnp.zeros((B, H), jnp.float32)               # PyTorch default h0 = 0
        for t in range(T):
            r0, r1 = t * B, (t + 1) * B
            gh_r = jnp.dot(h, w_hr, preferred_element_type=jnp.float32)
            gh_z = jnp.dot(h, w_hz, preferred_element_type=jnp.float32)
            gh_n = jnp.dot(h, w_hn, preferred_element_type=jnp.float32) + b_hn
            r = jax.nn.sigmoid(gi_r[r0:r1, :] + gh_r)
            z = jax.nn.sigmoid(gi_z[r0:r1, :] + gh_z)
            n = jnp.tanh(gi_n[r0:r1, :] + r * gh_n)
            h = (1.0 - z) * n + z * h
            if out_seq is not None:
                out_seq[r0:r1, :] = h                    # feeds next layer (VMEM only)

        # tanh(h_n) weighted over the layer axis == Linear(L, 1) applied to the
        # stacked final hidden states; accumulate layer by layer (no stacking).
        head_x = head_x + jnp.tanh(h) * w_h2_ref[l]

    # ---- head: Linear(H,32) -> tanh -> Linear(32,A) -> softmax(dim=1) ----
    head_x = head_x + b_h2_ref[0]
    y = jnp.tanh(jnp.dot(head_x, w1_ref[...],
                         preferred_element_type=jnp.float32) + b1_ref[...])
    logits = jnp.dot(y, w2_ref[...],
                     preferred_element_type=jnp.float32) + b2_ref[...]
    m = jnp.max(logits, axis=1, keepdims=True)
    e = jnp.exp(logits - m)
    s = jnp.sum(e, axis=1, keepdims=True)
    inv = pl.reciprocal(s, approx=True)                  # EUP slot (otherwise idle)
    inv = inv * (2.0 - s * inv)                          # one Newton step -> ~f32 exact
    out_ref[...] = e * inv


# ----------------------------------------------------------------------------
# Host-side (one-time) parameter packing: per-gate weight split + bias folding.
# ----------------------------------------------------------------------------
def pack_params(params):
    gru = params["gru"]
    L = len(gru)
    H = gru[0][1].shape[0]

    b_i, w_hh_r, w_hh_z, w_hh_n, b_hn = [], [], [], [], []
    for (w_ih, w_hh, b_ih, b_hh) in gru:
        # folded input-side biases: r/z get (b_ih + b_hh); n keeps only b_ih
        b_i.append(jnp.concatenate(
            [b_ih[:, 0:H] + b_hh[:, 0:H],
             b_ih[:, H:2 * H] + b_hh[:, H:2 * H],
             b_ih[:, 2 * H:3 * H]], axis=1))
        w_hh_r.append(w_hh[:, 0:H])
        w_hh_z.append(w_hh[:, H:2 * H])
        w_hh_n.append(w_hh[:, 2 * H:3 * H])
        b_hn.append(b_hh[:, 2 * H:3 * H])

    if L > 1:
        w_ihr = jnp.stack([gru[l][0] for l in range(1, L)], axis=0)
    else:
        w_ihr = jnp.zeros((1, H, 3 * H), jnp.float32)    # unused placeholder

    return {
        "w_ih0": gru[0][0],                              # (F, 3H)
        "w_ihr": w_ihr,                                  # (L-1, H, 3H)
        "b_i": jnp.stack(b_i, axis=0),                   # (L, 1, 3H)
        "w_hh_r": jnp.stack(w_hh_r, axis=0),             # (L, H, H)
        "w_hh_z": jnp.stack(w_hh_z, axis=0),
        "w_hh_n": jnp.stack(w_hh_n, axis=0),
        "b_hn": jnp.stack(b_hn, axis=0),                 # (L, 1, H)
        "w1": params["w1"], "b1": params["b1"],
        "w2": params["w2"], "b2": params["b2"],
        "w_h2": params["w_h2"].reshape(-1),              # (L,)  SMEM scalars
        "b_h2": params["b_h2"].reshape(-1),              # (1,)  SMEM scalar
    }


# ----------------------------------------------------------------------------
# Forward wrapper: single pallas_call, no grid, everything VMEM/SMEM resident.
# ----------------------------------------------------------------------------
@jax.jit
def policy_network_forward(state_btf, packed):
    B, T, F = state_btf.shape
    H = packed["w_hh_r"].shape[1]
    A = packed["w2"].shape[1]
    # time-major rows ordered (t, b): row t*B + b (tiny XLA glue, once per call)
    x2d = jnp.transpose(state_btf, (1, 0, 2)).reshape(T * B, F)

    vmem = pl.BlockSpec(memory_space=pltpu.MemorySpace.VMEM)
    smem = pl.BlockSpec(memory_space=pltpu.MemorySpace.SMEM)

    return pl.pallas_call(
        fused_policy_kernel,
        out_shape=jax.ShapeDtypeStruct((B, A), jnp.float32),
        in_specs=[vmem] * 12 + [smem, smem],
        out_specs=vmem,
        scratch_shapes=[pltpu.VMEM((T * B, H), jnp.float32),
                        pltpu.VMEM((T * B, H), jnp.float32)],
    )(x2d, packed["w_ih0"], packed["w_ihr"], packed["b_i"],
      packed["w_hh_r"], packed["w_hh_z"], packed["w_hh_n"], packed["b_hn"],
      packed["w1"], packed["b1"], packed["w2"], packed["b2"],
      packed["w_h2"], packed["b_h2"])


# ----------------------------------------------------------------------------
# Pure-JAX reference (operates on the raw, unpacked parameters).
# ----------------------------------------------------------------------------
def policy_network_reference(state_btf, params):
    B = state_btf.shape[0]
    x = jnp.transpose(state_btf, (1, 0, 2))
    h_lasts = []
    for (w_ih, w_hh, b_ih, b_hh) in params["gru"]:
        H = w_hh.shape[0]

        def step(h, x_t, w_ih=w_ih, w_hh=w_hh, b_ih=b_ih, b_hh=b_hh):
            gi = x_t @ w_ih + b_ih
            gh = h @ w_hh + b_hh
            i_r, i_z, i_n = jnp.split(gi, 3, axis=-1)
            h_r, h_z, h_n = jnp.split(gh, 3, axis=-1)
            r = jax.nn.sigmoid(i_r + h_r)
            z = jax.nn.sigmoid(i_z + h_z)
            n = jnp.tanh(i_n + r * h_n)
            h_new = (1.0 - z) * n + z * h
            return h_new, h_new

        h0 = jnp.zeros((B, H), jnp.float32)
        h_last, outs = lax.scan(step, h0, x)
        x = outs
        h_lasts.append(h_last)
    hn = jnp.tanh(jnp.stack(h_lasts, axis=0))                    # (L, B, H)
    xh = jnp.sum(hn * params["w_h2"][:, :, None], axis=0) + params["b_h2"]
    y = jnp.tanh(xh @ params["w1"] + params["b1"])
    logits = y @ params["w2"] + params["b2"]
    return jax.nn.softmax(logits, axis=1)


# ----------------------------------------------------------------------------
# Deterministic parameter init (PyTorch-style uniform bounds, synthetic).
# ----------------------------------------------------------------------------
def init_params(key, num_features, num_actions, hidden_size, gru_layers):
    keys = jax.random.split(key, 4 * gru_layers + 6)
    ki = iter(range(len(keys)))
    stdv = 1.0 / jnp.sqrt(hidden_size)

    gru = []
    for l in range(gru_layers):
        d_in = num_features if l == 0 else hidden_size
        w_ih = jax.random.uniform(keys[next(ki)], (d_in, 3 * hidden_size),
                                  jnp.float32, -stdv, stdv)
        w_hh = jax.random.uniform(keys[next(ki)], (hidden_size, 3 * hidden_size),
                                  jnp.float32, -stdv, stdv)
        b_ih = jax.random.uniform(keys[next(ki)], (1, 3 * hidden_size),
                                  jnp.float32, -stdv, stdv)
        b_hh = jax.random.uniform(keys[next(ki)], (1, 3 * hidden_size),
                                  jnp.float32, -stdv, stdv)
        gru.append((w_ih, w_hh, b_ih, b_hh))

    s_h2 = 1.0 / jnp.sqrt(gru_layers)
    w_h2 = jax.random.uniform(keys[next(ki)], (gru_layers, 1), jnp.float32, -s_h2, s_h2)
    b_h2 = jax.random.uniform(keys[next(ki)], (1, 1), jnp.float32, -s_h2, s_h2)

    s1 = 1.0 / jnp.sqrt(hidden_size)
    w1 = jax.random.uniform(keys[next(ki)], (hidden_size, 32), jnp.float32, -s1, s1)
    b1 = jax.random.uniform(keys[next(ki)], (1, 32), jnp.float32, -s1, s1)

    s2 = 1.0 / jnp.sqrt(32)
    w2 = jax.random.uniform(keys[next(ki)], (32, num_actions), jnp.float32, -s2, s2)
    b2 = jax.random.uniform(keys[next(ki)], (1, num_actions), jnp.float32, -s2, s2)

    return {"gru": gru, "w_h2": w_h2, "b_h2": b_h2,
            "w1": w1, "b1": b1, "w2": w2, "b2": b2}


if __name__ == "__main__":
    NUM_FEATURES = 8
    NUM_ACTIONS = 3
    HIDDEN = 32
    GRU_LAYERS = 4
    BATCH = 2
    SEQ = 8

    key = jax.random.PRNGKey(0)
    k_param, k_state = jax.random.split(key)
    params = init_params(k_param, NUM_FEATURES, NUM_ACTIONS, HIDDEN, GRU_LAYERS)
    packed = pack_params(params)   # one-time host-side prep (no per-call glue)
    state = jax.random.normal(k_state, (BATCH, SEQ, NUM_FEATURES), jnp.float32)

    probs = policy_network_forward(state, packed)
    probs = jax.block_until_ready(probs)

    ref = policy_network_reference(state, params)
    assert probs.shape == (BATCH, NUM_ACTIONS)
    assert jnp.allclose(jnp.sum(probs, axis=1), 1.0, atol=1e-4)
    assert jnp.allclose(probs, ref, atol=2e-4, rtol=2e-4)

    print("KERNEL_OK")
</pallas_src>

<mosaic_0001>
module attributes {stable_mosaic.version = 11 : i64} {
  func.func @fused_policy_kernel(%arg0: memref<16x8xf32, #tpu.memory_space<vmem>>, %arg1: memref<8x96xf32, #tpu.memory_space<vmem>>, %arg2: memref<3x32x96xf32, #tpu.memory_space<vmem>>, %arg3: memref<4x1x96xf32, #tpu.memory_space<vmem>>, %arg4: memref<4x32x32xf32, #tpu.memory_space<vmem>>, %arg5: memref<4x32x32xf32, #tpu.memory_space<vmem>>, %arg6: memref<4x32x32xf32, #tpu.memory_space<vmem>>, %arg7: memref<4x1x32xf32, #tpu.memory_space<vmem>>, %arg8: memref<32x32xf32, #tpu.memory_space<vmem>>, %arg9: memref<1x32xf32, #tpu.memory_space<vmem>>, %arg10: memref<32x3xf32, #tpu.memory_space<vmem>>, %arg11: memref<1x3xf32, #tpu.memory_space<vmem>>, %arg12: memref<4xf32, #tpu.memory_space<smem>>, %arg13: memref<1xf32, #tpu.memory_space<smem>>, %arg14: memref<2x3xf32, #tpu.memory_space<vmem>>, %arg15: memref<16x32xf32, #tpu.memory_space<vmem>>, %arg16: memref<16x32xf32, #tpu.memory_space<vmem>>) attributes {dimension_semantics = [], scalar_prefetch = 0 : i64, scratch_operands = 2 : i64, tpu.core_type = #tpu.core_type<tc>} {
    %cst = arith.constant 0.000000e+00 : f32
    %0 = vector.broadcast %cst : f32 to vector<2x32xf32>
    %c0 = arith.constant 0 : index
    %c0_0 = arith.constant 0 : index
    %1 = vector.load %arg0[%c0, %c0_0] : memref<16x8xf32, #tpu.memory_space<vmem>>, vector<16x8xf32>
    %c0_1 = arith.constant 0 : index
    %c0_2 = arith.constant 0 : index
    %2 = vector.load %arg1[%c0_1, %c0_2] : memref<8x96xf32, #tpu.memory_space<vmem>>, vector<8x96xf32>
    %cst_3 = arith.constant dense<0.000000e+00> : vector<16x96xf32>
    %3 = tpu.matmul %1, %2, %cst_3 {dimension_numbers = #tpu.dot_dimension_numbers<[1], [0], [0], [1], [0, 0, 1, 1], [], []>} : vector<16x8xf32>, vector<8x96xf32>, vector<16x96xf32> -> vector<16x96xf32>
    %c0_4 = arith.constant 0 : index
    %c0_5 = arith.constant 0 : index
    %c0_6 = arith.constant 0 : index
    %4 = vector.load %arg3[%c0_4, %c0_5, %c0_6] : memref<4x1x96xf32, #tpu.memory_space<vmem>>, vector<1x1x96xf32>
    %5 = vector.shape_cast %4 : vector<1x1x96xf32> to vector<1x96xf32>
    %6 = vector.broadcast %5 : vector<1x96xf32> to vector<16x96xf32>
    %7 = arith.addf %3, %6 : vector<16x96xf32>
    %8 = vector.extract_strided_slice %7 {offsets = [0, 0], sizes = [16, 32], strides = [1, 1]} : vector<16x96xf32> to vector<16x32xf32>
    %9 = vector.extract_strided_slice %7 {offsets = [0, 32], sizes = [16, 32], strides = [1, 1]} : vector<16x96xf32> to vector<16x32xf32>
    %10 = vector.extract_strided_slice %7 {offsets = [0, 64], sizes = [16, 32], strides = [1, 1]} : vector<16x96xf32> to vector<16x32xf32>
    %c0_7 = arith.constant 0 : index
    %c0_8 = arith.constant 0 : index
    %c0_9 = arith.constant 0 : index
    %11 = vector.load %arg4[%c0_7, %c0_8, %c0_9] : memref<4x32x32xf32, #tpu.memory_space<vmem>>, vector<1x32x32xf32>
    %12 = vector.shape_cast %11 : vector<1x32x32xf32> to vector<32x32xf32>
    %c0_10 = arith.constant 0 : index
    %c0_11 = arith.constant 0 : index
    %c0_12 = arith.constant 0 : index
    %13 = vector.load %arg5[%c0_10, %c0_11, %c0_12] : memref<4x32x32xf32, #tpu.memory_space<vmem>>, vector<1x32x32xf32>
    %14 = vector.shape_cast %13 : vector<1x32x32xf32> to vector<32x32xf32>
    %c0_13 = arith.constant 0 : index
    %c0_14 = arith.constant 0 : index
    %c0_15 = arith.constant 0 : index
    %15 = vector.load %arg6[%c0_13, %c0_14, %c0_15] : memref<4x32x32xf32, #tpu.memory_space<vmem>>, vector<1x32x32xf32>
    %16 = vector.shape_cast %15 : vector<1x32x32xf32> to vector<32x32xf32>
    %c0_16 = arith.constant 0 : index
    %c0_17 = arith.constant 0 : index
    %c0_18 = arith.constant 0 : index
    %17 = vector.load %arg7[%c0_16, %c0_17, %c0_18] : memref<4x1x32xf32, #tpu.memory_space<vmem>>, vector<1x1x32xf32>
    %18 = vector.shape_cast %17 : vector<1x1x32xf32> to vector<1x32xf32>
    %cst_19 = arith.constant 0.000000e+00 : f32
    %19 = vector.broadcast %cst_19 : f32 to vector<2x32xf32>
    %cst_20 = arith.constant dense<0.000000e+00> : vector<2x32xf32>
    %20 = tpu.matmul %19, %12, %cst_20 {dimension_numbers = #tpu.dot_dimension_numbers<[1], [0], [0], [1], [0, 0, 1, 1], [], []>} : vector<2x32xf32>, vector<32x32xf32>, vector<2x32xf32> -> vector<2x32xf32>
    %cst_21 = arith.constant dense<0.000000e+00> : vector<2x32xf32>
    %21 = tpu.matmul %19, %14, %cst_21 {dimension_numbers = #tpu.dot_dimension_numbers<[1], [0], [0], [1], [0, 0, 1, 1], [], []>} : vector<2x32xf32>, vector<32x32xf32>, vector<2x32xf32> -> vector<2x32xf32>
    %cst_22 = arith.constant dense<0.000000e+00> : vector<2x32xf32>
    %22 = tpu.matmul %19, %16, %cst_22 {dimension_numbers = #tpu.dot_dimension_numbers<[1], [0], [0], [1], [0, 0, 1, 1], [], []>} : vector<2x32xf32>, vector<32x32xf32>, vector<2x32xf32> -> vector<2x32xf32>
    %23 = vector.broadcast %18 : vector<1x32xf32> to vector<2x32xf32>
    %24 = arith.addf %22, %23 : vector<2x32xf32>
    %25 = vector.extract_strided_slice %8 {offsets = [0, 0], sizes = [2, 32], strides = [1, 1]} : vector<16x32xf32> to vector<2x32xf32>
    %26 = arith.addf %25, %20 : vector<2x32xf32>
    %27 = arith.negf %26 : vector<2x32xf32>
    %28 = math.exp %27 : vector<2x32xf32>
    %cst_23 = arith.constant 1.000000e+00 : f32
    %29 = vector.broadcast %cst_23 : f32 to vector<2x32xf32>
    %30 = arith.addf %29, %28 : vector<2x32xf32>
    %31 = arith.divf %29, %30 : vector<2x32xf32>
    %32 = vector.extract_strided_slice %9 {offsets = [0, 0], sizes = [2, 32], strides = [1, 1]} : vector<16x32xf32> to vector<2x32xf32>
    %33 = arith.addf %32, %21 : vector<2x32xf32>
    %34 = arith.negf %33 : vector<2x32xf32>
    %35 = math.exp %34 : vector<2x32xf32>
    %cst_24 = arith.constant 1.000000e+00 : f32
    %36 = vector.broadcast %cst_24 : f32 to vector<2x32xf32>
    %37 = arith.addf %36, %35 : vector<2x32xf32>
    %38 = arith.divf %36, %37 : vector<2x32xf32>
    %39 = vector.extract_strided_slice %10 {offsets = [0, 0], sizes = [2, 32], strides = [1, 1]} : vector<16x32xf32> to vector<2x32xf32>
    %40 = arith.mulf %31, %24 : vector<2x32xf32>
    %41 = arith.addf %39, %40 : vector<2x32xf32>
    %42 = math.tanh %41 : vector<2x32xf32>
    %cst_25 = arith.constant 1.000000e+00 : f32
    %43 = vector.broadcast %cst_25 : f32 to vector<2x32xf32>
    %44 = arith.subf %43, %38 : vector<2x32xf32>
    %45 = arith.mulf %44, %42 : vector<2x32xf32>
    %46 = arith.mulf %38, %19 : vector<2x32xf32>
    %47 = arith.addf %45, %46 : vector<2x32xf32>
    %c0_26 = arith.constant 0 : index
    %c0_27 = arith.constant 0 : index
    %48 = vector.load %arg15[%c0_26, %c0_27] : memref<16x32xf32, #tpu.memory_space<vmem>>, vector<2x32xf32>
    tpu.vector_store %arg15[%c0_26, %c0_27], %47 {strides = array<i32>} : memref<16x32xf32, #tpu.memory_space<vmem>>, vector<2x32xf32>,
    %cst_28 = arith.constant dense<0.000000e+00> : vector<2x32xf32>
    %49 = tpu.matmul %47, %12, %cst_28 {dimension_numbers = #tpu.dot_dimension_numbers<[1], [0], [0], [1], [0, 0, 1, 1], [], []>} : vector<2x32xf32>, vector<32x32xf32>, vector<2x32xf32> -> vector<2x32xf32>
    %cst_29 = arith.constant dense<0.000000e+00> : vector<2x32xf32>
    %50 = tpu.matmul %47, %14, %cst_29 {dimension_numbers = #tpu.dot_dimension_numbers<[1], [0], [0], [1], [0, 0, 1, 1], [], []>} : vector<2x32xf32>, vector<32x32xf32>, vector<2x32xf32> -> vector<2x32xf32>
    %cst_30 = arith.constant dense<0.000000e+00> : vector<2x32xf32>
    %51 = tpu.matmul %47, %16, %cst_30 {dimension_numbers = #tpu.dot_dimension_numbers<[1], [0], [0], [1], [0, 0, 1, 1], [], []>} : vector<2x32xf32>, vector<32x32xf32>, vector<2x32xf32> -> vector<2x32xf32>
    %52 = vector.broadcast %18 : vector<1x32xf32> to vector<2x32xf32>
    %53 = arith.addf %51, %52 : vector<2x32xf32>
    %54 = vector.extract_strided_slice %8 {offsets = [2, 0], sizes = [2, 32], strides = [1, 1]} : vector<16x32xf32> to vector<2x32xf32>
    %55 = arith.addf %54, %49 : vector<2x32xf32>
    %56 = arith.negf %55 : vector<2x32xf32>
    %57 = math.exp %56 : vector<2x32xf32>
    %cst_31 = arith.constant 1.000000e+00 : f32
    %58 = vector.broadcast %cst_31 : f32 to vector<2x32xf32>
    %59 = arith.addf %58, %57 : vector<2x32xf32>
    %60 = arith.divf %58, %59 : vector<2x32xf32>
    %61 = vector.extract_strided_slice %9 {offsets = [2, 0], sizes = [2, 32], strides = [1, 1]} : vector<16x32xf32> to vector<2x32xf32>
    %62 = arith.addf %61, %50 : vector<2x32xf32>
    %63 = arith.negf %62 : vector<2x32xf32>
    %64 = math.exp %63 : vector<2x32xf32>
    %cst_32 = arith.constant 1.000000e+00 : f32
    %65 = vector.broadcast %cst_32 : f32 to vector<2x32xf32>
    %66 = arith.addf %65, %64 : vector<2x32xf32>
    %67 = arith.divf %65, %66 : vector<2x32xf32>
    %68 = vector.extract_strided_slice %10 {offsets = [2, 0], sizes = [2, 32], strides = [1, 1]} : vector<16x32xf32> to vector<2x32xf32>
    %69 = arith.mulf %60, %53 : vector<2x32xf32>
    %70 = arith.addf %68, %69 : vector<2x32xf32>
    %71 = math.tanh %70 : vector<2x32xf32>
    %cst_33 = arith.constant 1.000000e+00 : f32
    %72 = vector.broadcast %cst_33 : f32 to vector<2x32xf32>
    %73 = arith.subf %72, %67 : vector<2x32xf32>
    %74 = arith.mulf %73, %71 : vector<2x32xf32>
    %75 = arith.mulf %67, %47 : vector<2x32xf32>
    %76 = arith.addf %74, %75 : vector<2x32xf32>
    %c2 = arith.constant 2 : index
    %c0_34 = arith.constant 0 : index
    %77 = vector.load %arg15[%c2, %c0_34] : memref<16x32xf32, #tpu.memory_space<vmem>>, vector<2x32xf32>
    tpu.vector_store %arg15[%c2, %c0_34], %76 {strides = array<i32>} : memref<16x32xf32, #tpu.memory_space<vmem>>, vector<2x32xf32>,
    %cst_35 = arith.constant dense<0.000000e+00> : vector<2x32xf32>
    %78 = tpu.matmul %76, %12, %cst_35 {dimension_numbers = #tpu.dot_dimension_numbers<[1], [0], [0], [1], [0, 0, 1, 1], [], []>} : vector<2x32xf32>, vector<32x32xf32>, vector<2x32xf32> -> vector<2x32xf32>
    %cst_36 = arith.constant dense<0.000000e+00> : vector<2x32xf32>
    %79 = tpu.matmul %76, %14, %cst_36 {dimension_numbers = #tpu.dot_dimension_numbers<[1], [0], [0], [1], [0, 0, 1, 1], [], []>} : vector<2x32xf32>, vector<32x32xf32>, vector<2x32xf32> -> vector<2x32xf32>
    %cst_37 = arith.constant dense<0.000000e+00> : vector<2x32xf32>
    %80 = tpu.matmul %76, %16, %cst_37 {dimension_numbers = #tpu.dot_dimension_numbers<[1], [0], [0], [1], [0, 0, 1, 1], [], []>} : vector<2x32xf32>, vector<32x32xf32>, vector<2x32xf32> -> vector<2x32xf32>
    %81 = vector.broadcast %18 : vector<1x32xf32> to vector<2x32xf32>
    %82 = arith.addf %80, %81 : vector<2x32xf32>
    %83 = vector.extract_strided_slice %8 {offsets = [4, 0], sizes = [2, 32], strides = [1, 1]} : vector<16x32xf32> to vector<2x32xf32>
    %84 = arith.addf %83, %78 : vector<2x32xf32>
    %85 = arith.negf %84 : vector<2x32xf32>
    %86 = math.exp %85 : vector<2x32xf32>
    %cst_38 = arith.constant 1.000000e+00 : f32
    %87 = vector.broadcast %cst_38 : f32 to vector<2x32xf32>
    %88 = arith.addf %87, %86 : vector<2x32xf32>
    %89 = arith.divf %87, %88 : vector<2x32xf32>
    %90 = vector.extract_strided_slice %9 {offsets = [4, 0], sizes = [2, 32], strides = [1, 1]} : vector<16x32xf32> to vector<2x32xf32>
    %91 = arith.addf %90, %79 : vector<2x32xf32>
    %92 = arith.negf %91 : vector<2x32xf32>
    %93 = math.exp %92 : vector<2x32xf32>
    %cst_39 = arith.constant 1.000000e+00 : f32
    %94 = vector.broadcast %cst_39 : f32 to vector<2x32xf32>
    %95 = arith.addf %94, %93 : vector<2x32xf32>
    %96 = arith.divf %94, %95 : vector<2x32xf32>
    %97 = vector.extract_strided_slice %10 {offsets = [4, 0], sizes = [2, 32], strides = [1, 1]} : vector<16x32xf32> to vector<2x32xf32>
    %98 = arith.mulf %89, %82 : vector<2x32xf32>
    %99 = arith.addf %97, %98 : vector<2x32xf32>
    %100 = math.tanh %99 : vector<2x32xf32>
    %cst_40 = arith.constant 1.000000e+00 : f32
    %101 = vector.broadcast %cst_40 : f32 to vector<2x32xf32>
    %102 = arith.subf %101, %96 : vector<2x32xf32>
    %103 = arith.mulf %102, %100 : vector<2x32xf32>
    %104 = arith.mulf %96, %76 : vector<2x32xf32>
    %105 = arith.addf %103, %104 : vector<2x32xf32>
    %c4 = arith.constant 4 : index
    %c0_41 = arith.constant 0 : index
    %106 = vector.load %arg15[%c4, %c0_41] : memref<16x32xf32, #tpu.memory_space<vmem>>, vector<2x32xf32>
    tpu.vector_store %arg15[%c4, %c0_41], %105 {strides = array<i32>} : memref<16x32xf32, #tpu.memory_space<vmem>>, vector<2x32xf32>,
    %cst_42 = arith.constant dense<0.000000e+00> : vector<2x32xf32>
    %107 = tpu.matmul %105, %12, %cst_42 {dimension_numbers = #tpu.dot_dimension_numbers<[1], [0], [0], [1], [0, 0, 1, 1], [], []>} : vector<2x32xf32>, vector<32x32xf32>, vector<2x32xf32> -> vector<2x32xf32>
    %cst_43 = arith.constant dense<0.000000e+00> : vector<2x32xf32>
    %108 = tpu.matmul %105, %14, %cst_43 {dimension_numbers = #tpu.dot_dimension_numbers<[1], [0], [0], [1], [0, 0, 1, 1], [], []>} : vector<2x32xf32>, vector<32x32xf32>, vector<2x32xf32> -> vector<2x32xf32>
    %cst_44 = arith.constant dense<0.000000e+00> : vector<2x32xf32>
    %109 = tpu.matmul %105, %16, %cst_44 {dimension_numbers = #tpu.dot_dimension_numbers<[1], [0], [0], [1], [0, 0, 1, 1], [], []>} : vector<2x32xf32>, vector<32x32xf32>, vector<2x32xf32> -> vector<2x32xf32>
    %110 = vector.broadcast %18 : vector<1x32xf32> to vector<2x32xf32>
    %111 = arith.addf %109, %110 : vector<2x32xf32>
    %112 = vector.extract_strided_slice %8 {offsets = [6, 0], sizes = [2, 32], strides = [1, 1]} : vector<16x32xf32> to vector<2x32xf32>
    %113 = arith.addf %112, %107 : vector<2x32xf32>
    %114 = arith.negf %113 : vector<2x32xf32>
    %115 = math.exp %114 : vector<2x32xf32>
    %cst_45 = arith.constant 1.000000e+00 : f32
    %116 = vector.broadcast %cst_45 : f32 to vector<2x32xf32>
    %117 = arith.addf %116, %115 : vector<2x32xf32>
    %118 = arith.divf %116, %117 : vector<2x32xf32>
    %119 = vector.extract_strided_slice %9 {offsets = [6, 0], sizes = [2, 32], strides = [1, 1]} : vector<16x32xf32> to vector<2x32xf32>
    %120 = arith.addf %119, %108 : vector<2x32xf32>
    %121 = arith.negf %120 : vector<2x32xf32>
    %122 = math.exp %121 : vector<2x32xf32>
    %cst_46 = arith.constant 1.000000e+00 : f32
    %123 = vector.broadcast %cst_46 : f32 to vector<2x32xf32>
    %124 = arith.addf %123, %122 : vector<2x32xf32>
    %125 = arith.divf %123, %124 : vector<2x32xf32>
    %126 = vector.extract_strided_slice %10 {offsets = [6, 0], sizes = [2, 32], strides = [1, 1]} : vector<16x32xf32> to vector<2x32xf32>
    %127 = arith.mulf %118, %111 : vector<2x32xf32>
    %128 = arith.addf %126, %127 : vector<2x32xf32>
    %129 = math.tanh %128 : vector<2x32xf32>
    %cst_47 = arith.constant 1.000000e+00 : f32
    %130 = vector.broadcast %cst_47 : f32 to vector<2x32xf32>
    %131 = arith.subf %130, %125 : vector<2x32xf32>
    %132 = arith.mulf %131, %129 : vector<2x32xf32>
    %133 = arith.mulf %125, %105 : vector<2x32xf32>
    %134 = arith.addf %132, %133 : vector<2x32xf32>
    %c6 = arith.constant 6 : index
    %c0_48 = arith.constant 0 : index
    %135 = vector.load %arg15[%c6, %c0_48] : memref<16x32xf32, #tpu.memory_space<vmem>>, vector<2x32xf32>
    tpu.vector_store %arg15[%c6, %c0_48], %134 {strides = array<i32>} : memref<16x32xf32, #tpu.memory_space<vmem>>, vector<2x32xf32>,
    %cst_49 = arith.constant dense<0.000000e+00> : vector<2x32xf32>
    %136 = tpu.matmul %134, %12, %cst_49 {dimension_numbers = #tpu.dot_dimension_numbers<[1], [0], [0], [1], [0, 0, 1, 1], [], []>} : vector<2x32xf32>, vector<32x32xf32>, vector<2x32xf32> -> vector<2x32xf32>
    %cst_50 = arith.constant dense<0.000000e+00> : vector<2x32xf32>
    %137 = tpu.matmul %134, %14, %cst_50 {dimension_numbers = #tpu.dot_dimension_numbers<[1], [0], [0], [1], [0, 0, 1, 1], [], []>} : vector<2x32xf32>, vector<32x32xf32>, vector<2x32xf32> -> vector<2x32xf32>
    %cst_51 = arith.constant dense<0.000000e+00> : vector<2x32xf32>
    %138 = tpu.matmul %134, %16, %cst_51 {dimension_numbers = #tpu.dot_dimension_numbers<[1], [0], [0], [1], [0, 0, 1, 1], [], []>} : vector<2x32xf32>, vector<32x32xf32>, vector<2x32xf32> -> vector<2x32xf32>
    %139 = vector.broadcast %18 : vector<1x32xf32> to vector<2x32xf32>
    %140 = arith.addf %138, %139 : vector<2x32xf32>
    %141 = vector.extract_strided_slice %8 {offsets = [8, 0], sizes = [2, 32], strides = [1, 1]} : vector<16x32xf32> to vector<2x32xf32>
    %142 = arith.addf %141, %136 : vector<2x32xf32>
    %143 = arith.negf %142 : vector<2x32xf32>
    %144 = math.exp %143 : vector<2x32xf32>
    %cst_52 = arith.constant 1.000000e+00 : f32
    %145 = vector.broadcast %cst_52 : f32 to vector<2x32xf32>
    %146 = arith.addf %145, %144 : vector<2x32xf32>
    %147 = arith.divf %145, %146 : vector<2x32xf32>
    %148 = vector.extract_strided_slice %9 {offsets = [8, 0], sizes = [2, 32], strides = [1, 1]} : vector<16x32xf32> to vector<2x32xf32>
    %149 = arith.addf %148, %137 : vector<2x32xf32>
    %150 = arith.negf %149 : vector<2x32xf32>
    %151 = math.exp %150 : vector<2x32xf32>
    %cst_53 = arith.constant 1.000000e+00 : f32
    %152 = vector.broadcast %cst_53 : f32 to vector<2x32xf32>
    %153 = arith.addf %152, %151 : vector<2x32xf32>
    %154 = arith.divf %152, %153 : vector<2x32xf32>
    %155 = vector.extract_strided_slice %10 {offsets = [8, 0], sizes = [2, 32], strides = [1, 1]} : vector<16x32xf32> to vector<2x32xf32>
    %156 = arith.mulf %147, %140 : vector<2x32xf32>
    %157 = arith.addf %155, %156 : vector<2x32xf32>
    %158 = math.tanh %157 : vector<2x32xf32>
    %cst_54 = arith.constant 1.000000e+00 : f32
    %159 = vector.broadcast %cst_54 : f32 to vector<2x32xf32>
    %160 = arith.subf %159, %154 : vector<2x32xf32>
    %161 = arith.mulf %160, %158 : vector<2x32xf32>
    %162 = arith.mulf %154, %134 : vector<2x32xf32>
    %163 = arith.addf %161, %162 : vector<2x32xf32>
    %c8 = arith.constant 8 : index
    %c0_55 = arith.constant 0 : index
    %164 = vector.load %arg15[%c8, %c0_55] : memref<16x32xf32, #tpu.memory_space<vmem>>, vector<2x32xf32>
    tpu.vector_store %arg15[%c8, %c0_55], %163 {strides = array<i32>} : memref<16x32xf32, #tpu.memory_space<vmem>>, vector<2x32xf32>,
    %cst_56 = arith.constant dense<0.000000e+00> : vector<2x32xf32>
    %165 = tpu.matmul %163, %12, %cst_56 {dimension_numbers = #tpu.dot_dimension_numbers<[1], [0], [0], [1], [0, 0, 1, 1], [], []>} : vector<2x32xf32>, vector<32x32xf32>, vector<2x32xf32> -> vector<2x32xf32>
    %cst_57 = arith.constant dense<0.000000e+00> : vector<2x32xf32>
    %166 = tpu.matmul %163, %14, %cst_57 {dimension_numbers = #tpu.dot_dimension_numbers<[1], [0], [0], [1], [0, 0, 1, 1], [], []>} : vector<2x32xf32>, vector<32x32xf32>, vector<2x32xf32> -> vector<2x32xf32>
    %cst_58 = arith.constant dense<0.000000e+00> : vector<2x32xf32>
    %167 = tpu.matmul %163, %16, %cst_58 {dimension_numbers = #tpu.dot_dimension_numbers<[1], [0], [0], [1], [0, 0, 1, 1], [], []>} : vector<2x32xf32>, vector<32x32xf32>, vector<2x32xf32> -> vector<2x32xf32>
    %168 = vector.broadcast %18 : vector<1x32xf32> to vector<2x32xf32>
    %169 = arith.addf %167, %168 : vector<2x32xf32>
    %170 = vector.extract_strided_slice %8 {offsets = [10, 0], sizes = [2, 32], strides = [1, 1]} : vector<16x32xf32> to vector<2x32xf32>
    %171 = arith.addf %170, %165 : vector<2x32xf32>
    %172 = arith.negf %171 : vector<2x32xf32>
    %173 = math.exp %172 : vector<2x32xf32>
    %cst_59 = arith.constant 1.000000e+00 : f32
    %174 = vector.broadcast %cst_59 : f32 to vector<2x32xf32>
    %175 = arith.addf %174, %173 : vector<2x32xf32>
    %176 = arith.divf %174, %175 : vector<2x32xf32>
    %177 = vector.extract_strided_slice %9 {offsets = [10, 0], sizes = [2, 32], strides = [1, 1]} : vector<16x32xf32> to vector<2x32xf32>
    %178 = arith.addf %177, %166 : vector<2x32xf32>
    %179 = arith.negf %178 : vector<2x32xf32>
    %180 = math.exp %179 : vector<2x32xf32>
    %cst_60 = arith.constant 1.000000e+00 : f32
    %181 = vector.broadcast %cst_60 : f32 to vector<2x32xf32>
    %182 = arith.addf %181, %180 : vector<2x32xf32>
    %183 = arith.divf %181, %182 : vector<2x32xf32>
    %184 = vector.extract_strided_slice %10 {offsets = [10, 0], sizes = [2, 32], strides = [1, 1]} : vector<16x32xf32> to vector<2x32xf32>
    %185 = arith.mulf %176, %169 : vector<2x32xf32>
    %186 = arith.addf %184, %185 : vector<2x32xf32>
    %187 = math.tanh %186 : vector<2x32xf32>
    %cst_61 = arith.constant 1.000000e+00 : f32
    %188 = vector.broadcast %cst_61 : f32 to vector<2x32xf32>
    %189 = arith.subf %188, %183 : vector<2x32xf32>
    %190 = arith.mulf %189, %187 : vector<2x32xf32>
    %191 = arith.mulf %183, %163 : vector<2x32xf32>
    %192 = arith.addf %190, %191 : vector<2x32xf32>
    %c10 = arith.constant 10 : index
    %c0_62 = arith.constant 0 : index
    %193 = vector.load %arg15[%c10, %c0_62] : memref<16x32xf32, #tpu.memory_space<vmem>>, vector<2x32xf32>
    tpu.vector_store %arg15[%c10, %c0_62], %192 {strides = array<i32>} : memref<16x32xf32, #tpu.memory_space<vmem>>, vector<2x32xf32>,
    %cst_63 = arith.constant dense<0.000000e+00> : vector<2x32xf32>
    %194 = tpu.matmul %192, %12, %cst_63 {dimension_numbers = #tpu.dot_dimension_numbers<[1], [0], [0], [1], [0, 0, 1, 1], [], []>} : vector<2x32xf32>, vector<32x32xf32>, vector<2x32xf32> -> vector<2x32xf32>
    %cst_64 = arith.constant dense<0.000000e+00> : vector<2x32xf32>
    %195 = tpu.matmul %192, %14, %cst_64 {dimension_numbers = #tpu.dot_dimension_numbers<[1], [0], [0], [1], [0, 0, 1, 1], [], []>} : vector<2x32xf32>, vector<32x32xf32>, vector<2x32xf32> -> vector<2x32xf32>
    %cst_65 = arith.constant dense<0.000000e+00> : vector<2x32xf32>
    %196 = tpu.matmul %192, %16, %cst_65 {dimension_numbers = #tpu.dot_dimension_numbers<[1], [0], [0], [1], [0, 0, 1, 1], [], []>} : vector<2x32xf32>, vector<32x32xf32>, vector<2x32xf32> -> vector<2x32xf32>
    %197 = vector.broadcast %18 : vector<1x32xf32> to vector<2x32xf32>
    %198 = arith.addf %196, %197 : vector<2x32xf32>
    %199 = vector.extract_strided_slice %8 {offsets = [12, 0], sizes = [2, 32], strides = [1, 1]} : vector<16x32xf32> to vector<2x32xf32>
    %200 = arith.addf %199, %194 : vector<2x32xf32>
    %201 = arith.negf %200 : vector<2x32xf32>
    %202 = math.exp %201 : vector<2x32xf32>
    %cst_66 = arith.constant 1.000000e+00 : f32
    %203 = vector.broadcast %cst_66 : f32 to vector<2x32xf32>
    %204 = arith.addf %203, %202 : vector<2x32xf32>
    %205 = arith.divf %203, %204 : vector<2x32xf32>
    %206 = vector.extract_strided_slice %9 {offsets = [12, 0], sizes = [2, 32], strides = [1, 1]} : vector<16x32xf32> to vector<2x32xf32>
    %207 = arith.addf %206, %195 : vector<2x32xf32>
    %208 = arith.negf %207 : vector<2x32xf32>
    %209 = math.exp %208 : vector<2x32xf32>
    %cst_67 = arith.constant 1.000000e+00 : f32
    %210 = vector.broadcast %cst_67 : f32 to vector<2x32xf32>
    %211 = arith.addf %210, %209 : vector<2x32xf32>
    %212 = arith.divf %210, %211 : vector<2x32xf32>
    %213 = vector.extract_strided_slice %10 {offsets = [12, 0], sizes = [2, 32], strides = [1, 1]} : vector<16x32xf32> to vector<2x32xf32>
    %214 = arith.mulf %205, %198 : vector<2x32xf32>
    %215 = arith.addf %213, %214 : vector<2x32xf32>
    %216 = math.tanh %215 : vector<2x32xf32>
    %cst_68 = arith.constant 1.000000e+00 : f32
    %217 = vector.broadcast %cst_68 : f32 to vector<2x32xf32>
    %218 = arith.subf %217, %212 : vector<2x32xf32>
    %219 = arith.mulf %218, %216 : vector<2x32xf32>
    %220 = arith.mulf %212, %192 : vector<2x32xf32>
    %221 = arith.addf %219, %220 : vector<2x32xf32>
    %c12 = arith.constant 12 : index
    %c0_69 = arith.constant 0 : index
    %222 = vector.load %arg15[%c12, %c0_69] : memref<16x32xf32, #tpu.memory_space<vmem>>, vector<2x32xf32>
    tpu.vector_store %arg15[%c12, %c0_69], %221 {strides = array<i32>} : memref<16x32xf32, #tpu.memory_space<vmem>>, vector<2x32xf32>,
    %cst_70 = arith.constant dense<0.000000e+00> : vector<2x32xf32>
    %223 = tpu.matmul %221, %12, %cst_70 {dimension_numbers = #tpu.dot_dimension_numbers<[1], [0], [0], [1], [0, 0, 1, 1], [], []>} : vector<2x32xf32>, vector<32x32xf32>, vector<2x32xf32> -> vector<2x32xf32>
    %cst_71 = arith.constant dense<0.000000e+00> : vector<2x32xf32>
    %224 = tpu.matmul %221, %14, %cst_71 {dimension_numbers = #tpu.dot_dimension_numbers<[1], [0], [0], [1], [0, 0, 1, 1], [], []>} : vector<2x32xf32>, vector<32x32xf32>, vector<2x32xf32> -> vector<2x32xf32>
    %cst_72 = arith.constant dense<0.000000e+00> : vector<2x32xf32>
    %225 = tpu.matmul %221, %16, %cst_72 {dimension_numbers = #tpu.dot_dimension_numbers<[1], [0], [0], [1], [0, 0, 1, 1], [], []>} : vector<2x32xf32>, vector<32x32xf32>, vector<2x32xf32> -> vector<2x32xf32>
    %226 = vector.broadcast %18 : vector<1x32xf32> to vector<2x32xf32>
    %227 = arith.addf %225, %226 : vector<2x32xf32>
    %228 = vector.extract_strided_slice %8 {offsets = [14, 0], sizes = [2, 32], strides = [1, 1]} : vector<16x32xf32> to vector<2x32xf32>
    %229 = arith.addf %228, %223 : vector<2x32xf32>
    %230 = arith.negf %229 : vector<2x32xf32>
    %231 = math.exp %230 : vector<2x32xf32>
    %cst_73 = arith.constant 1.000000e+00 : f32
    %232 = vector.broadcast %cst_73 : f32 to vector<2x32xf32>
    %233 = arith.addf %232, %231 : vector<2x32xf32>
    %234 = arith.divf %232, %233 : vector<2x32xf32>
    %235 = vector.extract_strided_slice %9 {offsets = [14, 0], sizes = [2, 32], strides = [1, 1]} : vector<16x32xf32> to vector<2x32xf32>
    %236 = arith.addf %235, %224 : vector<2x32xf32>
    %237 = arith.negf %236 : vector<2x32xf32>
    %238 = math.exp %237 : vector<2x32xf32>
    %cst_74 = arith.constant 1.000000e+00 : f32
    %239 = vector.broadcast %cst_74 : f32 to vector<2x32xf32>
    %240 = arith.addf %239, %238 : vector<2x32xf32>
    %241 = arith.divf %239, %240 : vector<2x32xf32>
    %242 = vector.extract_strided_slice %10 {offsets = [14, 0], sizes = [2, 32], strides = [1, 1]} : vector<16x32xf32> to vector<2x32xf32>
    %243 = arith.mulf %234, %227 : vector<2x32xf32>
    %244 = arith.addf %242, %243 : vector<2x32xf32>
    %245 = math.tanh %244 : vector<2x32xf32>
    %cst_75 = arith.constant 1.000000e+00 : f32
    %246 = vector.broadcast %cst_75 : f32 to vector<2x32xf32>
    %247 = arith.subf %246, %241 : vector<2x32xf32>
    %248 = arith.mulf %247, %245 : vector<2x32xf32>
    %249 = arith.mulf %241, %221 : vector<2x32xf32>
    %250 = arith.addf %248, %249 : vector<2x32xf32>
    %c14 = arith.constant 14 : index
    %c0_76 = arith.constant 0 : index
    %251 = vector.load %arg15[%c14, %c0_76] : memref<16x32xf32, #tpu.memory_space<vmem>>, vector<2x32xf32>
    tpu.vector_store %arg15[%c14, %c0_76], %250 {strides = array<i32>} : memref<16x32xf32, #tpu.memory_space<vmem>>, vector<2x32xf32>,
    %252 = math.tanh %250 : vector<2x32xf32>
    %c0_77 = arith.constant 0 : index
    %253 = memref.load %arg12[%c0_77] : memref<4xf32, #tpu.memory_space<smem>>
    %254 = vector.broadcast %253 : f32 to vector<2x32xf32>
    %255 = arith.mulf %252, %254 : vector<2x32xf32>
    %256 = arith.addf %0, %255 : vector<2x32xf32>
    %c0_78 = arith.constant 0 : index
    %c0_79 = arith.constant 0 : index
    %257 = vector.load %arg15[%c0_78, %c0_79] : memref<16x32xf32, #tpu.memory_space<vmem>>, vector<16x32xf32>
    %c0_80 = arith.constant 0 : index
    %c0_81 = arith.constant 0 : index
    %c0_82 = arith.constant 0 : index
    %258 = vector.load %arg2[%c0_80, %c0_81, %c0_82] : memref<3x32x96xf32, #tpu.memory_space<vmem>>, vector<1x32x96xf32>
    %259 = vector.shape_cast %258 : vector<1x32x96xf32> to vector<32x96xf32>
    %cst_83 = arith.constant dense<0.000000e+00> : vector<16x96xf32>
    %260 = tpu.matmul %257, %259, %cst_83 {dimension_numbers = #tpu.dot_dimension_numbers<[1], [0], [0], [1], [0, 0, 1, 1], [], []>} : vector<16x32xf32>, vector<32x96xf32>, vector<16x96xf32> -> vector<16x96xf32>
    %c1 = arith.constant 1 : index
    %c0_84 = arith.constant 0 : index
    %c0_85 = arith.constant 0 : index
    %261 = vector.load %arg3[%c1, %c0_84, %c0_85] : memref<4x1x96xf32, #tpu.memory_space<vmem>>, vector<1x1x96xf32>
    %262 = vector.shape_cast %261 : vector<1x1x96xf32> to vector<1x96xf32>
    %263 = vector.broadcast %262 : vector<1x96xf32> to vector<16x96xf32>
    %264 = arith.addf %260, %263 : vector<16x96xf32>
    %265 = vector.extract_strided_slice %264 {offsets = [0, 0], sizes = [16, 32], strides = [1, 1]} : vector<16x96xf32> to vector<16x32xf32>
    %266 = vector.extract_strided_slice %264 {offsets = [0, 32], sizes = [16, 32], strides = [1, 1]} : vector<16x96xf32> to vector<16x32xf32>
    %267 = vector.extract_strided_slice %264 {offsets = [0, 64], sizes = [16, 32], strides = [1, 1]} : vector<16x96xf32> to vector<16x32xf32>
    %c1_86 = arith.constant 1 : index
    %c0_87 = arith.constant 0 : index
    %c0_88 = arith.constant 0 : index
    %268 = vector.load %arg4[%c1_86, %c0_87, %c0_88] : memref<4x32x32xf32, #tpu.memory_space<vmem>>, vector<1x32x32xf32>
    %269 = vector.shape_cast %268 : vector<1x32x32xf32> to vector<32x32xf32>
    %c1_89 = arith.constant 1 : index
    %c0_90 = arith.constant 0 : index
    %c0_91 = arith.constant 0 : index
    %270 = vector.load %arg5[%c1_89, %c0_90, %c0_91] : memref<4x32x32xf32, #tpu.memory_space<vmem>>, vector<1x32x32xf32>
    %271 = vector.shape_cast %270 : vector<1x32x32xf32> to vector<32x32xf32>
    %c1_92 = arith.constant 1 : index
    %c0_93 = arith.constant 0 : index
    %c0_94 = arith.constant 0 : index
    %272 = vector.load %arg6[%c1_92, %c0_93, %c0_94] : memref<4x32x32xf32, #tpu.memory_space<vmem>>, vector<1x32x32xf32>
    %273 = vector.shape_cast %272 : vector<1x32x32xf32> to vector<32x32xf32>
    %c1_95 = arith.constant 1 : index
    %c0_96 = arith.constant 0 : index
    %c0_97 = arith.constant 0 : index
    %274 = vector.load %arg7[%c1_95, %c0_96, %c0_97] : memref<4x1x32xf32, #tpu.memory_space<vmem>>, vector<1x1x32xf32>
    %275 = vector.shape_cast %274 : vector<1x1x32xf32> to vector<1x32xf32>
    %cst_98 = arith.constant 0.000000e+00 : f32
    %276 = vector.broadcast %cst_98 : f32 to vector<2x32xf32>
    %cst_99 = arith.constant dense<0.000000e+00> : vector<2x32xf32>
    %277 = tpu.matmul %276, %269, %cst_99 {dimension_numbers = #tpu.dot_dimension_numbers<[1], [0], [0], [1], [0, 0, 1, 1], [], []>} : vector<2x32xf32>, vector<32x32xf32>, vector<2x32xf32> -> vector<2x32xf32>
    %cst_100 = arith.constant dense<0.000000e+00> : vector<2x32xf32>
    %278 = tpu.matmul %276, %271, %cst_100 {dimension_numbers = #tpu.dot_dimension_numbers<[1], [0], [0], [1], [0, 0, 1, 1], [], []>} : vector<2x32xf32>, vector<32x32xf32>, vector<2x32xf32> -> vector<2x32xf32>
    %cst_101 = arith.constant dense<0.000000e+00> : vector<2x32xf32>
    %279 = tpu.matmul %276, %273, %cst_101 {dimension_numbers = #tpu.dot_dimension_numbers<[1], [0], [0], [1], [0, 0, 1, 1], [], []>} : vector<2x32xf32>, vector<32x32xf32>, vector<2x32xf32> -> vector<2x32xf32>
    %280 = vector.broadcast %275 : vector<1x32xf32> to vector<2x32xf32>
    %281 = arith.addf %279, %280 : vector<2x32xf32>
    %282 = vector.extract_strided_slice %265 {offsets = [0, 0], sizes = [2, 32], strides = [1, 1]} : vector<16x32xf32> to vector<2x32xf32>
    %283 = arith.addf %282, %277 : vector<2x32xf32>
    %284 = arith.negf %283 : vector<2x32xf32>
    %285 = math.exp %284 : vector<2x32xf32>
    %cst_102 = arith.constant 1.000000e+00 : f32
    %286 = vector.broadcast %cst_102 : f32 to vector<2x32xf32>
    %287 = arith.addf %286, %285 : vector<2x32xf32>
    %288 = arith.divf %286, %287 : vector<2x32xf32>
    %289 = vector.extract_strided_slice %266 {offsets = [0, 0], sizes = [2, 32], strides = [1, 1]} : vector<16x32xf32> to vector<2x32xf32>
    %290 = arith.addf %289, %278 : vector<2x32xf32>
    %291 = arith.negf %290 : vector<2x32xf32>
    %292 = math.exp %291 : vector<2x32xf32>
    %cst_103 = arith.constant 1.000000e+00 : f32
    %293 = vector.broadcast %cst_103 : f32 to vector<2x32xf32>
    %294 = arith.addf %293, %292 : vector<2x32xf32>
    %295 = arith.divf %293, %294 : vector<2x32xf32>
    %296 = vector.extract_strided_slice %267 {offsets = [0, 0], sizes = [2, 32], strides = [1, 1]} : vector<16x32xf32> to vector<2x32xf32>
    %297 = arith.mulf %288, %281 : vector<2x32xf32>
    %298 = arith.addf %296, %297 : vector<2x32xf32>
    %299 = math.tanh %298 : vector<2x32xf32>
    %cst_104 = arith.constant 1.000000e+00 : f32
    %300 = vector.broadcast %cst_104 : f32 to vector<2x32xf32>
    %301 = arith.subf %300, %295 : vector<2x32xf32>
    %302 = arith.mulf %301, %299 : vector<2x32xf32>
    %303 = arith.mulf %295, %276 : vector<2x32xf32>
    %304 = arith.addf %302, %303 : vector<2x32xf32>
    %c0_105 = arith.constant 0 : index
    %c0_106 = arith.constant 0 : index
    %305 = vector.load %arg16[%c0_105, %c0_106] : memref<16x32xf32, #tpu.memory_space<vmem>>, vector<2x32xf32>
    tpu.vector_store %arg16[%c0_105, %c0_106], %304 {strides = array<i32>} : memref<16x32xf32, #tpu.memory_space<vmem>>, vector<2x32xf32>,
    %cst_107 = arith.constant dense<0.000000e+00> : vector<2x32xf32>
    %306 = tpu.matmul %304, %269, %cst_107 {dimension_numbers = #tpu.dot_dimension_numbers<[1], [0], [0], [1], [0, 0, 1, 1], [], []>} : vector<2x32xf32>, vector<32x32xf32>, vector<2x32xf32> -> vector<2x32xf32>
    %cst_108 = arith.constant dense<0.000000e+00> : vector<2x32xf32>
    %307 = tpu.matmul %304, %271, %cst_108 {dimension_numbers = #tpu.dot_dimension_numbers<[1], [0], [0], [1], [0, 0, 1, 1], [], []>} : vector<2x32xf32>, vector<32x32xf32>, vector<2x32xf32> -> vector<2x32xf32>
    %cst_109 = arith.constant dense<0.000000e+00> : vector<2x32xf32>
    %308 = tpu.matmul %304, %273, %cst_109 {dimension_numbers = #tpu.dot_dimension_numbers<[1], [0], [0], [1], [0, 0, 1, 1], [], []>} : vector<2x32xf32>, vector<32x32xf32>, vector<2x32xf32> -> vector<2x32xf32>
    %309 = vector.broadcast %275 : vector<1x32xf32> to vector<2x32xf32>
    %310 = arith.addf %308, %309 : vector<2x32xf32>
    %311 = vector.extract_strided_slice %265 {offsets = [2, 0], sizes = [2, 32], strides = [1, 1]} : vector<16x32xf32> to vector<2x32xf32>
    %312 = arith.addf %311, %306 : vector<2x32xf32>
    %313 = arith.negf %312 : vector<2x32xf32>
    %314 = math.exp %313 : vector<2x32xf32>
    %cst_110 = arith.constant 1.000000e+00 : f32
    %315 = vector.broadcast %cst_110 : f32 to vector<2x32xf32>
    %316 = arith.addf %315, %314 : vector<2x32xf32>
    %317 = arith.divf %315, %316 : vector<2x32xf32>
    %318 = vector.extract_strided_slice %266 {offsets = [2, 0], sizes = [2, 32], strides = [1, 1]} : vector<16x32xf32> to vector<2x32xf32>
    %319 = arith.addf %318, %307 : vector<2x32xf32>
    %320 = arith.negf %319 : vector<2x32xf32>
    %321 = math.exp %320 : vector<2x32xf32>
    %cst_111 = arith.constant 1.000000e+00 : f32
    %322 = vector.broadcast %cst_111 : f32 to vector<2x32xf32>
    %323 = arith.addf %322, %321 : vector<2x32xf32>
    %324 = arith.divf %322, %323 : vector<2x32xf32>
    %325 = vector.extract_strided_slice %267 {offsets = [2, 0], sizes = [2, 32], strides = [1, 1]} : vector<16x32xf32> to vector<2x32xf32>
    %326 = arith.mulf %317, %310 : vector<2x32xf32>
    %327 = arith.addf %325, %326 : vector<2x32xf32>
    %328 = math.tanh %327 : vector<2x32xf32>
    %cst_112 = arith.constant 1.000000e+00 : f32
    %329 = vector.broadcast %cst_112 : f32 to vector<2x32xf32>
    %330 = arith.subf %329, %324 : vector<2x32xf32>
    %331 = arith.mulf %330, %328 : vector<2x32xf32>
    %332 = arith.mulf %324, %304 : vector<2x32xf32>
    %333 = arith.addf %331, %332 : vector<2x32xf32>
    %c2_113 = arith.constant 2 : index
    %c0_114 = arith.constant 0 : index
    %334 = vector.load %arg16[%c2_113, %c0_114] : memref<16x32xf32, #tpu.memory_space<vmem>>, vector<2x32xf32>
    tpu.vector_store %arg16[%c2_113, %c0_114], %333 {strides = array<i32>} : memref<16x32xf32, #tpu.memory_space<vmem>>, vector<2x32xf32>,
    %cst_115 = arith.constant dense<0.000000e+00> : vector<2x32xf32>
    %335 = tpu.matmul %333, %269, %cst_115 {dimension_numbers = #tpu.dot_dimension_numbers<[1], [0], [0], [1], [0, 0, 1, 1], [], []>} : vector<2x32xf32>, vector<32x32xf32>, vector<2x32xf32> -> vector<2x32xf32>
    %cst_116 = arith.constant dense<0.000000e+00> : vector<2x32xf32>
    %336 = tpu.matmul %333, %271, %cst_116 {dimension_numbers = #tpu.dot_dimension_numbers<[1], [0], [0], [1], [0, 0, 1, 1], [], []>} : vector<2x32xf32>, vector<32x32xf32>, vector<2x32xf32> -> vector<2x32xf32>
    %cst_117 = arith.constant dense<0.000000e+00> : vector<2x32xf32>
    %337 = tpu.matmul %333, %273, %cst_117 {dimension_numbers = #tpu.dot_dimension_numbers<[1], [0], [0], [1], [0, 0, 1, 1], [], []>} : vector<2x32xf32>, vector<32x32xf32>, vector<2x32xf32> -> vector<2x32xf32>
    %338 = vector.broadcast %275 : vector<1x32xf32> to vector<2x32xf32>
    %339 = arith.addf %337, %338 : vector<2x32xf32>
    %340 = vector.extract_strided_slice %265 {offsets = [4, 0], sizes = [2, 32], strides = [1, 1]} : vector<16x32xf32> to vector<2x32xf32>
    %341 = arith.addf %340, %335 : vector<2x32xf32>
    %342 = arith.negf %341 : vector<2x32xf32>
    %343 = math.exp %342 : vector<2x32xf32>
    %cst_118 = arith.constant 1.000000e+00 : f32
    %344 = vector.broadcast %cst_118 : f32 to vector<2x32xf32>
    %345 = arith.addf %344, %343 : vector<2x32xf32>
    %346 = arith.divf %344, %345 : vector<2x32xf32>
    %347 = vector.extract_strided_slice %266 {offsets = [4, 0], sizes = [2, 32], strides = [1, 1]} : vector<16x32xf32> to vector<2x32xf32>
    %348 = arith.addf %347, %336 : vector<2x32xf32>
    %349 = arith.negf %348 : vector<2x32xf32>
    %350 = math.exp %349 : vector<2x32xf32>
    %cst_119 = arith.constant 1.000000e+00 : f32
    %351 = vector.broadcast %cst_119 : f32 to vector<2x32xf32>
    %352 = arith.addf %351, %350 : vector<2x32xf32>
    %353 = arith.divf %351, %352 : vector<2x32xf32>
    %354 = vector.extract_strided_slice %267 {offsets = [4, 0], sizes = [2, 32], strides = [1, 1]} : vector<16x32xf32> to vector<2x32xf32>
    %355 = arith.mulf %346, %339 : vector<2x32xf32>
    %356 = arith.addf %354, %355 : vector<2x32xf32>
    %357 = math.tanh %356 : vector<2x32xf32>
    %cst_120 = arith.constant 1.000000e+00 : f32
    %358 = vector.broadcast %cst_120 : f32 to vector<2x32xf32>
    %359 = arith.subf %358, %353 : vector<2x32xf32>
    %360 = arith.mulf %359, %357 : vector<2x32xf32>
    %361 = arith.mulf %353, %333 : vector<2x32xf32>
    %362 = arith.addf %360, %361 : vector<2x32xf32>
    %c4_121 = arith.constant 4 : index
    %c0_122 = arith.constant 0 : index
    %363 = vector.load %arg16[%c4_121, %c0_122] : memref<16x32xf32, #tpu.memory_space<vmem>>, vector<2x32xf32>
    tpu.vector_store %arg16[%c4_121, %c0_122], %362 {strides = array<i32>} : memref<16x32xf32, #tpu.memory_space<vmem>>, vector<2x32xf32>,
    %cst_123 = arith.constant dense<0.000000e+00> : vector<2x32xf32>
    %364 = tpu.matmul %362, %269, %cst_123 {dimension_numbers = #tpu.dot_dimension_numbers<[1], [0], [0], [1], [0, 0, 1, 1], [], []>} : vector<2x32xf32>, vector<32x32xf32>, vector<2x32xf32> -> vector<2x32xf32>
    %cst_124 = arith.constant dense<0.000000e+00> : vector<2x32xf32>
    %365 = tpu.matmul %362, %271, %cst_124 {dimension_numbers = #tpu.dot_dimension_numbers<[1], [0], [0], [1], [0, 0, 1, 1], [], []>} : vector<2x32xf32>, vector<32x32xf32>, vector<2x32xf32> -> vector<2x32xf32>
    %cst_125 = arith.constant dense<0.000000e+00> : vector<2x32xf32>
    %366 = tpu.matmul %362, %273, %cst_125 {dimension_numbers = #tpu.dot_dimension_numbers<[1], [0], [0], [1], [0, 0, 1, 1], [], []>} : vector<2x32xf32>, vector<32x32xf32>, vector<2x32xf32> -> vector<2x32xf32>
    %367 = vector.broadcast %275 : vector<1x32xf32> to vector<2x32xf32>
    %368 = arith.addf %366, %367 : vector<2x32xf32>
    %369 = vector.extract_strided_slice %265 {offsets = [6, 0], sizes = [2, 32], strides = [1, 1]} : vector<16x32xf32> to vector<2x32xf32>
    %370 = arith.addf %369, %364 : vector<2x32xf32>
    %371 = arith.negf %370 : vector<2x32xf32>
    %372 = math.exp %371 : vector<2x32xf32>
    %cst_126 = arith.constant 1.000000e+00 : f32
    %373 = vector.broadcast %cst_126 : f32 to vector<2x32xf32>
    %374 = arith.addf %373, %372 : vector<2x32xf32>
    %375 = arith.divf %373, %374 : vector<2x32xf32>
    %376 = vector.extract_strided_slice %266 {offsets = [6, 0], sizes = [2, 32], strides = [1, 1]} : vector<16x32xf32> to vector<2x32xf32>
    %377 = arith.addf %376, %365 : vector<2x32xf32>
    %378 = arith.negf %377 : vector<2x32xf32>
    %379 = math.exp %378 : vector<2x32xf32>
    %cst_127 = arith.constant 1.000000e+00 : f32
    %380 = vector.broadcast %cst_127 : f32 to vector<2x32xf32>
    %381 = arith.addf %380, %379 : vector<2x32xf32>
    %382 = arith.divf %380, %381 : vector<2x32xf32>
    %383 = vector.extract_strided_slice %267 {offsets = [6, 0], sizes = [2, 32], strides = [1, 1]} : vector<16x32xf32> to vector<2x32xf32>
    %384 = arith.mulf %375, %368 : vector<2x32xf32>
    %385 = arith.addf %383, %384 : vector<2x32xf32>
    %386 = math.tanh %385 : vector<2x32xf32>
    %cst_128 = arith.constant 1.000000e+00 : f32
    %387 = vector.broadcast %cst_128 : f32 to vector<2x32xf32>
    %388 = arith.subf %387, %382 : vector<2x32xf32>
    %389 = arith.mulf %388, %386 : vector<2x32xf32>
    %390 = arith.mulf %382, %362 : vector<2x32xf32>
    %391 = arith.addf %389, %390 : vector<2x32xf32>
    %c6_129 = arith.constant 6 : index
    %c0_130 = arith.constant 0 : index
    %392 = vector.load %arg16[%c6_129, %c0_130] : memref<16x32xf32, #tpu.memory_space<vmem>>, vector<2x32xf32>
    tpu.vector_store %arg16[%c6_129, %c0_130], %391 {strides = array<i32>} : memref<16x32xf32, #tpu.memory_space<vmem>>, vector<2x32xf32>,
    %cst_131 = arith.constant dense<0.000000e+00> : vector<2x32xf32>
    %393 = tpu.matmul %391, %269, %cst_131 {dimension_numbers = #tpu.dot_dimension_numbers<[1], [0], [0], [1], [0, 0, 1, 1], [], []>} : vector<2x32xf32>, vector<32x32xf32>, vector<2x32xf32> -> vector<2x32xf32>
    %cst_132 = arith.constant dense<0.000000e+00> : vector<2x32xf32>
    %394 = tpu.matmul %391, %271, %cst_132 {dimension_numbers = #tpu.dot_dimension_numbers<[1], [0], [0], [1], [0, 0, 1, 1], [], []>} : vector<2x32xf32>, vector<32x32xf32>, vector<2x32xf32> -> vector<2x32xf32>
    %cst_133 = arith.constant dense<0.000000e+00> : vector<2x32xf32>
    %395 = tpu.matmul %391, %273, %cst_133 {dimension_numbers = #tpu.dot_dimension_numbers<[1], [0], [0], [1], [0, 0, 1, 1], [], []>} : vector<2x32xf32>, vector<32x32xf32>, vector<2x32xf32> -> vector<2x32xf32>
    %396 = vector.broadcast %275 : vector<1x32xf32> to vector<2x32xf32>
    %397 = arith.addf %395, %396 : vector<2x32xf32>
    %398 = vector.extract_strided_slice %265 {offsets = [8, 0], sizes = [2, 32], strides = [1, 1]} : vector<16x32xf32> to vector<2x32xf32>
    %399 = arith.addf %398, %393 : vector<2x32xf32>
    %400 = arith.negf %399 : vector<2x32xf32>
    %401 = math.exp %400 : vector<2x32xf32>
    %cst_134 = arith.constant 1.000000e+00 : f32
    %402 = vector.broadcast %cst_134 : f32 to vector<2x32xf32>
    %403 = arith.addf %402, %401 : vector<2x32xf32>
    %404 = arith.divf %402, %403 : vector<2x32xf32>
    %405 = vector.extract_strided_slice %266 {offsets = [8, 0], sizes = [2, 32], strides = [1, 1]} : vector<16x32xf32> to vector<2x32xf32>
    %406 = arith.addf %405, %394 : vector<2x32xf32>
    %407 = arith.negf %406 : vector<2x32xf32>
    %408 = math.exp %407 : vector<2x32xf32>
    %cst_135 = arith.constant 1.000000e+00 : f32
    %409 = vector.broadcast %cst_135 : f32 to vector<2x32xf32>
    %410 = arith.addf %409, %408 : vector<2x32xf32>
    %411 = arith.divf %409, %410 : vector<2x32xf32>
    %412 = vector.extract_strided_slice %267 {offsets = [8, 0], sizes = [2, 32], strides = [1, 1]} : vector<16x32xf32> to vector<2x32xf32>
    %413 = arith.mulf %404, %397 : vector<2x32xf32>
    %414 = arith.addf %412, %413 : vector<2x32xf32>
    %415 = math.tanh %414 : vector<2x32xf32>
    %cst_136 = arith.constant 1.000000e+00 : f32
    %416 = vector.broadcast %cst_136 : f32 to vector<2x32xf32>
    %417 = arith.subf %416, %411 : vector<2x32xf32>
    %418 = arith.mulf %417, %415 : vector<2x32xf32>
    %419 = arith.mulf %411, %391 : vector<2x32xf32>
    %420 = arith.addf %418, %419 : vector<2x32xf32>
    %c8_137 = arith.constant 8 : index
    %c0_138 = arith.constant 0 : index
    %421 = vector.load %arg16[%c8_137, %c0_138] : memref<16x32xf32, #tpu.memory_space<vmem>>, vector<2x32xf32>
    tpu.vector_store %arg16[%c8_137, %c0_138], %420 {strides = array<i32>} : memref<16x32xf32, #tpu.memory_space<vmem>>, vector<2x32xf32>,
    %cst_139 = arith.constant dense<0.000000e+00> : vector<2x32xf32>
    %422 = tpu.matmul %420, %269, %cst_139 {dimension_numbers = #tpu.dot_dimension_numbers<[1], [0], [0], [1], [0, 0, 1, 1], [], []>} : vector<2x32xf32>, vector<32x32xf32>, vector<2x32xf32> -> vector<2x32xf32>
    %cst_140 = arith.constant dense<0.000000e+00> : vector<2x32xf32>
    %423 = tpu.matmul %420, %271, %cst_140 {dimension_numbers = #tpu.dot_dimension_numbers<[1], [0], [0], [1], [0, 0, 1, 1], [], []>} : vector<2x32xf32>, vector<32x32xf32>, vector<2x32xf32> -> vector<2x32xf32>
    %cst_141 = arith.constant dense<0.000000e+00> : vector<2x32xf32>
    %424 = tpu.matmul %420, %273, %cst_141 {dimension_numbers = #tpu.dot_dimension_numbers<[1], [0], [0], [1], [0, 0, 1, 1], [], []>} : vector<2x32xf32>, vector<32x32xf32>, vector<2x32xf32> -> vector<2x32xf32>
    %425 = vector.broadcast %275 : vector<1x32xf32> to vector<2x32xf32>
    %426 = arith.addf %424, %425 : vector<2x32xf32>
    %427 = vector.extract_strided_slice %265 {offsets = [10, 0], sizes = [2, 32], strides = [1, 1]} : vector<16x32xf32> to vector<2x32xf32>
    %428 = arith.addf %427, %422 : vector<2x32xf32>
    %429 = arith.negf %428 : vector<2x32xf32>
    %430 = math.exp %429 : vector<2x32xf32>
    %cst_142 = arith.constant 1.000000e+00 : f32
    %431 = vector.broadcast %cst_142 : f32 to vector<2x32xf32>
    %432 = arith.addf %431, %430 : vector<2x32xf32>
    %433 = arith.divf %431, %432 : vector<2x32xf32>
    %434 = vector.extract_strided_slice %266 {offsets = [10, 0], sizes = [2, 32], strides = [1, 1]} : vector<16x32xf32> to vector<2x32xf32>
    %435 = arith.addf %434, %423 : vector<2x32xf32>
    %436 = arith.negf %435 : vector<2x32xf32>
    %437 = math.exp %436 : vector<2x32xf32>
    %cst_143 = arith.constant 1.000000e+00 : f32
    %438 = vector.broadcast %cst_143 : f32 to vector<2x32xf32>
    %439 = arith.addf %438, %437 : vector<2x32xf32>
    %440 = arith.divf %438, %439 : vector<2x32xf32>
    %441 = vector.extract_strided_slice %267 {offsets = [10, 0], sizes = [2, 32], strides = [1, 1]} : vector<16x32xf32> to vector<2x32xf32>
    %442 = arith.mulf %433, %426 : vector<2x32xf32>
    %443 = arith.addf %441, %442 : vector<2x32xf32>
    %444 = math.tanh %443 : vector<2x32xf32>
    %cst_144 = arith.constant 1.000000e+00 : f32
    %445 = vector.broadcast %cst_144 : f32 to vector<2x32xf32>
    %446 = arith.subf %445, %440 : vector<2x32xf32>
    %447 = arith.mulf %446, %444 : vector<2x32xf32>
    %448 = arith.mulf %440, %420 : vector<2x32xf32>
    %449 = arith.addf %447, %448 : vector<2x32xf32>
    %c10_145 = arith.constant 10 : index
    %c0_146 = arith.constant 0 : index
    %450 = vector.load %arg16[%c10_145, %c0_146] : memref<16x32xf32, #tpu.memory_space<vmem>>, vector<2x32xf32>
    tpu.vector_store %arg16[%c10_145, %c0_146], %449 {strides = array<i32>} : memref<16x32xf32, #tpu.memory_space<vmem>>, vector<2x32xf32>,
    %cst_147 = arith.constant dense<0.000000e+00> : vector<2x32xf32>
    %451 = tpu.matmul %449, %269, %cst_147 {dimension_numbers = #tpu.dot_dimension_numbers<[1], [0], [0], [1], [0, 0, 1, 1], [], []>} : vector<2x32xf32>, vector<32x32xf32>, vector<2x32xf32> -> vector<2x32xf32>
    %cst_148 = arith.constant dense<0.000000e+00> : vector<2x32xf32>
    %452 = tpu.matmul %449, %271, %cst_148 {dimension_numbers = #tpu.dot_dimension_numbers<[1], [0], [0], [1], [0, 0, 1, 1], [], []>} : vector<2x32xf32>, vector<32x32xf32>, vector<2x32xf32> -> vector<2x32xf32>
    %cst_149 = arith.constant dense<0.000000e+00> : vector<2x32xf32>
    %453 = tpu.matmul %449, %273, %cst_149 {dimension_numbers = #tpu.dot_dimension_numbers<[1], [0], [0], [1], [0, 0, 1, 1], [], []>} : vector<2x32xf32>, vector<32x32xf32>, vector<2x32xf32> -> vector<2x32xf32>
    %454 = vector.broadcast %275 : vector<1x32xf32> to vector<2x32xf32>
    %455 = arith.addf %453, %454 : vector<2x32xf32>
    %456 = vector.extract_strided_slice %265 {offsets = [12, 0], sizes = [2, 32], strides = [1, 1]} : vector<16x32xf32> to vector<2x32xf32>
    %457 = arith.addf %456, %451 : vector<2x32xf32>
    %458 = arith.negf %457 : vector<2x32xf32>
    %459 = math.exp %458 : vector<2x32xf32>
    %cst_150 = arith.constant 1.000000e+00 : f32
    %460 = vector.broadcast %cst_150 : f32 to vector<2x32xf32>
    %461 = arith.addf %460, %459 : vector<2x32xf32>
    %462 = arith.divf %460, %461 : vector<2x32xf32>
    %463 = vector.extract_strided_slice %266 {offsets = [12, 0], sizes = [2, 32], strides = [1, 1]} : vector<16x32xf32> to vector<2x32xf32>
    %464 = arith.addf %463, %452 : vector<2x32xf32>
    %465 = arith.negf %464 : vector<2x32xf32>
    %466 = math.exp %465 : vector<2x32xf32>
    %cst_151 = arith.constant 1.000000e+00 : f32
    %467 = vector.broadcast %cst_151 : f32 to vector<2x32xf32>
    %468 = arith.addf %467, %466 : vector<2x32xf32>
    %469 = arith.divf %467, %468 : vector<2x32xf32>
    %470 = vector.extract_strided_slice %267 {offsets = [12, 0], sizes = [2, 32], strides = [1, 1]} : vector<16x32xf32> to vector<2x32xf32>
    %471 = arith.mulf %462, %455 : vector<2x32xf32>
    %472 = arith.addf %470, %471 : vector<2x32xf32>
    %473 = math.tanh %472 : vector<2x32xf32>
    %cst_152 = arith.constant 1.000000e+00 : f32
    %474 = vector.broadcast %cst_152 : f32 to vector<2x32xf32>
    %475 = arith.subf %474, %469 : vector<2x32xf32>
    %476 = arith.mulf %475, %473 : vector<2x32xf32>
    %477 = arith.mulf %469, %449 : vector<2x32xf32>
    %478 = arith.addf %476, %477 : vector<2x32xf32>
    %c12_153 = arith.constant 12 : index
    %c0_154 = arith.constant 0 : index
    %479 = vector.load %arg16[%c12_153, %c0_154] : memref<16x32xf32, #tpu.memory_space<vmem>>, vector<2x32xf32>
    tpu.vector_store %arg16[%c12_153, %c0_154], %478 {strides = array<i32>} : memref<16x32xf32, #tpu.memory_space<vmem>>, vector<2x32xf32>,
    %cst_155 = arith.constant dense<0.000000e+00> : vector<2x32xf32>
    %480 = tpu.matmul %478, %269, %cst_155 {dimension_numbers = #tpu.dot_dimension_numbers<[1], [0], [0], [1], [0, 0, 1, 1], [], []>} : vector<2x32xf32>, vector<32x32xf32>, vector<2x32xf32> -> vector<2x32xf32>
    %cst_156 = arith.constant dense<0.000000e+00> : vector<2x32xf32>
    %481 = tpu.matmul %478, %271, %cst_156 {dimension_numbers = #tpu.dot_dimension_numbers<[1], [0], [0], [1], [0, 0, 1, 1], [], []>} : vector<2x32xf32>, vector<32x32xf32>, vector<2x32xf32> -> vector<2x32xf32>
    %cst_157 = arith.constant dense<0.000000e+00> : vector<2x32xf32>
    %482 = tpu.matmul %478, %273, %cst_157 {dimension_numbers = #tpu.dot_dimension_numbers<[1], [0], [0], [1], [0, 0, 1, 1], [], []>} : vector<2x32xf32>, vector<32x32xf32>, vector<2x32xf32> -> vector<2x32xf32>
    %483 = vector.broadcast %275 : vector<1x32xf32> to vector<2x32xf32>
    %484 = arith.addf %482, %483 : vector<2x32xf32>
    %485 = vector.extract_strided_slice %265 {offsets = [14, 0], sizes = [2, 32], strides = [1, 1]} : vector<16x32xf32> to vector<2x32xf32>
    %486 = arith.addf %485, %480 : vector<2x32xf32>
    %487 = arith.negf %486 : vector<2x32xf32>
    %488 = math.exp %487 : vector<2x32xf32>
    %cst_158 = arith.constant 1.000000e+00 : f32
    %489 = vector.broadcast %cst_158 : f32 to vector<2x32xf32>
    %490 = arith.addf %489, %488 : vector<2x32xf32>
    %491 = arith.divf %489, %490 : vector<2x32xf32>
    %492 = vector.extract_strided_slice %266 {offsets = [14, 0], sizes = [2, 32], strides = [1, 1]} : vector<16x32xf32> to vector<2x32xf32>
    %493 = arith.addf %492, %481 : vector<2x32xf32>
    %494 = arith.negf %493 : vector<2x32xf32>
    %495 = math.exp %494 : vector<2x32xf32>
    %cst_159 = arith.constant 1.000000e+00 : f32
    %496 = vector.broadcast %cst_159 : f32 to vector<2x32xf32>
    %497 = arith.addf %496, %495 : vector<2x32xf32>
    %498 = arith.divf %496, %497 : vector<2x32xf32>
    %499 = vector.extract_strided_slice %267 {offsets = [14, 0], sizes = [2, 32], strides = [1, 1]} : vector<16x32xf32> to vector<2x32xf32>
    %500 = arith.mulf %491, %484 : vector<2x32xf32>
    %501 = arith.addf %499, %500 : vector<2x32xf32>
    %502 = math.tanh %501 : vector<2x32xf32>
    %cst_160 = arith.constant 1.000000e+00 : f32
    %503 = vector.broadcast %cst_160 : f32 to vector<2x32xf32>
    %504 = arith.subf %503, %498 : vector<2x32xf32>
    %505 = arith.mulf %504, %502 : vector<2x32xf32>
    %506 = arith.mulf %498, %478 : vector<2x32xf32>
    %507 = arith.addf %505, %506 : vector<2x32xf32>
    %c14_161 = arith.constant 14 : index
    %c0_162 = arith.constant 0 : index
    %508 = vector.load %arg16[%c14_161, %c0_162] : memref<16x32xf32, #tpu.memory_space<vmem>>, vector<2x32xf32>
    tpu.vector_store %arg16[%c14_161, %c0_162], %507 {strides = array<i32>} : memref<16x32xf32, #tpu.memory_space<vmem>>, vector<2x32xf32>,
    %509 = math.tanh %507 : vector<2x32xf32>
    %c1_163 = arith.constant 1 : index
    %510 = memref.load %arg12[%c1_163] : memref<4xf32, #tpu.memory_space<smem>>
    %511 = vector.broadcast %510 : f32 to vector<2x32xf32>
    %512 = arith.mulf %509, %511 : vector<2x32xf32>
    %513 = arith.addf %256, %512 : vector<2x32xf32>
    %c0_164 = arith.constant 0 : index
    %c0_165 = arith.constant 0 : index
    %514 = vector.load %arg16[%c0_164, %c0_165] : memref<16x32xf32, #tpu.memory_space<vmem>>, vector<16x32xf32>
    %c1_166 = arith.constant 1 : index
    %c0_167 = arith.constant 0 : index
    %c0_168 = arith.constant 0 : index
    %515 = vector.load %arg2[%c1_166, %c0_167, %c0_168] : memref<3x32x96xf32, #tpu.memory_space<vmem>>, vector<1x32x96xf32>
    %516 = vector.shape_cast %515 : vector<1x32x96xf32> to vector<32x96xf32>
    %cst_169 = arith.constant dense<0.000000e+00> : vector<16x96xf32>
    %517 = tpu.matmul %514, %516, %cst_169 {dimension_numbers = #tpu.dot_dimension_numbers<[1], [0], [0], [1], [0, 0, 1, 1], [], []>} : vector<16x32xf32>, vector<32x96xf32>, vector<16x96xf32> -> vector<16x96xf32>
    %c2_170 = arith.constant 2 : index
    %c0_171 = arith.constant 0 : index
    %c0_172 = arith.constant 0 : index
    %518 = vector.load %arg3[%c2_170, %c0_171, %c0_172] : memref<4x1x96xf32, #tpu.memory_space<vmem>>, vector<1x1x96xf32>
    %519 = vector.shape_cast %518 : vector<1x1x96xf32> to vector<1x96xf32>
    %520 = vector.broadcast %519 : vector<1x96xf32> to vector<16x96xf32>
    %521 = arith.addf %517, %520 : vector<16x96xf32>
    %522 = vector.extract_strided_slice %521 {offsets = [0, 0], sizes = [16, 32], strides = [1, 1]} : vector<16x96xf32> to vector<16x32xf32>
    %523 = vector.extract_strided_slice %521 {offsets = [0, 32], sizes = [16, 32], strides = [1, 1]} : vector<16x96xf32> to vector<16x32xf32>
    %524 = vector.extract_strided_slice %521 {offsets = [0, 64], sizes = [16, 32], strides = [1, 1]} : vector<16x96xf32> to vector<16x32xf32>
    %c2_173 = arith.constant 2 : index
    %c0_174 = arith.constant 0 : index
    %c0_175 = arith.constant 0 : index
    %525 = vector.load %arg4[%c2_173, %c0_174, %c0_175] : memref<4x32x32xf32, #tpu.memory_space<vmem>>, vector<1x32x32xf32>
    %526 = vector.shape_cast %525 : vector<1x32x32xf32> to vector<32x32xf32>
    %c2_176 = arith.constant 2 : index
    %c0_177 = arith.constant 0 : index
    %c0_178 = arith.constant 0 : index
    %527 = vector.load %arg5[%c2_176, %c0_177, %c0_178] : memref<4x32x32xf32, #tpu.memory_space<vmem>>, vector<1x32x32xf32>
    %528 = vector.shape_cast %527 : vector<1x32x32xf32> to vector<32x32xf32>
    %c2_179 = arith.constant 2 : index
    %c0_180 = arith.constant 0 : index
    %c0_181 = arith.constant 0 : index
    %529 = vector.load %arg6[%c2_179, %c0_180, %c0_181] : memref<4x32x32xf32, #tpu.memory_space<vmem>>, vector<1x32x32xf32>
    %530 = vector.shape_cast %529 : vector<1x32x32xf32> to vector<32x32xf32>
    %c2_182 = arith.constant 2 : index
    %c0_183 = arith.constant 0 : index
    %c0_184 = arith.constant 0 : index
    %531 = vector.load %arg7[%c2_182, %c0_183, %c0_184] : memref<4x1x32xf32, #tpu.memory_space<vmem>>, vector<1x1x32xf32>
    %532 = vector.shape_cast %531 : vector<1x1x32xf32> to vector<1x32xf32>
    %cst_185 = arith.constant 0.000000e+00 : f32
    %533 = vector.broadcast %cst_185 : f32 to vector<2x32xf32>
    %cst_186 = arith.constant dense<0.000000e+00> : vector<2x32xf32>
    %534 = tpu.matmul %533, %526, %cst_186 {dimension_numbers = #tpu.dot_dimension_numbers<[1], [0], [0], [1], [0, 0, 1, 1], [], []>} : vector<2x32xf32>, vector<32x32xf32>, vector<2x32xf32> -> vector<2x32xf32>
    %cst_187 = arith.constant dense<0.000000e+00> : vector<2x32xf32>
    %535 = tpu.matmul %533, %528, %cst_187 {dimension_numbers = #tpu.dot_dimension_numbers<[1], [0], [0], [1], [0, 0, 1, 1], [], []>} : vector<2x32xf32>, vector<32x32xf32>, vector<2x32xf32> -> vector<2x32xf32>
    %cst_188 = arith.constant dense<0.000000e+00> : vector<2x32xf32>
    %536 = tpu.matmul %533, %530, %cst_188 {dimension_numbers = #tpu.dot_dimension_numbers<[1], [0], [0], [1], [0, 0, 1, 1], [], []>} : vector<2x32xf32>, vector<32x32xf32>, vector<2x32xf32> -> vector<2x32xf32>
    %537 = vector.broadcast %532 : vector<1x32xf32> to vector<2x32xf32>
    %538 = arith.addf %536, %537 : vector<2x32xf32>
    %539 = vector.extract_strided_slice %522 {offsets = [0, 0], sizes = [2, 32], strides = [1, 1]} : vector<16x32xf32> to vector<2x32xf32>
    %540 = arith.addf %539, %534 : vector<2x32xf32>
    %541 = arith.negf %540 : vector<2x32xf32>
    %542 = math.exp %541 : vector<2x32xf32>
    %cst_189 = arith.constant 1.000000e+00 : f32
    %543 = vector.broadcast %cst_189 : f32 to vector<2x32xf32>
    %544 = arith.addf %543, %542 : vector<2x32xf32>
    %545 = arith.divf %543, %544 : vector<2x32xf32>
    %546 = vector.extract_strided_slice %523 {offsets = [0, 0], sizes = [2, 32], strides = [1, 1]} : vector<16x32xf32> to vector<2x32xf32>
    %547 = arith.addf %546, %535 : vector<2x32xf32>
    %548 = arith.negf %547 : vector<2x32xf32>
    %549 = math.exp %548 : vector<2x32xf32>
    %cst_190 = arith.constant 1.000000e+00 : f32
    %550 = vector.broadcast %cst_190 : f32 to vector<2x32xf32>
    %551 = arith.addf %550, %549 : vector<2x32xf32>
    %552 = arith.divf %550, %551 : vector<2x32xf32>
    %553 = vector.extract_strided_slice %524 {offsets = [0, 0], sizes = [2, 32], strides = [1, 1]} : vector<16x32xf32> to vector<2x32xf32>
    %554 = arith.mulf %545, %538 : vector<2x32xf32>
    %555 = arith.addf %553, %554 : vector<2x32xf32>
    %556 = math.tanh %555 : vector<2x32xf32>
    %cst_191 = arith.constant 1.000000e+00 : f32
    %557 = vector.broadcast %cst_191 : f32 to vector<2x32xf32>
    %558 = arith.subf %557, %552 : vector<2x32xf32>
    %559 = arith.mulf %558, %556 : vector<2x32xf32>
    %560 = arith.mulf %552, %533 : vector<2x32xf32>
    %561 = arith.addf %559, %560 : vector<2x32xf32>
    %c0_192 = arith.constant 0 : index
    %c0_193 = arith.constant 0 : index
    %562 = vector.load %arg15[%c0_192, %c0_193] : memref<16x32xf32, #tpu.memory_space<vmem>>, vector<2x32xf32>
    tpu.vector_store %arg15[%c0_192, %c0_193], %561 {strides = array<i32>} : memref<16x32xf32, #tpu.memory_space<vmem>>, vector<2x32xf32>,
    %cst_194 = arith.constant dense<0.000000e+00> : vector<2x32xf32>
    %563 = tpu.matmul %561, %526, %cst_194 {dimension_numbers = #tpu.dot_dimension_numbers<[1], [0], [0], [1], [0, 0, 1, 1], [], []>} : vector<2x32xf32>, vector<32x32xf32>, vector<2x32xf32> -> vector<2x32xf32>
    %cst_195 = arith.constant dense<0.000000e+00> : vector<2x32xf32>
    %564 = tpu.matmul %561, %528, %cst_195 {dimension_numbers = #tpu.dot_dimension_numbers<[1], [0], [0], [1], [0, 0, 1, 1], [], []>} : vector<2x32xf32>, vector<32x32xf32>, vector<2x32xf32> -> vector<2x32xf32>
    %cst_196 = arith.constant dense<0.000000e+00> : vector<2x32xf32>
    %565 = tpu.matmul %561, %530, %cst_196 {dimension_numbers = #tpu.dot_dimension_numbers<[1], [0], [0], [1], [0, 0, 1, 1], [], []>} : vector<2x32xf32>, vector<32x32xf32>, vector<2x32xf32> -> vector<2x32xf32>
    %566 = vector.broadcast %532 : vector<1x32xf32> to vector<2x32xf32>
    %567 = arith.addf %565, %566 : vector<2x32xf32>
    %568 = vector.extract_strided_slice %522 {offsets = [2, 0], sizes = [2, 32], strides = [1, 1]} : vector<16x32xf32> to vector<2x32xf32>
    %569 = arith.addf %568, %563 : vector<2x32xf32>
    %570 = arith.negf %569 : vector<2x32xf32>
    %571 = math.exp %570 : vector<2x32xf32>
    %cst_197 = arith.constant 1.000000e+00 : f32
    %572 = vector.broadcast %cst_197 : f32 to vector<2x32xf32>
    %573 = arith.addf %572, %571 : vector<2x32xf32>
    %574 = arith.divf %572, %573 : vector<2x32xf32>
    %575 = vector.extract_strided_slice %523 {offsets = [2, 0], sizes = [2, 32], strides = [1, 1]} : vector<16x32xf32> to vector<2x32xf32>
    %576 = arith.addf %575, %564 : vector<2x32xf32>
    %577 = arith.negf %576 : vector<2x32xf32>
    %578 = math.exp %577 : vector<2x32xf32>
    %cst_198 = arith.constant 1.000000e+00 : f32
    %579 = vector.broadcast %cst_198 : f32 to vector<2x32xf32>
    %580 = arith.addf %579, %578 : vector<2x32xf32>
    %581 = arith.divf %579, %580 : vector<2x32xf32>
    %582 = vector.extract_strided_slice %524 {offsets = [2, 0], sizes = [2, 32], strides = [1, 1]} : vector<16x32xf32> to vector<2x32xf32>
    %583 = arith.mulf %574, %567 : vector<2x32xf32>
    %584 = arith.addf %582, %583 : vector<2x32xf32>
    %585 = math.tanh %584 : vector<2x32xf32>
    %cst_199 = arith.constant 1.000000e+00 : f32
    %586 = vector.broadcast %cst_199 : f32 to vector<2x32xf32>
    %587 = arith.subf %586, %581 : vector<2x32xf32>
    %588 = arith.mulf %587, %585 : vector<2x32xf32>
    %589 = arith.mulf %581, %561 : vector<2x32xf32>
    %590 = arith.addf %588, %589 : vector<2x32xf32>
    %c2_200 = arith.constant 2 : index
    %c0_201 = arith.constant 0 : index
    %591 = vector.load %arg15[%c2_200, %c0_201] : memref<16x32xf32, #tpu.memory_space<vmem>>, vector<2x32xf32>
    tpu.vector_store %arg15[%c2_200, %c0_201], %590 {strides = array<i32>} : memref<16x32xf32, #tpu.memory_space<vmem>>, vector<2x32xf32>,
    %cst_202 = arith.constant dense<0.000000e+00> : vector<2x32xf32>
    %592 = tpu.matmul %590, %526, %cst_202 {dimension_numbers = #tpu.dot_dimension_numbers<[1], [0], [0], [1], [0, 0, 1, 1], [], []>} : vector<2x32xf32>, vector<32x32xf32>, vector<2x32xf32> -> vector<2x32xf32>
    %cst_203 = arith.constant dense<0.000000e+00> : vector<2x32xf32>
    %593 = tpu.matmul %590, %528, %cst_203 {dimension_numbers = #tpu.dot_dimension_numbers<[1], [0], [0], [1], [0, 0, 1, 1], [], []>} : vector<2x32xf32>, vector<32x32xf32>, vector<2x32xf32> -> vector<2x32xf32>
    %cst_204 = arith.constant dense<0.000000e+00> : vector<2x32xf32>
    %594 = tpu.matmul %590, %530, %cst_204 {dimension_numbers = #tpu.dot_dimension_numbers<[1], [0], [0], [1], [0, 0, 1, 1], [], []>} : vector<2x32xf32>, vector<32x32xf32>, vector<2x32xf32> -> vector<2x32xf32>
    %595 = vector.broadcast %532 : vector<1x32xf32> to vector<2x32xf32>
    %596 = arith.addf %594, %595 : vector<2x32xf32>
    %597 = vector.extract_strided_slice %522 {offsets = [4, 0], sizes = [2, 32], strides = [1, 1]} : vector<16x32xf32> to vector<2x32xf32>
    %598 = arith.addf %597, %592 : vector<2x32xf32>
    %599 = arith.negf %598 : vector<2x32xf32>
    %600 = math.exp %599 : vector<2x32xf32>
    %cst_205 = arith.constant 1.000000e+00 : f32
    %601 = vector.broadcast %cst_205 : f32 to vector<2x32xf32>
    %602 = arith.addf %601, %600 : vector<2x32xf32>
    %603 = arith.divf %601, %602 : vector<2x32xf32>
    %604 = vector.extract_strided_slice %523 {offsets = [4, 0], sizes = [2, 32], strides = [1, 1]} : vector<16x32xf32> to vector<2x32xf32>
    %605 = arith.addf %604, %593 : vector<2x32xf32>
    %606 = arith.negf %605 : vector<2x32xf32>
    %607 = math.exp %606 : vector<2x32xf32>
    %cst_206 = arith.constant 1.000000e+00 : f32
    %608 = vector.broadcast %cst_206 : f32 to vector<2x32xf32>
    %609 = arith.addf %608, %607 : vector<2x32xf32>
    %610 = arith.divf %608, %609 : vector<2x32xf32>
    %611 = vector.extract_strided_slice %524 {offsets = [4, 0], sizes = [2, 32], strides = [1, 1]} : vector<16x32xf32> to vector<2x32xf32>
    %612 = arith.mulf %603, %596 : vector<2x32xf32>
    %613 = arith.addf %611, %612 : vector<2x32xf32>
    %614 = math.tanh %613 : vector<2x32xf32>
    %cst_207 = arith.constant 1.000000e+00 : f32
    %615 = vector.broadcast %cst_207 : f32 to vector<2x32xf32>
    %616 = arith.subf %615, %610 : vector<2x32xf32>
    %617 = arith.mulf %616, %614 : vector<2x32xf32>
    %618 = arith.mulf %610, %590 : vector<2x32xf32>
    %619 = arith.addf %617, %618 : vector<2x32xf32>
    %c4_208 = arith.constant 4 : index
    %c0_209 = arith.constant 0 : index
    %620 = vector.load %arg15[%c4_208, %c0_209] : memref<16x32xf32, #tpu.memory_space<vmem>>, vector<2x32xf32>
    tpu.vector_store %arg15[%c4_208, %c0_209], %619 {strides = array<i32>} : memref<16x32xf32, #tpu.memory_space<vmem>>, vector<2x32xf32>,
    %cst_210 = arith.constant dense<0.000000e+00> : vector<2x32xf32>
    %621 = tpu.matmul %619, %526, %cst_210 {dimension_numbers = #tpu.dot_dimension_numbers<[1], [0], [0], [1], [0, 0, 1, 1], [], []>} : vector<2x32xf32>, vector<32x32xf32>, vector<2x32xf32> -> vector<2x32xf32>
    %cst_211 = arith.constant dense<0.000000e+00> : vector<2x32xf32>
    %622 = tpu.matmul %619, %528, %cst_211 {dimension_numbers = #tpu.dot_dimension_numbers<[1], [0], [0], [1], [0, 0, 1, 1], [], []>} : vector<2x32xf32>, vector<32x32xf32>, vector<2x32xf32> -> vector<2x32xf32>
    %cst_212 = arith.constant dense<0.000000e+00> : vector<2x32xf32>
    %623 = tpu.matmul %619, %530, %cst_212 {dimension_numbers = #tpu.dot_dimension_numbers<[1], [0], [0], [1], [0, 0, 1, 1], [], []>} : vector<2x32xf32>, vector<32x32xf32>, vector<2x32xf32> -> vector<2x32xf32>
    %624 = vector.broadcast %532 : vector<1x32xf32> to vector<2x32xf32>
    %625 = arith.addf %623, %624 : vector<2x32xf32>
    %626 = vector.extract_strided_slice %522 {offsets = [6, 0], sizes = [2, 32], strides = [1, 1]} : vector<16x32xf32> to vector<2x32xf32>
    %627 = arith.addf %626, %621 : vector<2x32xf32>
    %628 = arith.negf %627 : vector<2x32xf32>
    %629 = math.exp %628 : vector<2x32xf32>
    %cst_213 = arith.constant 1.000000e+00 : f32
    %630 = vector.broadcast %cst_213 : f32 to vector<2x32xf32>
    %631 = arith.addf %630, %629 : vector<2x32xf32>
    %632 = arith.divf %630, %631 : vector<2x32xf32>
    %633 = vector.extract_strided_slice %523 {offsets = [6, 0], sizes = [2, 32], strides = [1, 1]} : vector<16x32xf32> to vector<2x32xf32>
    %634 = arith.addf %633, %622 : vector<2x32xf32>
    %635 = arith.negf %634 : vector<2x32xf32>
    %636 = math.exp %635 : vector<2x32xf32>
    %cst_214 = arith.constant 1.000000e+00 : f32
    %637 = vector.broadcast %cst_214 : f32 to vector<2x32xf32>
    %638 = arith.addf %637, %636 : vector<2x32xf32>
    %639 = arith.divf %637, %638 : vector<2x32xf32>
    %640 = vector.extract_strided_slice %524 {offsets = [6, 0], sizes = [2, 32], strides = [1, 1]} : vector<16x32xf32> to vector<2x32xf32>
    %641 = arith.mulf %632, %625 : vector<2x32xf32>
    %642 = arith.addf %640, %641 : vector<2x32xf32>
    %643 = math.tanh %642 : vector<2x32xf32>
    %cst_215 = arith.constant 1.000000e+00 : f32
    %644 = vector.broadcast %cst_215 : f32 to vector<2x32xf32>
    %645 = arith.subf %644, %639 : vector<2x32xf32>
    %646 = arith.mulf %645, %643 : vector<2x32xf32>
    %647 = arith.mulf %639, %619 : vector<2x32xf32>
    %648 = arith.addf %646, %647 : vector<2x32xf32>
    %c6_216 = arith.constant 6 : index
    %c0_217 = arith.constant 0 : index
    %649 = vector.load %arg15[%c6_216, %c0_217] : memref<16x32xf32, #tpu.memory_space<vmem>>, vector<2x32xf32>
    tpu.vector_store %arg15[%c6_216, %c0_217], %648 {strides = array<i32>} : memref<16x32xf32, #tpu.memory_space<vmem>>, vector<2x32xf32>,
    %cst_218 = arith.constant dense<0.000000e+00> : vector<2x32xf32>
    %650 = tpu.matmul %648, %526, %cst_218 {dimension_numbers = #tpu.dot_dimension_numbers<[1], [0], [0], [1], [0, 0, 1, 1], [], []>} : vector<2x32xf32>, vector<32x32xf32>, vector<2x32xf32> -> vector<2x32xf32>
    %cst_219 = arith.constant dense<0.000000e+00> : vector<2x32xf32>
    %651 = tpu.matmul %648, %528, %cst_219 {dimension_numbers = #tpu.dot_dimension_numbers<[1], [0], [0], [1], [0, 0, 1, 1], [], []>} : vector<2x32xf32>, vector<32x32xf32>, vector<2x32xf32> -> vector<2x32xf32>
    %cst_220 = arith.constant dense<0.000000e+00> : vector<2x32xf32>
    %652 = tpu.matmul %648, %530, %cst_220 {dimension_numbers = #tpu.dot_dimension_numbers<[1], [0], [0], [1], [0, 0, 1, 1], [], []>} : vector<2x32xf32>, vector<32x32xf32>, vector<2x32xf32> -> vector<2x32xf32>
    %653 = vector.broadcast %532 : vector<1x32xf32> to vector<2x32xf32>
    %654 = arith.addf %652, %653 : vector<2x32xf32>
    %655 = vector.extract_strided_slice %522 {offsets = [8, 0], sizes = [2, 32], strides = [1, 1]} : vector<16x32xf32> to vector<2x32xf32>
    %656 = arith.addf %655, %650 : vector<2x32xf32>
    %657 = arith.negf %656 : vector<2x32xf32>
    %658 = math.exp %657 : vector<2x32xf32>
    %cst_221 = arith.constant 1.000000e+00 : f32
    %659 = vector.broadcast %cst_221 : f32 to vector<2x32xf32>
    %660 = arith.addf %659, %658 : vector<2x32xf32>
    %661 = arith.divf %659, %660 : vector<2x32xf32>
    %662 = vector.extract_strided_slice %523 {offsets = [8, 0], sizes = [2, 32], strides = [1, 1]} : vector<16x32xf32> to vector<2x32xf32>
    %663 = arith.addf %662, %651 : vector<2x32xf32>
    %664 = arith.negf %663 : vector<2x32xf32>
    %665 = math.exp %664 : vector<2x32xf32>
    %cst_222 = arith.constant 1.000000e+00 : f32
    %666 = vector.broadcast %cst_222 : f32 to vector<2x32xf32>
    %667 = arith.addf %666, %665 : vector<2x32xf32>
    %668 = arith.divf %666, %667 : vector<2x32xf32>
    %669 = vector.extract_strided_slice %524 {offsets = [8, 0], sizes = [2, 32], strides = [1, 1]} : vector<16x32xf32> to vector<2x32xf32>
    %670 = arith.mulf %661, %654 : vector<2x32xf32>
    %671 = arith.addf %669, %670 : vector<2x32xf32>
    %672 = math.tanh %671 : vector<2x32xf32>
    %cst_223 = arith.constant 1.000000e+00 : f32
    %673 = vector.broadcast %cst_223 : f32 to vector<2x32xf32>
    %674 = arith.subf %673, %668 : vector<2x32xf32>
    %675 = arith.mulf %674, %672 : vector<2x32xf32>
    %676 = arith.mulf %668, %648 : vector<2x32xf32>
    %677 = arith.addf %675, %676 : vector<2x32xf32>
    %c8_224 = arith.constant 8 : index
    %c0_225 = arith.constant 0 : index
    %678 = vector.load %arg15[%c8_224, %c0_225] : memref<16x32xf32, #tpu.memory_space<vmem>>, vector<2x32xf32>
    tpu.vector_store %arg15[%c8_224, %c0_225], %677 {strides = array<i32>} : memref<16x32xf32, #tpu.memory_space<vmem>>, vector<2x32xf32>,
    %cst_226 = arith.constant dense<0.000000e+00> : vector<2x32xf32>
    %679 = tpu.matmul %677, %526, %cst_226 {dimension_numbers = #tpu.dot_dimension_numbers<[1], [0], [0], [1], [0, 0, 1, 1], [], []>} : vector<2x32xf32>, vector<32x32xf32>, vector<2x32xf32> -> vector<2x32xf32>
    %cst_227 = arith.constant dense<0.000000e+00> : vector<2x32xf32>
    %680 = tpu.matmul %677, %528, %cst_227 {dimension_numbers = #tpu.dot_dimension_numbers<[1], [0], [0], [1], [0, 0, 1, 1], [], []>} : vector<2x32xf32>, vector<32x32xf32>, vector<2x32xf32> -> vector<2x32xf32>
    %cst_228 = arith.constant dense<0.000000e+00> : vector<2x32xf32>
    %681 = tpu.matmul %677, %530, %cst_228 {dimension_numbers = #tpu.dot_dimension_numbers<[1], [0], [0], [1], [0, 0, 1, 1], [], []>} : vector<2x32xf32>, vector<32x32xf32>, vector<2x32xf32> -> vector<2x32xf32>
    %682 = vector.broadcast %532 : vector<1x32xf32> to vector<2x32xf32>
    %683 = arith.addf %681, %682 : vector<2x32xf32>
    %684 = vector.extract_strided_slice %522 {offsets = [10, 0], sizes = [2, 32], strides = [1, 1]} : vector<16x32xf32> to vector<2x32xf32>
    %685 = arith.addf %684, %679 : vector<2x32xf32>
    %686 = arith.negf %685 : vector<2x32xf32>
    %687 = math.exp %686 : vector<2x32xf32>
    %cst_229 = arith.constant 1.000000e+00 : f32
    %688 = vector.broadcast %cst_229 : f32 to vector<2x32xf32>
    %689 = arith.addf %688, %687 : vector<2x32xf32>
    %690 = arith.divf %688, %689 : vector<2x32xf32>
    %691 = vector.extract_strided_slice %523 {offsets = [10, 0], sizes = [2, 32], strides = [1, 1]} : vector<16x32xf32> to vector<2x32xf32>
    %692 = arith.addf %691, %680 : vector<2x32xf32>
    %693 = arith.negf %692 : vector<2x32xf32>
    %694 = math.exp %693 : vector<2x32xf32>
    %cst_230 = arith.constant 1.000000e+00 : f32
    %695 = vector.broadcast %cst_230 : f32 to vector<2x32xf32>
    %696 = arith.addf %695, %694 : vector<2x32xf32>
    %697 = arith.divf %695, %696 : vector<2x32xf32>
    %698 = vector.extract_strided_slice %524 {offsets = [10, 0], sizes = [2, 32], strides = [1, 1]} : vector<16x32xf32> to vector<2x32xf32>
    %699 = arith.mulf %690, %683 : vector<2x32xf32>
    %700 = arith.addf %698, %699 : vector<2x32xf32>
    %701 = math.tanh %700 : vector<2x32xf32>
    %cst_231 = arith.constant 1.000000e+00 : f32
    %702 = vector.broadcast %cst_231 : f32 to vector<2x32xf32>
    %703 = arith.subf %702, %697 : vector<2x32xf32>
    %704 = arith.mulf %703, %701 : vector<2x32xf32>
    %705 = arith.mulf %697, %677 : vector<2x32xf32>
    %706 = arith.addf %704, %705 : vector<2x32xf32>
    %c10_232 = arith.constant 10 : index
    %c0_233 = arith.constant 0 : index
    %707 = vector.load %arg15[%c10_232, %c0_233] : memref<16x32xf32, #tpu.memory_space<vmem>>, vector<2x32xf32>
    tpu.vector_store %arg15[%c10_232, %c0_233], %706 {strides = array<i32>} : memref<16x32xf32, #tpu.memory_space<vmem>>, vector<2x32xf32>,
    %cst_234 = arith.constant dense<0.000000e+00> : vector<2x32xf32>
    %708 = tpu.matmul %706, %526, %cst_234 {dimension_numbers = #tpu.dot_dimension_numbers<[1], [0], [0], [1], [0, 0, 1, 1], [], []>} : vector<2x32xf32>, vector<32x32xf32>, vector<2x32xf32> -> vector<2x32xf32>
    %cst_235 = arith.constant dense<0.000000e+00> : vector<2x32xf32>
    %709 = tpu.matmul %706, %528, %cst_235 {dimension_numbers = #tpu.dot_dimension_numbers<[1], [0], [0], [1], [0, 0, 1, 1], [], []>} : vector<2x32xf32>, vector<32x32xf32>, vector<2x32xf32> -> vector<2x32xf32>
    %cst_236 = arith.constant dense<0.000000e+00> : vector<2x32xf32>
    %710 = tpu.matmul %706, %530, %cst_236 {dimension_numbers = #tpu.dot_dimension_numbers<[1], [0], [0], [1], [0, 0, 1, 1], [], []>} : vector<2x32xf32>, vector<32x32xf32>, vector<2x32xf32> -> vector<2x32xf32>
    %711 = vector.broadcast %532 : vector<1x32xf32> to vector<2x32xf32>
    %712 = arith.addf %710, %711 : vector<2x32xf32>
    %713 = vector.extract_strided_slice %522 {offsets = [12, 0], sizes = [2, 32], strides = [1, 1]} : vector<16x32xf32> to vector<2x32xf32>
    %714 = arith.addf %713, %708 : vector<2x32xf32>
    %715 = arith.negf %714 : vector<2x32xf32>
    %716 = math.exp %715 : vector<2x32xf32>
    %cst_237 = arith.constant 1.000000e+00 : f32
    %717 = vector.broadcast %cst_237 : f32 to vector<2x32xf32>
    %718 = arith.addf %717, %716 : vector<2x32xf32>
    %719 = arith.divf %717, %718 : vector<2x32xf32>
    %720 = vector.extract_strided_slice %523 {offsets = [12, 0], sizes = [2, 32], strides = [1, 1]} : vector<16x32xf32> to vector<2x32xf32>
    %721 = arith.addf %720, %709 : vector<2x32xf32>
    %722 = arith.negf %721 : vector<2x32xf32>
    %723 = math.exp %722 : vector<2x32xf32>
    %cst_238 = arith.constant 1.000000e+00 : f32
    %724 = vector.broadcast %cst_238 : f32 to vector<2x32xf32>
    %725 = arith.addf %724, %723 : vector<2x32xf32>
    %726 = arith.divf %724, %725 : vector<2x32xf32>
    %727 = vector.extract_strided_slice %524 {offsets = [12, 0], sizes = [2, 32], strides = [1, 1]} : vector<16x32xf32> to vector<2x32xf32>
    %728 = arith.mulf %719, %712 : vector<2x32xf32>
    %729 = arith.addf %727, %728 : vector<2x32xf32>
    %730 = math.tanh %729 : vector<2x32xf32>
    %cst_239 = arith.constant 1.000000e+00 : f32
    %731 = vector.broadcast %cst_239 : f32 to vector<2x32xf32>
    %732 = arith.subf %731, %726 : vector<2x32xf32>
    %733 = arith.mulf %732, %730 : vector<2x32xf32>
    %734 = arith.mulf %726, %706 : vector<2x32xf32>
    %735 = arith.addf %733, %734 : vector<2x32xf32>
    %c12_240 = arith.constant 12 : index
    %c0_241 = arith.constant 0 : index
    %736 = vector.load %arg15[%c12_240, %c0_241] : memref<16x32xf32, #tpu.memory_space<vmem>>, vector<2x32xf32>
    tpu.vector_store %arg15[%c12_240, %c0_241], %735 {strides = array<i32>} : memref<16x32xf32, #tpu.memory_space<vmem>>, vector<2x32xf32>,
    %cst_242 = arith.constant dense<0.000000e+00> : vector<2x32xf32>
    %737 = tpu.matmul %735, %526, %cst_242 {dimension_numbers = #tpu.dot_dimension_numbers<[1], [0], [0], [1], [0, 0, 1, 1], [], []>} : vector<2x32xf32>, vector<32x32xf32>, vector<2x32xf32> -> vector<2x32xf32>
    %cst_243 = arith.constant dense<0.000000e+00> : vector<2x32xf32>
    %738 = tpu.matmul %735, %528, %cst_243 {dimension_numbers = #tpu.dot_dimension_numbers<[1], [0], [0], [1], [0, 0, 1, 1], [], []>} : vector<2x32xf32>, vector<32x32xf32>, vector<2x32xf32> -> vector<2x32xf32>
    %cst_244 = arith.constant dense<0.000000e+00> : vector<2x32xf32>
    %739 = tpu.matmul %735, %530, %cst_244 {dimension_numbers = #tpu.dot_dimension_numbers<[1], [0], [0], [1], [0, 0, 1, 1], [], []>} : vector<2x32xf32>, vector<32x32xf32>, vector<2x32xf32> -> vector<2x32xf32>
    %740 = vector.broadcast %532 : vector<1x32xf32> to vector<2x32xf32>
    %741 = arith.addf %739, %740 : vector<2x32xf32>
    %742 = vector.extract_strided_slice %522 {offsets = [14, 0], sizes = [2, 32], strides = [1, 1]} : vector<16x32xf32> to vector<2x32xf32>
    %743 = arith.addf %742, %737 : vector<2x32xf32>
    %744 = arith.negf %743 : vector<2x32xf32>
    %745 = math.exp %744 : vector<2x32xf32>
    %cst_245 = arith.constant 1.000000e+00 : f32
    %746 = vector.broadcast %cst_245 : f32 to vector<2x32xf32>
    %747 = arith.addf %746, %745 : vector<2x32xf32>
    %748 = arith.divf %746, %747 : vector<2x32xf32>
    %749 = vector.extract_strided_slice %523 {offsets = [14, 0], sizes = [2, 32], strides = [1, 1]} : vector<16x32xf32> to vector<2x32xf32>
    %750 = arith.addf %749, %738 : vector<2x32xf32>
    %751 = arith.negf %750 : vector<2x32xf32>
    %752 = math.exp %751 : vector<2x32xf32>
    %cst_246 = arith.constant 1.000000e+00 : f32
    %753 = vector.broadcast %cst_246 : f32 to vector<2x32xf32>
    %754 = arith.addf %753, %752 : vector<2x32xf32>
    %755 = arith.divf %753, %754 : vector<2x32xf32>
    %756 = vector.extract_strided_slice %524 {offsets = [14, 0], sizes = [2, 32], strides = [1, 1]} : vector<16x32xf32> to vector<2x32xf32>
    %757 = arith.mulf %748, %741 : vector<2x32xf32>
    %758 = arith.addf %756, %757 : vector<2x32xf32>
    %759 = math.tanh %758 : vector<2x32xf32>
    %cst_247 = arith.constant 1.000000e+00 : f32
    %760 = vector.broadcast %cst_247 : f32 to vector<2x32xf32>
    %761 = arith.subf %760, %755 : vector<2x32xf32>
    %762 = arith.mulf %761, %759 : vector<2x32xf32>
    %763 = arith.mulf %755, %735 : vector<2x32xf32>
    %764 = arith.addf %762, %763 : vector<2x32xf32>
    %c14_248 = arith.constant 14 : index
    %c0_249 = arith.constant 0 : index
    %765 = vector.load %arg15[%c14_248, %c0_249] : memref<16x32xf32, #tpu.memory_space<vmem>>, vector<2x32xf32>
    tpu.vector_store %arg15[%c14_248, %c0_249], %764 {strides = array<i32>} : memref<16x32xf32, #tpu.memory_space<vmem>>, vector<2x32xf32>,
    %766 = math.tanh %764 : vector<2x32xf32>
    %c2_250 = arith.constant 2 : index
    %767 = memref.load %arg12[%c2_250] : memref<4xf32, #tpu.memory_space<smem>>
    %768 = vector.broadcast %767 : f32 to vector<2x32xf32>
    %769 = arith.mulf %766, %768 : vector<2x32xf32>
    %770 = arith.addf %513, %769 : vector<2x32xf32>
    %c0_251 = arith.constant 0 : index
    %c0_252 = arith.constant 0 : index
    %771 = vector.load %arg15[%c0_251, %c0_252] : memref<16x32xf32, #tpu.memory_space<vmem>>, vector<16x32xf32>
    %c2_253 = arith.constant 2 : index
    %c0_254 = arith.constant 0 : index
    %c0_255 = arith.constant 0 : index
    %772 = vector.load %arg2[%c2_253, %c0_254, %c0_255] : memref<3x32x96xf32, #tpu.memory_space<vmem>>, vector<1x32x96xf32>
    %773 = vector.shape_cast %772 : vector<1x32x96xf32> to vector<32x96xf32>
    %cst_256 = arith.constant dense<0.000000e+00> : vector<16x96xf32>
    %774 = tpu.matmul %771, %773, %cst_256 {dimension_numbers = #tpu.dot_dimension_numbers<[1], [0], [0], [1], [0, 0, 1, 1], [], []>} : vector<16x32xf32>, vector<32x96xf32>, vector<16x96xf32> -> vector<16x96xf32>
    %c3 = arith.constant 3 : index
    %c0_257 = arith.constant 0 : index
    %c0_258 = arith.constant 0 : index
    %775 = vector.load %arg3[%c3, %c0_257, %c0_258] : memref<4x1x96xf32, #tpu.memory_space<vmem>>, vector<1x1x96xf32>
    %776 = vector.shape_cast %775 : vector<1x1x96xf32> to vector<1x96xf32>
    %777 = vector.broadcast %776 : vector<1x96xf32> to vector<16x96xf32>
    %778 = arith.addf %774, %777 : vector<16x96xf32>
    %779 = vector.extract_strided_slice %778 {offsets = [0, 0], sizes = [16, 32], strides = [1, 1]} : vector<16x96xf32> to vector<16x32xf32>
    %780 = vector.extract_strided_slice %778 {offsets = [0, 32], sizes = [16, 32], strides = [1, 1]} : vector<16x96xf32> to vector<16x32xf32>
    %781 = vector.extract_strided_slice %778 {offsets = [0, 64], sizes = [16, 32], strides = [1, 1]} : vector<16x96xf32> to vector<16x32xf32>
    %c3_259 = arith.constant 3 : index
    %c0_260 = arith.constant 0 : index
    %c0_261 = arith.constant 0 : index
    %782 = vector.load %arg4[%c3_259, %c0_260, %c0_261] : memref<4x32x32xf32, #tpu.memory_space<vmem>>, vector<1x32x32xf32>
    %783 = vector.shape_cast %782 : vector<1x32x32xf32> to vector<32x32xf32>
    %c3_262 = arith.constant 3 : index
    %c0_263 = arith.constant 0 : index
    %c0_264 = arith.constant 0 : index
    %784 = vector.load %arg5[%c3_262, %c0_263, %c0_264] : memref<4x32x32xf32, #tpu.memory_space<vmem>>, vector<1x32x32xf32>
    %785 = vector.shape_cast %784 : vector<1x32x32xf32> to vector<32x32xf32>
    %c3_265 = arith.constant 3 : index
    %c0_266 = arith.constant 0 : index
    %c0_267 = arith.constant 0 : index
    %786 = vector.load %arg6[%c3_265, %c0_266, %c0_267] : memref<4x32x32xf32, #tpu.memory_space<vmem>>, vector<1x32x32xf32>
    %787 = vector.shape_cast %786 : vector<1x32x32xf32> to vector<32x32xf32>
    %c3_268 = arith.constant 3 : index
    %c0_269 = arith.constant 0 : index
    %c0_270 = arith.constant 0 : index
    %788 = vector.load %arg7[%c3_268, %c0_269, %c0_270] : memref<4x1x32xf32, #tpu.memory_space<vmem>>, vector<1x1x32xf32>
    %789 = vector.shape_cast %788 : vector<1x1x32xf32> to vector<1x32xf32>
    %cst_271 = arith.constant 0.000000e+00 : f32
    %790 = vector.broadcast %cst_271 : f32 to vector<2x32xf32>
    %cst_272 = arith.constant dense<0.000000e+00> : vector<2x32xf32>
    %791 = tpu.matmul %790, %783, %cst_272 {dimension_numbers = #tpu.dot_dimension_numbers<[1], [0], [0], [1], [0, 0, 1, 1], [], []>} : vector<2x32xf32>, vector<32x32xf32>, vector<2x32xf32> -> vector<2x32xf32>
    %cst_273 = arith.constant dense<0.000000e+00> : vector<2x32xf32>
    %792 = tpu.matmul %790, %785, %cst_273 {dimension_numbers = #tpu.dot_dimension_numbers<[1], [0], [0], [1], [0, 0, 1, 1], [], []>} : vector<2x32xf32>, vector<32x32xf32>, vector<2x32xf32> -> vector<2x32xf32>
    %cst_274 = arith.constant dense<0.000000e+00> : vector<2x32xf32>
    %793 = tpu.matmul %790, %787, %cst_274 {dimension_numbers = #tpu.dot_dimension_numbers<[1], [0], [0], [1], [0, 0, 1, 1], [], []>} : vector<2x32xf32>, vector<32x32xf32>, vector<2x32xf32> -> vector<2x32xf32>
    %794 = vector.broadcast %789 : vector<1x32xf32> to vector<2x32xf32>
    %795 = arith.addf %793, %794 : vector<2x32xf32>
    %796 = vector.extract_strided_slice %779 {offsets = [0, 0], sizes = [2, 32], strides = [1, 1]} : vector<16x32xf32> to vector<2x32xf32>
    %797 = arith.addf %796, %791 : vector<2x32xf32>
    %798 = arith.negf %797 : vector<2x32xf32>
    %799 = math.exp %798 : vector<2x32xf32>
    %cst_275 = arith.constant 1.000000e+00 : f32
    %800 = vector.broadcast %cst_275 : f32 to vector<2x32xf32>
    %801 = arith.addf %800, %799 : vector<2x32xf32>
    %802 = arith.divf %800, %801 : vector<2x32xf32>
    %803 = vector.extract_strided_slice %780 {offsets = [0, 0], sizes = [2, 32], strides = [1, 1]} : vector<16x32xf32> to vector<2x32xf32>
    %804 = arith.addf %803, %792 : vector<2x32xf32>
    %805 = arith.negf %804 : vector<2x32xf32>
    %806 = math.exp %805 : vector<2x32xf32>
    %cst_276 = arith.constant 1.000000e+00 : f32
    %807 = vector.broadcast %cst_276 : f32 to vector<2x32xf32>
    %808 = arith.addf %807, %806 : vector<2x32xf32>
    %809 = arith.divf %807, %808 : vector<2x32xf32>
    %810 = vector.extract_strided_slice %781 {offsets = [0, 0], sizes = [2, 32], strides = [1, 1]} : vector<16x32xf32> to vector<2x32xf32>
    %811 = arith.mulf %802, %795 : vector<2x32xf32>
    %812 = arith.addf %810, %811 : vector<2x32xf32>
    %813 = math.tanh %812 : vector<2x32xf32>
    %cst_277 = arith.constant 1.000000e+00 : f32
    %814 = vector.broadcast %cst_277 : f32 to vector<2x32xf32>
    %815 = arith.subf %814, %809 : vector<2x32xf32>
    %816 = arith.mulf %815, %813 : vector<2x32xf32>
    %817 = arith.mulf %809, %790 : vector<2x32xf32>
    %818 = arith.addf %816, %817 : vector<2x32xf32>
    %cst_278 = arith.constant dense<0.000000e+00> : vector<2x32xf32>
    %819 = tpu.matmul %818, %783, %cst_278 {dimension_numbers = #tpu.dot_dimension_numbers<[1], [0], [0], [1], [0, 0, 1, 1], [], []>} : vector<2x32xf32>, vector<32x32xf32>, vector<2x32xf32> -> vector<2x32xf32>
    %cst_279 = arith.constant dense<0.000000e+00> : vector<2x32xf32>
    %820 = tpu.matmul %818, %785, %cst_279 {dimension_numbers = #tpu.dot_dimension_numbers<[1], [0], [0], [1], [0, 0, 1, 1], [], []>} : vector<2x32xf32>, vector<32x32xf32>, vector<2x32xf32> -> vector<2x32xf32>
    %cst_280 = arith.constant dense<0.000000e+00> : vector<2x32xf32>
    %821 = tpu.matmul %818, %787, %cst_280 {dimension_numbers = #tpu.dot_dimension_numbers<[1], [0], [0], [1], [0, 0, 1, 1], [], []>} : vector<2x32xf32>, vector<32x32xf32>, vector<2x32xf32> -> vector<2x32xf32>
    %822 = vector.broadcast %789 : vector<1x32xf32> to vector<2x32xf32>
    %823 = arith.addf %821, %822 : vector<2x32xf32>
    %824 = vector.extract_strided_slice %779 {offsets = [2, 0], sizes = [2, 32], strides = [1, 1]} : vector<16x32xf32> to vector<2x32xf32>
    %825 = arith.addf %824, %819 : vector<2x32xf32>
    %826 = arith.negf %825 : vector<2x32xf32>
    %827 = math.exp %826 : vector<2x32xf32>
    %cst_281 = arith.constant 1.000000e+00 : f32
    %828 = vector.broadcast %cst_281 : f32 to vector<2x32xf32>
    %829 = arith.addf %828, %827 : vector<2x32xf32>
    %830 = arith.divf %828, %829 : vector<2x32xf32>
    %831 = vector.extract_strided_slice %780 {offsets = [2, 0], sizes = [2, 32], strides = [1, 1]} : vector<16x32xf32> to vector<2x32xf32>
    %832 = arith.addf %831, %820 : vector<2x32xf32>
    %833 = arith.negf %832 : vector<2x32xf32>
    %834 = math.exp %833 : vector<2x32xf32>
    %cst_282 = arith.constant 1.000000e+00 : f32
    %835 = vector.broadcast %cst_282 : f32 to vector<2x32xf32>
    %836 = arith.addf %835, %834 : vector<2x32xf32>
    %837 = arith.divf %835, %836 : vector<2x32xf32>
    %838 = vector.extract_strided_slice %781 {offsets = [2, 0], sizes = [2, 32], strides = [1, 1]} : vector<16x32xf32> to vector<2x32xf32>
    %839 = arith.mulf %830, %823 : vector<2x32xf32>
    %840 = arith.addf %838, %839 : vector<2x32xf32>
    %841 = math.tanh %840 : vector<2x32xf32>
    %cst_283 = arith.constant 1.000000e+00 : f32
    %842 = vector.broadcast %cst_283 : f32 to vector<2x32xf32>
    %843 = arith.subf %842, %837 : vector<2x32xf32>
    %844 = arith.mulf %843, %841 : vector<2x32xf32>
    %845 = arith.mulf %837, %818 : vector<2x32xf32>
    %846 = arith.addf %844, %845 : vector<2x32xf32>
    %cst_284 = arith.constant dense<0.000000e+00> : vector<2x32xf32>
    %847 = tpu.matmul %846, %783, %cst_284 {dimension_numbers = #tpu.dot_dimension_numbers<[1], [0], [0], [1], [0, 0, 1, 1], [], []>} : vector<2x32xf32>, vector<32x32xf32>, vector<2x32xf32> -> vector<2x32xf32>
    %cst_285 = arith.constant dense<0.000000e+00> : vector<2x32xf32>
    %848 = tpu.matmul %846, %785, %cst_285 {dimension_numbers = #tpu.dot_dimension_numbers<[1], [0], [0], [1], [0, 0, 1, 1], [], []>} : vector<2x32xf32>, vector<32x32xf32>, vector<2x32xf32> -> vector<2x32xf32>
    %cst_286 = arith.constant dense<0.000000e+00> : vector<2x32xf32>
    %849 = tpu.matmul %846, %787, %cst_286 {dimension_numbers = #tpu.dot_dimension_numbers<[1], [0], [0], [1], [0, 0, 1, 1], [], []>} : vector<2x32xf32>, vector<32x32xf32>, vector<2x32xf32> -> vector<2x32xf32>
    %850 = vector.broadcast %789 : vector<1x32xf32> to vector<2x32xf32>
    %851 = arith.addf %849, %850 : vector<2x32xf32>
    %852 = vector.extract_strided_slice %779 {offsets = [4, 0], sizes = [2, 32], strides = [1, 1]} : vector<16x32xf32> to vector<2x32xf32>
    %853 = arith.addf %852, %847 : vector<2x32xf32>
    %854 = arith.negf %853 : vector<2x32xf32>
    %855 = math.exp %854 : vector<2x32xf32>
    %cst_287 = arith.constant 1.000000e+00 : f32
    %856 = vector.broadcast %cst_287 : f32 to vector<2x32xf32>
    %857 = arith.addf %856, %855 : vector<2x32xf32>
    %858 = arith.divf %856, %857 : vector<2x32xf32>
    %859 = vector.extract_strided_slice %780 {offsets = [4, 0], sizes = [2, 32], strides = [1, 1]} : vector<16x32xf32> to vector<2x32xf32>
    %860 = arith.addf %859, %848 : vector<2x32xf32>
    %861 = arith.negf %860 : vector<2x32xf32>
    %862 = math.exp %861 : vector<2x32xf32>
    %cst_288 = arith.constant 1.000000e+00 : f32
    %863 = vector.broadcast %cst_288 : f32 to vector<2x32xf32>
    %864 = arith.addf %863, %862 : vector<2x32xf32>
    %865 = arith.divf %863, %864 : vector<2x32xf32>
    %866 = vector.extract_strided_slice %781 {offsets = [4, 0], sizes = [2, 32], strides = [1, 1]} : vector<16x32xf32> to vector<2x32xf32>
    %867 = arith.mulf %858, %851 : vector<2x32xf32>
    %868 = arith.addf %866, %867 : vector<2x32xf32>
    %869 = math.tanh %868 : vector<2x32xf32>
    %cst_289 = arith.constant 1.000000e+00 : f32
    %870 = vector.broadcast %cst_289 : f32 to vector<2x32xf32>
    %871 = arith.subf %870, %865 : vector<2x32xf32>
    %872 = arith.mulf %871, %869 : vector<2x32xf32>
    %873 = arith.mulf %865, %846 : vector<2x32xf32>
    %874 = arith.addf %872, %873 : vector<2x32xf32>
    %cst_290 = arith.constant dense<0.000000e+00> : vector<2x32xf32>
    %875 = tpu.matmul %874, %783, %cst_290 {dimension_numbers = #tpu.dot_dimension_numbers<[1], [0], [0], [1], [0, 0, 1, 1], [], []>} : vector<2x32xf32>, vector<32x32xf32>, vector<2x32xf32> -> vector<2x32xf32>
    %cst_291 = arith.constant dense<0.000000e+00> : vector<2x32xf32>
    %876 = tpu.matmul %874, %785, %cst_291 {dimension_numbers = #tpu.dot_dimension_numbers<[1], [0], [0], [1], [0, 0, 1, 1], [], []>} : vector<2x32xf32>, vector<32x32xf32>, vector<2x32xf32> -> vector<2x32xf32>
    %cst_292 = arith.constant dense<0.000000e+00> : vector<2x32xf32>
    %877 = tpu.matmul %874, %787, %cst_292 {dimension_numbers = #tpu.dot_dimension_numbers<[1], [0], [0], [1], [0, 0, 1, 1], [], []>} : vector<2x32xf32>, vector<32x32xf32>, vector<2x32xf32> -> vector<2x32xf32>
    %878 = vector.broadcast %789 : vector<1x32xf32> to vector<2x32xf32>
    %879 = arith.addf %877, %878 : vector<2x32xf32>
    %880 = vector.extract_strided_slice %779 {offsets = [6, 0], sizes = [2, 32], strides = [1, 1]} : vector<16x32xf32> to vector<2x32xf32>
    %881 = arith.addf %880, %875 : vector<2x32xf32>
    %882 = arith.negf %881 : vector<2x32xf32>
    %883 = math.exp %882 : vector<2x32xf32>
    %cst_293 = arith.constant 1.000000e+00 : f32
    %884 = vector.broadcast %cst_293 : f32 to vector<2x32xf32>
    %885 = arith.addf %884, %883 : vector<2x32xf32>
    %886 = arith.divf %884, %885 : vector<2x32xf32>
    %887 = vector.extract_strided_slice %780 {offsets = [6, 0], sizes = [2, 32], strides = [1, 1]} : vector<16x32xf32> to vector<2x32xf32>
    %888 = arith.addf %887, %876 : vector<2x32xf32>
    %889 = arith.negf %888 : vector<2x32xf32>
    %890 = math.exp %889 : vector<2x32xf32>
    %cst_294 = arith.constant 1.000000e+00 : f32
    %891 = vector.broadcast %cst_294 : f32 to vector<2x32xf32>
    %892 = arith.addf %891, %890 : vector<2x32xf32>
    %893 = arith.divf %891, %892 : vector<2x32xf32>
    %894 = vector.extract_strided_slice %781 {offsets = [6, 0], sizes = [2, 32], strides = [1, 1]} : vector<16x32xf32> to vector<2x32xf32>
    %895 = arith.mulf %886, %879 : vector<2x32xf32>
    %896 = arith.addf %894, %895 : vector<2x32xf32>
    %897 = math.tanh %896 : vector<2x32xf32>
    %cst_295 = arith.constant 1.000000e+00 : f32
    %898 = vector.broadcast %cst_295 : f32 to vector<2x32xf32>
    %899 = arith.subf %898, %893 : vector<2x32xf32>
    %900 = arith.mulf %899, %897 : vector<2x32xf32>
    %901 = arith.mulf %893, %874 : vector<2x32xf32>
    %902 = arith.addf %900, %901 : vector<2x32xf32>
    %cst_296 = arith.constant dense<0.000000e+00> : vector<2x32xf32>
    %903 = tpu.matmul %902, %783, %cst_296 {dimension_numbers = #tpu.dot_dimension_numbers<[1], [0], [0], [1], [0, 0, 1, 1], [], []>} : vector<2x32xf32>, vector<32x32xf32>, vector<2x32xf32> -> vector<2x32xf32>
    %cst_297 = arith.constant dense<0.000000e+00> : vector<2x32xf32>
    %904 = tpu.matmul %902, %785, %cst_297 {dimension_numbers = #tpu.dot_dimension_numbers<[1], [0], [0], [1], [0, 0, 1, 1], [], []>} : vector<2x32xf32>, vector<32x32xf32>, vector<2x32xf32> -> vector<2x32xf32>
    %cst_298 = arith.constant dense<0.000000e+00> : vector<2x32xf32>
    %905 = tpu.matmul %902, %787, %cst_298 {dimension_numbers = #tpu.dot_dimension_numbers<[1], [0], [0], [1], [0, 0, 1, 1], [], []>} : vector<2x32xf32>, vector<32x32xf32>, vector<2x32xf32> -> vector<2x32xf32>
    %906 = vector.broadcast %789 : vector<1x32xf32> to vector<2x32xf32>
    %907 = arith.addf %905, %906 : vector<2x32xf32>
    %908 = vector.extract_strided_slice %779 {offsets = [8, 0], sizes = [2, 32], strides = [1, 1]} : vector<16x32xf32> to vector<2x32xf32>
    %909 = arith.addf %908, %903 : vector<2x32xf32>
    %910 = arith.negf %909 : vector<2x32xf32>
    %911 = math.exp %910 : vector<2x32xf32>
    %cst_299 = arith.constant 1.000000e+00 : f32
    %912 = vector.broadcast %cst_299 : f32 to vector<2x32xf32>
    %913 = arith.addf %912, %911 : vector<2x32xf32>
    %914 = arith.divf %912, %913 : vector<2x32xf32>
    %915 = vector.extract_strided_slice %780 {offsets = [8, 0], sizes = [2, 32], strides = [1, 1]} : vector<16x32xf32> to vector<2x32xf32>
    %916 = arith.addf %915, %904 : vector<2x32xf32>
    %917 = arith.negf %916 : vector<2x32xf32>
    %918 = math.exp %917 : vector<2x32xf32>
    %cst_300 = arith.constant 1.000000e+00 : f32
    %919 = vector.broadcast %cst_300 : f32 to vector<2x32xf32>
    %920 = arith.addf %919, %918 : vector<2x32xf32>
    %921 = arith.divf %919, %920 : vector<2x32xf32>
    %922 = vector.extract_strided_slice %781 {offsets = [8, 0], sizes = [2, 32], strides = [1, 1]} : vector<16x32xf32> to vector<2x32xf32>
    %923 = arith.mulf %914, %907 : vector<2x32xf32>
    %924 = arith.addf %922, %923 : vector<2x32xf32>
    %925 = math.tanh %924 : vector<2x32xf32>
    %cst_301 = arith.constant 1.000000e+00 : f32
    %926 = vector.broadcast %cst_301 : f32 to vector<2x32xf32>
    %927 = arith.subf %926, %921 : vector<2x32xf32>
    %928 = arith.mulf %927, %925 : vector<2x32xf32>
    %929 = arith.mulf %921, %902 : vector<2x32xf32>
    %930 = arith.addf %928, %929 : vector<2x32xf32>
    %cst_302 = arith.constant dense<0.000000e+00> : vector<2x32xf32>
    %931 = tpu.matmul %930, %783, %cst_302 {dimension_numbers = #tpu.dot_dimension_numbers<[1], [0], [0], [1], [0, 0, 1, 1], [], []>} : vector<2x32xf32>, vector<32x32xf32>, vector<2x32xf32> -> vector<2x32xf32>
    %cst_303 = arith.constant dense<0.000000e+00> : vector<2x32xf32>
    %932 = tpu.matmul %930, %785, %cst_303 {dimension_numbers = #tpu.dot_dimension_numbers<[1], [0], [0], [1], [0, 0, 1, 1], [], []>} : vector<2x32xf32>, vector<32x32xf32>, vector<2x32xf32> -> vector<2x32xf32>
    %cst_304 = arith.constant dense<0.000000e+00> : vector<2x32xf32>
    %933 = tpu.matmul %930, %787, %cst_304 {dimension_numbers = #tpu.dot_dimension_numbers<[1], [0], [0], [1], [0, 0, 1, 1], [], []>} : vector<2x32xf32>, vector<32x32xf32>, vector<2x32xf32> -> vector<2x32xf32>
    %934 = vector.broadcast %789 : vector<1x32xf32> to vector<2x32xf32>
    %935 = arith.addf %933, %934 : vector<2x32xf32>
    %936 = vector.extract_strided_slice %779 {offsets = [10, 0], sizes = [2, 32], strides = [1, 1]} : vector<16x32xf32> to vector<2x32xf32>
    %937 = arith.addf %936, %931 : vector<2x32xf32>
    %938 = arith.negf %937 : vector<2x32xf32>
    %939 = math.exp %938 : vector<2x32xf32>
    %cst_305 = arith.constant 1.000000e+00 : f32
    %940 = vector.broadcast %cst_305 : f32 to vector<2x32xf32>
    %941 = arith.addf %940, %939 : vector<2x32xf32>
    %942 = arith.divf %940, %941 : vector<2x32xf32>
    %943 = vector.extract_strided_slice %780 {offsets = [10, 0], sizes = [2, 32], strides = [1, 1]} : vector<16x32xf32> to vector<2x32xf32>
    %944 = arith.addf %943, %932 : vector<2x32xf32>
    %945 = arith.negf %944 : vector<2x32xf32>
    %946 = math.exp %945 : vector<2x32xf32>
    %cst_306 = arith.constant 1.000000e+00 : f32
    %947 = vector.broadcast %cst_306 : f32 to vector<2x32xf32>
    %948 = arith.addf %947, %946 : vector<2x32xf32>
    %949 = arith.divf %947, %948 : vector<2x32xf32>
    %950 = vector.extract_strided_slice %781 {offsets = [10, 0], sizes = [2, 32], strides = [1, 1]} : vector<16x32xf32> to vector<2x32xf32>
    %951 = arith.mulf %942, %935 : vector<2x32xf32>
    %952 = arith.addf %950, %951 : vector<2x32xf32>
    %953 = math.tanh %952 : vector<2x32xf32>
    %cst_307 = arith.constant 1.000000e+00 : f32
    %954 = vector.broadcast %cst_307 : f32 to vector<2x32xf32>
    %955 = arith.subf %954, %949 : vector<2x32xf32>
    %956 = arith.mulf %955, %953 : vector<2x32xf32>
    %957 = arith.mulf %949, %930 : vector<2x32xf32>
    %958 = arith.addf %956, %957 : vector<2x32xf32>
    %cst_308 = arith.constant dense<0.000000e+00> : vector<2x32xf32>
    %959 = tpu.matmul %958, %783, %cst_308 {dimension_numbers = #tpu.dot_dimension_numbers<[1], [0], [0], [1], [0, 0, 1, 1], [], []>} : vector<2x32xf32>, vector<32x32xf32>, vector<2x32xf32> -> vector<2x32xf32>
    %cst_309 = arith.constant dense<0.000000e+00> : vector<2x32xf32>
    %960 = tpu.matmul %958, %785, %cst_309 {dimension_numbers = #tpu.dot_dimension_numbers<[1], [0], [0], [1], [0, 0, 1, 1], [], []>} : vector<2x32xf32>, vector<32x32xf32>, vector<2x32xf32> -> vector<2x32xf32>
    %cst_310 = arith.constant dense<0.000000e+00> : vector<2x32xf32>
    %961 = tpu.matmul %958, %787, %cst_310 {dimension_numbers = #tpu.dot_dimension_numbers<[1], [0], [0], [1], [0, 0, 1, 1], [], []>} : vector<2x32xf32>, vector<32x32xf32>, vector<2x32xf32> -> vector<2x32xf32>
    %962 = vector.broadcast %789 : vector<1x32xf32> to vector<2x32xf32>
    %963 = arith.addf %961, %962 : vector<2x32xf32>
    %964 = vector.extract_strided_slice %779 {offsets = [12, 0], sizes = [2, 32], strides = [1, 1]} : vector<16x32xf32> to vector<2x32xf32>
    %965 = arith.addf %964, %959 : vector<2x32xf32>
    %966 = arith.negf %965 : vector<2x32xf32>
    %967 = math.exp %966 : vector<2x32xf32>
    %cst_311 = arith.constant 1.000000e+00 : f32
    %968 = vector.broadcast %cst_311 : f32 to vector<2x32xf32>
    %969 = arith.addf %968, %967 : vector<2x32xf32>
    %970 = arith.divf %968, %969 : vector<2x32xf32>
    %971 = vector.extract_strided_slice %780 {offsets = [12, 0], sizes = [2, 32], strides = [1, 1]} : vector<16x32xf32> to vector<2x32xf32>
    %972 = arith.addf %971, %960 : vector<2x32xf32>
    %973 = arith.negf %972 : vector<2x32xf32>
    %974 = math.exp %973 : vector<2x32xf32>
    %cst_312 = arith.constant 1.000000e+00 : f32
    %975 = vector.broadcast %cst_312 : f32 to vector<2x32xf32>
    %976 = arith.addf %975, %974 : vector<2x32xf32>
    %977 = arith.divf %975, %976 : vector<2x32xf32>
    %978 = vector.extract_strided_slice %781 {offsets = [12, 0], sizes = [2, 32], strides = [1, 1]} : vector<16x32xf32> to vector<2x32xf32>
    %979 = arith.mulf %970, %963 : vector<2x32xf32>
    %980 = arith.addf %978, %979 : vector<2x32xf32>
    %981 = math.tanh %980 : vector<2x32xf32>
    %cst_313 = arith.constant 1.000000e+00 : f32
    %982 = vector.broadcast %cst_313 : f32 to vector<2x32xf32>
    %983 = arith.subf %982, %977 : vector<2x32xf32>
    %984 = arith.mulf %983, %981 : vector<2x32xf32>
    %985 = arith.mulf %977, %958 : vector<2x32xf32>
    %986 = arith.addf %984, %985 : vector<2x32xf32>
    %cst_314 = arith.constant dense<0.000000e+00> : vector<2x32xf32>
    %987 = tpu.matmul %986, %783, %cst_314 {dimension_numbers = #tpu.dot_dimension_numbers<[1], [0], [0], [1], [0, 0, 1, 1], [], []>} : vector<2x32xf32>, vector<32x32xf32>, vector<2x32xf32> -> vector<2x32xf32>
    %cst_315 = arith.constant dense<0.000000e+00> : vector<2x32xf32>
    %988 = tpu.matmul %986, %785, %cst_315 {dimension_numbers = #tpu.dot_dimension_numbers<[1], [0], [0], [1], [0, 0, 1, 1], [], []>} : vector<2x32xf32>, vector<32x32xf32>, vector<2x32xf32> -> vector<2x32xf32>
    %cst_316 = arith.constant dense<0.000000e+00> : vector<2x32xf32>
    %989 = tpu.matmul %986, %787, %cst_316 {dimension_numbers = #tpu.dot_dimension_numbers<[1], [0], [0], [1], [0, 0, 1, 1], [], []>} : vector<2x32xf32>, vector<32x32xf32>, vector<2x32xf32> -> vector<2x32xf32>
    %990 = vector.broadcast %789 : vector<1x32xf32> to vector<2x32xf32>
    %991 = arith.addf %989, %990 : vector<2x32xf32>
    %992 = vector.extract_strided_slice %779 {offsets = [14, 0], sizes = [2, 32], strides = [1, 1]} : vector<16x32xf32> to vector<2x32xf32>
    %993 = arith.addf %992, %987 : vector<2x32xf32>
    %994 = arith.negf %993 : vector<2x32xf32>
    %995 = math.exp %994 : vector<2x32xf32>
    %cst_317 = arith.constant 1.000000e+00 : f32
    %996 = vector.broadcast %cst_317 : f32 to vector<2x32xf32>
    %997 = arith.addf %996, %995 : vector<2x32xf32>
    %998 = arith.divf %996, %997 : vector<2x32xf32>
    %999 = vector.extract_strided_slice %780 {offsets = [14, 0], sizes = [2, 32], strides = [1, 1]} : vector<16x32xf32> to vector<2x32xf32>
    %1000 = arith.addf %999, %988 : vector<2x32xf32>
    %1001 = arith.negf %1000 : vector<2x32xf32>
    %1002 = math.exp %1001 : vector<2x32xf32>
    %cst_318 = arith.constant 1.000000e+00 : f32
    %1003 = vector.broadcast %cst_318 : f32 to vector<2x32xf32>
    %1004 = arith.addf %1003, %1002 : vector<2x32xf32>
    %1005 = arith.divf %1003, %1004 : vector<2x32xf32>
    %1006 = vector.extract_strided_slice %781 {offsets = [14, 0], sizes = [2, 32], strides = [1, 1]} : vector<16x32xf32> to vector<2x32xf32>
    %1007 = arith.mulf %998, %991 : vector<2x32xf32>
    %1008 = arith.addf %1006, %1007 : vector<2x32xf32>
    %1009 = math.tanh %1008 : vector<2x32xf32>
    %cst_319 = arith.constant 1.000000e+00 : f32
    %1010 = vector.broadcast %cst_319 : f32 to vector<2x32xf32>
    %1011 = arith.subf %1010, %1005 : vector<2x32xf32>
    %1012 = arith.mulf %1011, %1009 : vector<2x32xf32>
    %1013 = arith.mulf %1005, %986 : vector<2x32xf32>
    %1014 = arith.addf %1012, %1013 : vector<2x32xf32>
    %1015 = math.tanh %1014 : vector<2x32xf32>
    %c3_320 = arith.constant 3 : index
    %1016 = memref.load %arg12[%c3_320] : memref<4xf32, #tpu.memory_space<smem>>
    %1017 = vector.broadcast %1016 : f32 to vector<2x32xf32>
    %1018 = arith.mulf %1015, %1017 : vector<2x32xf32>
    %1019 = arith.addf %770, %1018 : vector<2x32xf32>
    %c0_321 = arith.constant 0 : index
    %1020 = memref.load %arg13[%c0_321] : memref<1xf32, #tpu.memory_space<smem>>
    %1021 = vector.broadcast %1020 : f32 to vector<2x32xf32>
    %1022 = arith.addf %1019, %1021 : vector<2x32xf32>
    %c0_322 = arith.constant 0 : index
    %c0_323 = arith.constant 0 : index
    %1023 = vector.load %arg8[%c0_322, %c0_323] : memref<32x32xf32, #tpu.memory_space<vmem>>, vector<32x32xf32>
    %cst_324 = arith.constant dense<0.000000e+00> : vector<2x32xf32>
    %1024 = tpu.matmul %1022, %1023, %cst_324 {dimension_numbers = #tpu.dot_dimension_numbers<[1], [0], [0], [1], [0, 0, 1, 1], [], []>} : vector<2x32xf32>, vector<32x32xf32>, vector<2x32xf32> -> vector<2x32xf32>
    %c0_325 = arith.constant 0 : index
    %c0_326 = arith.constant 0 : index
    %1025 = vector.load %arg9[%c0_325, %c0_326] : memref<1x32xf32, #tpu.memory_space<vmem>>, vector<1x32xf32>
    %1026 = vector.broadcast %1025 : vector<1x32xf32> to vector<2x32xf32>
    %1027 = arith.addf %1024, %1026 : vector<2x32xf32>
    %1028 = math.tanh %1027 : vector<2x32xf32>
    %c0_327 = arith.constant 0 : index
    %c0_328 = arith.constant 0 : index
    %1029 = vector.load %arg10[%c0_327, %c0_328] : memref<32x3xf32, #tpu.memory_space<vmem>>, vector<32x3xf32>
    %cst_329 = arith.constant dense<0.000000e+00> : vector<2x3xf32>
    %1030 = tpu.matmul %1028, %1029, %cst_329 {dimension_numbers = #tpu.dot_dimension_numbers<[1], [0], [0], [1], [0, 0, 1, 1], [], []>} : vector<2x32xf32>, vector<32x3xf32>, vector<2x3xf32> -> vector<2x3xf32>
    %c0_330 = arith.constant 0 : index
    %c0_331 = arith.constant 0 : index
    %1031 = vector.load %arg11[%c0_330, %c0_331] : memref<1x3xf32, #tpu.memory_space<vmem>>, vector<1x3xf32>
    %1032 = vector.broadcast %1031 : vector<1x3xf32> to vector<2x3xf32>
    %1033 = arith.addf %1030, %1032 : vector<2x3xf32>
    %cst_332 = arith.constant dense<0xFF800000> : vector<2xf32>
    %1034 = vector.multi_reduction <maximumf>, %1033, %cst_332 [1] : vector<2x3xf32> to vector<2xf32>
    %1035 = vector.shape_cast %1034 : vector<2xf32> to vector<2x1xf32>
    %1036 = vector.broadcast %1035 : vector<2x1xf32> to vector<2x3xf32>
    %1037 = arith.subf %1033, %1036 : vector<2x3xf32>
    %1038 = math.exp %1037 : vector<2x3xf32>
    %cst_333 = arith.constant dense<0.000000e+00> : vector<2xf32>
    %1039 = vector.multi_reduction <add>, %1038, %cst_333 [1] : vector<2x3xf32> to vector<2xf32>
    %1040 = vector.shape_cast %1039 : vector<2xf32> to vector<2x1xf32>
    %1041 = tpu.reciprocal %1040 {approx = true} : vector<2x1xf32> -> vector<2x1xf32>
    %1042 = arith.mulf %1040, %1041 : vector<2x1xf32>
    %cst_334 = arith.constant 2.000000e+00 : f32
    %1043 = vector.broadcast %cst_334 : f32 to vector<2x1xf32>
    %1044 = arith.subf %1043, %1042 : vector<2x1xf32>
    %1045 = arith.mulf %1041, %1044 : vector<2x1xf32>
    %1046 = vector.broadcast %1045 : vector<2x1xf32> to vector<2x3xf32>
    %1047 = arith.mulf %1038, %1046 : vector<2x3xf32>
    %c0_335 = arith.constant 0 : index
    %c0_336 = arith.constant 0 : index
    %1048 = vector.load %arg14[%c0_335, %c0_336] : memref<2x3xf32, #tpu.memory_space<vmem>>, vector<2x3xf32>
    tpu.vector_store %arg14[%c0_335, %c0_336], %1047 {strides = array<i32>} : memref<2x3xf32, #tpu.memory_space<vmem>>, vector<2x3xf32>,
    return
  }
}

</mosaic_0001>

<bundles_post_ra>
// kernel: policy_network_forward.1
= control target key start
LH: loop header
LB: loop body
LE: loop exit
PB: predicated region body
PF: predicated region fallthrough
CT: control target
= control target key end

     0   :  { %20 = vsyncpa [#allocation6], 0  ;;  %s13376_s0 = inlined_call_operand.vmem [shape: f32[16,8], index: 0, kind: input, shape index: {}]   ;;  %s13377_s1 = inlined_call_operand.vmem [shape: f32[8,96], index: 1, kind: input, shape index: {}]   ;;  %s13378_s2 = inlined_call_operand.vmem [shape: f32[3,32,96], index: 2, kind: input, shape index: {}]   ;;  %s13379_s3 = inlined_call_operand.vmem [shape: f32[4,1,96], index: 3, kind: input, shape index: {}]   ;;  %s13380_s4 = inlined_call_operand.hbm [shape: f32[4,32,32], index: 4, kind: input, shape index: {}]   ;;  %s13381_s5 = inlined_call_operand.hbm [shape: f32[4,32,32], index: 5, kind: input, shape index: {}]   ;;  %s13382_s6 = inlined_call_operand.hbm [shape: f32[4,32,32], index: 6, kind: input, shape index: {}]   ;;  %s13383_s7 = inlined_call_operand.vmem [shape: f32[4,1,32], index: 7, kind: input, shape index: {}]   ;;  %s13384_s8 = inlined_call_operand.hbm [shape: f32[32,32], index: 8, kind: input, shape index: {}]   ;;  %s13385_s9 = inlined_call_operand.vmem [shape: f32[1,32], index: 9, kind: input, shape index: {}]   ;;  %s13386_s10 = inlined_call_operand.vmem [shape: f32[32,3], index: 10, kind: input, shape index: {}]   ;;  %s13387_s11 = inlined_call_operand.vmem [shape: f32[1,3], index: 11, kind: input, shape index: {}]   ;;  %s13388_s12 = inlined_call_operand.vmem [shape: f32[4], index: 12, kind: input, shape index: {}]   ;;  %s13389_s13 = inlined_call_operand.<no memory space> [shape: f32[1], index: 13, kind: input, shape index: {}]   ;;  %s13390_s14 = inlined_call_operand.hbm [shape: f32[2,3], index: 14, kind: output, shape index: {}]  }
   0x1   :  { %21 = vsyncpa [#allocation10], 0 }
   0x2   :  { %22 = vsyncpa [#allocation13], 0 }
   0x3   :  { %23 = vsyncpa [#allocation8], 0 }
   0x4   :  { %24 = vsyncpa [#allocation7], 0  ;;  %s11968_s29 = smov [#allocation9]   ;;  %s11969_s15 = smov [#allocation5]  }
   0x5   :  { %s50_s30 = sshll.u32 %s11968_s29, 4  ;;  %s38_s16 = sshll.u32 %s11969_s15, 4  ;;  %s51_s30 = int_to_ptr.vmem [resolvable:$true] %s50_s30  ;;  %s12057_s16 = int_to_ptr.vmem [resolvable:$true] %s38_s16 }
   0x6   :  { %s11836_s19 = scalar_lea.hbm %s13381_s5, 2048 }
   0x7   :  { %p11837_p0 = scmp.ne.s32.totalorder %s13381_s5, %s11836_s19  ;;  %p11840_p1 = scmp.lt.u32.totalorder %s11836_s19, %s13381_s5 }
   0x9   :  { %p11842_p2 = pnand %p11840_p1, %p11837_p0 }
   0xb   :  { %11845 = shalt.err (!%p11842_p2)
}
   0xc   :  { %s11846_s24 = scalar_lea.vmem %s51_s30, 2048  ;;  %p11851_p4 = scmp.lt.s32.totalorder %s51_s30, %s51_s30 }
   0xd   :  { %p11847_p3 = scmp.ne.s32.totalorder %s51_s30, %s11846_s24  ;;  %p11852_p5 = scmp.lt.s32.totalorder %s11846_s24, %s11846_s24 }
   0xf   :  { %p11853_p6 = por %p11852_p5, %p11851_p4 }
  0x11   :  { %p11854_p7 = pnand %p11853_p6, %p11847_p3 }
  0x13   :  { %11857 = shalt.err (!%p11854_p7)
}
  0x14   :  { %s11970_s25 = smov 128   ;;  %s11971_s26 = smov 8  }
  0x15   :  { %56 = dma.hbm_to_vmem [thread:$0]  %s13381_s5, 2048, %s51_s30, [#allocation10], %s11970_s25, %s11970_s25, %s11971_s26  }
  0x16   :  { %s11858_s17 = scalar_lea.hbm %s13380_s4, 2048 }
  0x17   :  { %p11859_p8 = scmp.ne.s32.totalorder %s13380_s4, %s11858_s17  ;;  %p11862_p9 = scmp.lt.u32.totalorder %s11858_s17, %s13380_s4 }
  0x19   :  { %p11864_p10 = pnand %p11862_p9, %p11859_p8 }
  0x1b   :  { %11867 = shalt.err (!%p11864_p10)
}
  0x1c   :  { %s11868_s22 = scalar_lea.vmem %s12057_s16, 2048  ;;  %p11873_p12 = scmp.lt.s32.totalorder %s12057_s16, %s12057_s16 }
  0x1d   :  { %p11869_p11 = scmp.ne.s32.totalorder %s12057_s16, %s11868_s22  ;;  %p11874_p13 = scmp.lt.s32.totalorder %s11868_s22, %s11868_s22 }
  0x1f   :  { %p11875_p0 = por %p11874_p13, %p11873_p12 }
  0x21   :  { %p11876_p1 = pnand %p11875_p0, %p11869_p11 }
  0x23   :  { %11879 = shalt.err (!%p11876_p1)
}
  0x24   :  { %44 = dma.hbm_to_vmem [thread:$0]  %s13380_s4, 2048, %s12057_s16, [#allocation6], %s11970_s25, %s11970_s25, %s11971_s26  }
  0x25   :  { %s11972_s23 = smov [#allocation11]   ;;  %s11973_s27 = smov [#allocation12]  }
  0x26   :  { %s62_s24 = sshll.u32 %s11972_s23, 4  ;;  %s76_s28 = sshll.u32 %s11973_s27, 4  ;;  %s63_s24 = int_to_ptr.vmem [resolvable:$true] %s62_s24  ;;  %s12094_s28 = int_to_ptr.vmem [resolvable:$true] %s76_s28 }
  0x27   :  { %s11880_s17 = scalar_lea.hbm %s13382_s6, 2048 }
  0x28   :  { %p11881_p2 = scmp.ne.s32.totalorder %s13382_s6, %s11880_s17  ;;  %p11884_p3 = scmp.lt.u32.totalorder %s11880_s17, %s13382_s6 }
  0x2a   :  { %p11886_p4 = pnand %p11884_p3, %p11881_p2 }
  0x2c   :  { %11889 = shalt.err (!%p11886_p4)
}
  0x2d   :  { %s11890_s4 = scalar_lea.vmem %s63_s24, 2048  ;;  %p11895_p6 = scmp.lt.s32.totalorder %s63_s24, %s63_s24 }
  0x2e   :  { %p11891_p5 = scmp.ne.s32.totalorder %s63_s24, %s11890_s4  ;;  %p11896_p7 = scmp.lt.s32.totalorder %s11890_s4, %s11890_s4 }
  0x30   :  { %p11897_p8 = por %p11896_p7, %p11895_p6 }
  0x32   :  { %p11898_p9 = pnand %p11897_p8, %p11891_p5 }
  0x34   :  { %11901 = shalt.err (!%p11898_p9)
}
  0x35   :  { %68 = dma.hbm_to_vmem [thread:$0]  %s13382_s6, 2048, %s63_s24, [#allocation10], %s11970_s25, %s11970_s25, %s11971_s26  }
  0x36   :  { %s11902_s23 = scalar_lea.hbm %s13384_s8, 512 }
  0x37   :  { %p11903_p10 = scmp.ne.s32.totalorder %s13384_s8, %s11902_s23  ;;  %p11906_p11 = scmp.lt.u32.totalorder %s11902_s23, %s13384_s8 }
  0x39   :  { %p11908_p12 = pnand %p11906_p11, %p11903_p10 }
  0x3b   :  { %11911 = shalt.err (!%p11908_p12)
}
  0x3c   :  { %s11912_s18 = scalar_lea.vmem %s12094_s28, 512  ;;  %p11917_p0 = scmp.lt.s32.totalorder %s12094_s28, %s12094_s28 }
  0x3d   :  { %p11913_p13 = scmp.ne.s32.totalorder %s12094_s28, %s11912_s18  ;;  %p11918_p1 = scmp.lt.s32.totalorder %s11912_s18, %s11912_s18 }
  0x3f   :  { %p11919_p2 = por %p11918_p1, %p11917_p0 }
  0x41   :  { %p11920_p3 = pnand %p11919_p2, %p11913_p13 }
  0x43   :  { %11923 = shalt.err (!%p11920_p3)
}
  0x44   :  { %82 = dma.hbm_to_vmem [thread:$0]  %s13384_s8, 512, %s12094_s28, [#allocation13], %s11970_s25, %s11970_s25, %s11971_s26  }
  0x45   :  { %s95_s21 = sshll.u32 %s13388_s12, 4  ;;  %s96_s21 = int_to_ptr.vmem [resolvable:$true] %s95_s21 }
  0x46   :  { %s11924_s4 = scalar_lea.vmem %s96_s21, 16  ;;  %p11929_p5 = scmp.lt.s32.totalorder %s96_s21, %s96_s21 }
  0x47   :  { %p11925_p4 = scmp.ne.s32.totalorder %s96_s21, %s11924_s4  ;;  %p11930_p6 = scmp.lt.s32.totalorder %s11924_s4, %s11924_s4 }
  0x49   :  { %p11931_p7 = por %p11930_p6, %p11929_p5 }
  0x4b   :  { %p11932_p8 = pnand %p11931_p7, %p11925_p4 }
  0x4d   :  { %11935 = shalt.err (!%p11932_p8)
}
  0x4e   :  { %s11974_s16 = smov [#allocation14]  }
  0x4f   :  { %98 = dma.vmem_to_smem %s96_s21, 16, %s11974_s16, [#allocation8]  }
  0x50   :  { %11958 = dma.done.wait [#allocation6], 2048  }
  0x51   :  { %11959 = vsyncadd [#allocation6], 4294965248 }
  0x52   :  { %11960 = dma.done.wait [#allocation10], 4096  }
  0x53   :  { %11961 = vsyncadd [#allocation10], 4294963200 }
  0x54   :  { %11962 = dma.done.wait [#allocation13], 512  }
  0x55   :  { %11963 = vsyncadd [#allocation13], 4294966784 }
  0x56   :  { %11964 = dma.done.wait [#allocation8], 16  }
  0x57   :  { %11965 = vsyncadd [#allocation8], 4294967280 }
  0x58   :  { %116 = sfence }
  0x59   :  { %v209_v0 = vld [vmem:[#allocation5] sm:$0xff]  ;;  %v210_v1 = vld [vmem:[#allocation5 + $0x8] sm:$0xff]  ;;  %vm127_vm0 = vcmask 64512   ;;  %v11975_v3 = vmov 0.0|0.0   ;;  %v211_v7 = vld [vmem:[#allocation5 + $0x10] sm:$0xff]  ;;  %vm11976_vm1 = vmmov 0  }
  0x5a   :  { %v119_v2 = vld [vmem:[%s13377_s1] sm:$0xff]  ;;  %10876 = vmatprep.subr.bf16.mxu1 %v11975_v3  ;;  %v12138_v4 = vpack.c.bf16 %v210_v1, %v209_v0  ;;  %v118_v6 = vld [vmem:[%s13376_s0 + $0x8] sm:$0xff]  ;;  %v212_v8 = vld [vmem:[#allocation5 + $0x18] sm:$0xff]  ;;  %v11977_v11 = vmov 0.0   ;;  %s11978_s23 = smov 64   ;;  %s11979_s27 = smov 32  }
  0x5b   :  { %9760 = vmatprep.subr.mxu0 %v119_v2  ;;  %v117_v5 = vld [vmem:[%s13376_s0] sm:$0xff]  ;;  %v12147_v9 = vpack.c.bf16 %v212_v8, %v211_v7  ;;  %9773 = vmatprep.mubr.msk.f32.mxu1 %vm11976_vm1, %v11977_v11  ;;  %v218_v13 = vld [vmem:[#allocation11 + $0x8] sm:$0xff]  ;;  %v215_v16 = vld [vmem:[#allocation9 + $0x10] sm:$0xff]  ;;  %s11980_s29 = smov 96   ;;  %vm479_vm2 = vcmask 254976   ;;  %vm222_vm3 = vcmask 261120  }
  0x5c   :  { %9761 = vmatpush3.msra.mxu0 %v119_v2  ;;  %9762 = vmatprep.mubr.msk.f32.mxu0 %vm127_vm0, %v117_v5  ;;  %v213_v10 = vld [vmem:[#allocation9] sm:$0xff]  ;;  %v214_v14 = vld [vmem:[#allocation9 + $0x8] sm:$0xff]  ;;  %v216_v17 = vld [vmem:[#allocation9 + $0x18] sm:$0xff]  ;;  %vm739_vm4 = vcmask 257026   ;;  %vm1265_vm5 = vcmask 261126   ;;  %vm1002_vm6 = vcmask 259076  }
  0x5d   :  { %10878 = vmatpush3.bf16.msra.mxu1 %v12138_v4  ;;  %9763 = vmatmul.mubr.msk.f32.vlgmr.msra.gmra.mrb[0].mxu0 %vm127_vm0, %v118_v6  ;;  %v217_v12 = vld [vmem:[#allocation11] sm:$0xff]  ;;  %v12153_v15 = vpack.c.bf16 %v214_v14, %v213_v10  ;;  %v219_v19 = vld [vmem:[#allocation11 + $0x10] sm:$0xff]  ;;  %v220_v20 = vld [vmem:[#allocation11 + $0x18] sm:$0xff]  ;;  %v12163_v21 = vpack.c.bf16 %v216_v17, %v215_v16  ;;  %s9148_s15 = sld [smem:[#allocation14 + $0x1]]  ;;  %s2305_s17 = sld [smem:[#allocation14]]  ;;  %vm9030_vm7 = vcmask 17408  }
  0x5e   :  { %10879 = vmatprep.subr.bf16.mxu1 %v11975_v3  ;;  %10882 = vmatprep.subr.bf16.mxu0 %v11975_v3  ;;  %v12158_v18 = vpack.c.bf16 %v218_v13, %v217_v12  ;;  %v12167_v22 = vpack.c.bf16 %v220_v20, %v219_v19  ;;  %v9064_v23 = vld [vmem:[%s13379_s3] ss:$0 sm:$0xff] }
  0x5f   :  { %9784 = vmatprep.mubr.msk.f32.mxu0 %vm11976_vm1, %v11977_v11  ;;  %10884 = vmatpush3.bf16.msra.mxu0 %v12153_v15  ;;  %v12201_v38 = vld [vmem:[%s13383_s7] ss:$0 sm:$0xff] }
  0x60   :  { %10885 = vmatprep.subr.bf16.mxu0 %v11975_v3 }
  0x61   :  { %10881 = vmatpush3.bf16.msra.mxu1 %v12147_v9 }
  0x62   :  { %10888 = vmatprep.subr.bf16.mxu1 %v11975_v3 }
  0x63   :  { %10887 = vmatpush3.bf16.msra.mxu0 %v12163_v21 }
  0x64   :  { %9774 = vmatmul.mubr.f32.vlgmr.msra.gmra.mrb[0].mxu1 %v11977_v11  ;;  %10894 = vmatprep.subr.bf16.mxu0 %v11975_v3 }
  0x65   :  { %10890 = vmatpush3.bf16.msra.mxu1 %v12158_v18  ;;  %9795 = vmatprep.mubr.msk.f32.mxu1 %vm11976_vm1, %v11977_v11 }
  0x66   :  { %10891 = vmatprep.subr.bf16.mxu1 %v11975_v3  ;;  %9785 = vmatmul.mubr.f32.vlgmr.msra.gmra.mrb[2].mxu0 %v11977_v11 }
  0x67   :  { %10896 = vmatpush3.bf16.msra.mxu0 %v12138_v4  ;;  %9806 = vmatprep.mubr.msk.f32.mxu0 %vm11976_vm1, %v11977_v11 }
  0x68   :  { %10897 = vmatprep.subr.bf16.mxu0 %v11975_v3 }
  0x69   :  { %10893 = vmatpush3.bf16.msra.mxu1 %v12167_v22 }
  0x6a   :  { %10900 = vmatprep.subr.bf16.mxu1 %v11975_v3 }
  0x6b   :  { %10899 = vmatpush3.bf16.msra.mxu0 %v12147_v9 }
  0x6c   :  { %9796 = vmatmul.mubr.f32.vlgmr.msra.gmra.mrb[2].mxu1 %v11977_v11  ;;  %10906 = vmatprep.subr.bf16.mxu0 %v11975_v3 }
  0x6d   :  { %10902 = vmatpush3.bf16.msra.mxu1 %v12153_v15  ;;  %9817 = vmatprep.mubr.msk.f32.mxu1 %vm11976_vm1, %v11977_v11 }
  0x6e   :  { %10903 = vmatprep.subr.bf16.mxu1 %v11975_v3 }
  0x71   :  { %10905 = vmatpush3.bf16.msra.mxu1 %v12163_v21 }
  0x72   :  { %10912 = vmatprep.subr.bf16.mxu1 %v11975_v3 }
 0x130   :  { %v9764_v24 = vpop.f32.mrb[0].mxu0 }
 0x131   :  { %v12193_v25 = vadd.f32 %v9764_v24, %v9064_v23  ;;  %v200_v26 = vpop.f32.mrb[1].mxu0 }
 0x132   :  { %v12195_v27 = vadd.f32 %v9064_v23, %v200_v26 }
 0x137   :  { %v292_v28 = vpop.f32.mrb[0].mxu1 }
 0x138   :  { %v442_v29 = vadd.f32 %v292_v28, %v12195_v27  ;;  %v9775_v30 = vpop.f32.mrb[1].mxu1 }
 0x139   :  { %v362_v32 = vpop.f32.mrb[2].mxu0 }
 0x13a   :  { %v9068_v31 = vmul.f32 -1.442695, %v442_v29  ;;  %v9786_v33 = vpop.f32.mrb[3].mxu0 }
 0x13c   :  { %11502 = vpow2.f32 %v9068_v31 }
 0x13f   :  { %v438_v34 = vpop.f32.mrb[2].mxu1 }
 0x140   :  { %v9797_v35 = vpop.f32.mrb[3].mxu1  ;;  %v439_v39 = vadd.f32 %v12201_v38, %v438_v34 }
 0x146   :  { %v11503_v36 = vpop.eup %11502 }
 0x147   :  { %v446_v37 = vadd.f32 1.0, %v11503_v36 }
 0x149   :  { %11504 = vrcp.f32 %v446_v37 }
 0x153   :  { %v11505_v40 = vpop.eup %11504 }
 0x154   :  { %v460_v41 = vmul.f32 %v11505_v40, %v439_v39 }
 0x156   :  { %462 = vrot.lane.b32.xlu0 %v460_v41, %s11978_s23 }
 0x15a   :  { %450 = vrot.lane.b32.xlu0 %v362_v32, %s11979_s27 }
 0x1c8   :  { %v463_v42 = vpop.permute.xlu0 %462 }
 0x1c9   :  { %v465_v43 = vadd.f32 %v463_v42, %v12195_v27 }
 0x1cb   :  { %11506 = vtanh.f32 %v465_v43 }
 0x1cc   :  { %v451_v45 = vpop.permute.xlu0 %450 }
 0x1cd   :  { %v453_v46 = vadd.f32 %v451_v45, %v12195_v27 }
 0x1cf   :  { %v9069_v47 = vmul.f32 -1.442695, %v453_v46 }
 0x1d1   :  { %11508 = vpow2.f32 %v9069_v47 }
 0x1d5   :  { %v11507_v44 = vpop.eup %11506 }
 0x1d6   :  { %469 = vrot.lane.b32.xlu1 %v11507_v44, %s11980_s29 }
 0x1db   :  { %v11509_v48 = vpop.eup %11508 }
 0x1dc   :  { %v457_v49 = vadd.f32 1.0, %v11509_v48 }
 0x1de   :  { %11510 = vrcp.f32 %v457_v49 }
 0x1e8   :  { %v11511_v50 = vpop.eup %11510 }
 0x1e9   :  { %v467_v51 = vsub.f32 1.0, %v11511_v50  ;;  %v473_v54 = vmul.f32 0.0, %v11511_v50 }
 0x248   :  { %v470_v52 = vpop.permute.xlu1 %469 }
 0x249   :  { %v472_v53 = vmul.f32 %v470_v52, %v467_v51 }
 0x24b   :  { %v474_v55 = vadd.f32 %v473_v54, %v472_v53 }
 0x24d   :  { %476 = vrot.lane.b32.xlu1 %v474_v55, %s11980_s29  ;;  %v731_v28 = vrot.slane %v474_v55, 6 }
 0x2bf   :  { %v477_v56 = vpop.permute.xlu1 %476 }
 0x2c0   :  { %480 = vst.msk [vmem:[#allocation2] sm:$0x3] %vm479_vm2, %v477_v56  ;;  %9807 = vmatmul.mubr.msk.f32.vlgmr.msra.gmra.mrb[4].mxu0 %vm222_vm3, %v477_v56  ;;  %9818 = vmatmul.mubr.msk.f32.vlgmr.msra.gmra.mrb[4].mxu1 %vm222_vm3, %v477_v56 }
 0x2c1   :  { %10908 = vmatpush3.bf16.msra.mxu0 %v12158_v18  ;;  %9828 = vmatprep.mubr.msk.f32.mxu0 %vm11976_vm1, %v11977_v11 }
 0x2c2   :  { %10909 = vmatprep.subr.bf16.mxu0 %v11975_v3  ;;  %10914 = vmatpush3.bf16.msra.mxu1 %v12138_v4 }
 0x2c3   :  { %10915 = vmatprep.subr.bf16.mxu1 %v11975_v3  ;;  %9839 = vmatprep.mubr.msk.f32.mxu1 %vm11976_vm1, %v11977_v11 }
 0x2c5   :  { %10911 = vmatpush3.bf16.msra.mxu0 %v12167_v22 }
 0x2c6   :  { %10918 = vmatprep.subr.bf16.mxu0 %v11975_v3  ;;  %10917 = vmatpush3.bf16.msra.mxu1 %v12147_v9 }
 0x2c7   :  { %10924 = vmatprep.subr.bf16.mxu1 %v11975_v3 }
 0x2c8   :  { %9829 = vmatmul.mubr.msk.f32.vlgmr.msra.gmra.mrb[6].mxu0 %vm222_vm3, %v477_v56 }
 0x2c9   :  { %10920 = vmatpush3.bf16.msra.mxu0 %v12153_v15  ;;  %9850 = vmatprep.mubr.msk.f32.mxu0 %vm11976_vm1, %v11977_v11 }
 0x2ca   :  { %10921 = vmatprep.subr.bf16.mxu0 %v11975_v3 }
 0x2cd   :  { %10923 = vmatpush3.bf16.msra.mxu0 %v12163_v21 }
 0x2ce   :  { %10930 = vmatprep.subr.bf16.mxu0 %v11975_v3 }
 0x393   :  { %v549_v57 = vpop.f32.mrb[4].mxu0  ;;  %v619_v58 = vpop.f32.mrb[4].mxu1 }
 0x394   :  { %v694_v59 = vrot.slane %v549_v57, 6  ;;  %v704_v60 = vrot.slane %v619_v58, 6  ;;  %v9808_v61 = vpop.f32.mrb[5].mxu0  ;;  %v9819_v62 = vpop.f32.mrb[5].mxu1 }
 0x396   :  { %v696_v63 = vadd.f32 %v694_v59, %v12195_v27  ;;  %705 = vrot.lane.b32.xlu1 %v704_v60, %s11979_s27 }
 0x398   :  { %v9073_v0 = vmul.f32 -1.442695, %v696_v63 }
 0x39a   :  { %11512 = vpow2.f32 %v9073_v0 }
 0x39b   :  { %v689_v1 = vpop.f32.mrb[6].mxu0 }
 0x39c   :  { %v9830_v2 = vpop.f32.mrb[7].mxu0  ;;  %v690_v7 = vadd.f32 %v12201_v38, %v689_v1 }
 0x39e   :  { %v716_v8 = vrot.slane %v690_v7, 6 }
 0x3a4   :  { %v11513_v5 = vpop.eup %11512 }
 0x3a5   :  { %v700_v6 = vadd.f32 1.0, %v11513_v5 }
 0x3a7   :  { %11514 = vrcp.f32 %v700_v6 }
 0x3b1   :  { %v11515_v10 = vpop.eup %11514 }
 0x3b2   :  { %v718_v12 = vmul.f32 %v11515_v10, %v716_v8 }
 0x3b4   :  { %720 = vrot.lane.b32.xlu0 %v718_v12, %s11978_s23 }
 0x408   :  { %v706_v17 = vpop.permute.xlu1 %705 }
 0x409   :  { %v708_v19 = vadd.f32 %v706_v17, %v12195_v27 }
 0x40b   :  { %v9074_v20 = vmul.f32 -1.442695, %v708_v19 }
 0x426   :  { %v721_v13 = vpop.permute.xlu0 %720 }
 0x427   :  { %v723_v14 = vadd.f32 %v721_v13, %v12195_v27 }
 0x429   :  { %11516 = vtanh.f32 %v723_v14 }
 0x42a   :  { %11518 = vpow2.f32 %v9074_v20 }
 0x433   :  { %v11517_v16 = vpop.eup %11516 }
 0x434   :  { %727 = vrot.lane.b32.xlu0 %v11517_v16, %s11980_s29  ;;  %v11519_v23 = vpop.eup %11518 }
 0x435   :  { %v712_v24 = vadd.f32 1.0, %v11519_v23 }
 0x437   :  { %11520 = vrcp.f32 %v712_v24 }
 0x441   :  { %v11521_v26 = vpop.eup %11520 }
 0x442   :  { %v725_v29 = vsub.f32 1.0, %v11521_v26  ;;  %v733_v32 = vmul.f32 %v11521_v26, %v731_v28 }
 0x4a6   :  { %v728_v30 = vpop.permute.xlu0 %727 }
 0x4a7   :  { %v730_v31 = vmul.f32 %v728_v30, %v725_v29 }
 0x4a9   :  { %v12239_v33 = vadd.f32 %v733_v32, %v730_v31 }
 0x4ab   :  { %v741_v34 = vrot.slane %v12239_v33, 2  ;;  %v994_v63 = vrot.slane %v12239_v33, 6 }
 0x4ad   :  { %742 = vrot.lane.b32.xlu1 %v741_v34, %s11980_s29 }
 0x51f   :  { %v743_v35 = vpop.permute.xlu1 %742 }
 0x520   :  { %9840 = vmatmul.mubr.msk.f32.vlgmr.msra.gmra.mrb[6].mxu1 %vm222_vm3, %v743_v35  ;;  %9851 = vmatmul.mubr.msk.f32.vlgmr.msra.gmra.mrb[8].mxu0 %vm222_vm3, %v743_v35 }
 0x521   :  { %10926 = vmatpush3.bf16.msra.mxu1 %v12158_v18  ;;  %9861 = vmatprep.mubr.msk.f32.mxu1 %vm11976_vm1, %v11977_v11 }
 0x522   :  { %10927 = vmatprep.subr.bf16.mxu1 %v11975_v3  ;;  %10932 = vmatpush3.bf16.msra.mxu0 %v12138_v4 }
 0x523   :  { %10933 = vmatprep.subr.bf16.mxu0 %v11975_v3  ;;  %9872 = vmatprep.mubr.msk.f32.mxu0 %vm11976_vm1, %v11977_v11 }
 0x525   :  { %10929 = vmatpush3.bf16.msra.mxu1 %v12167_v22 }
 0x526   :  { %10936 = vmatprep.subr.bf16.mxu1 %v11975_v3  ;;  %10935 = vmatpush3.bf16.msra.mxu0 %v12147_v9 }
 0x527   :  { %10942 = vmatprep.subr.bf16.mxu0 %v11975_v3 }
 0x528   :  { %9862 = vmatmul.mubr.msk.f32.vlgmr.msra.gmra.mrb[8].mxu1 %vm222_vm3, %v743_v35 }
 0x529   :  { %10938 = vmatpush3.bf16.msra.mxu1 %v12153_v15  ;;  %9883 = vmatprep.mubr.msk.f32.mxu1 %vm11976_vm1, %v11977_v11 }
 0x52a   :  { %10939 = vmatprep.subr.bf16.mxu1 %v11975_v3 }
 0x52d   :  { %10941 = vmatpush3.bf16.msra.mxu1 %v12163_v21 }
 0x52e   :  { %10948 = vmatprep.subr.bf16.mxu1 %v11975_v3 }
 0x5f3   :  { %v812_v36 = vpop.f32.mrb[6].mxu1  ;;  %v882_v37 = vpop.f32.mrb[8].mxu0 }
 0x5f4   :  { %v957_v39 = vrot.slane %v812_v36, 4  ;;  %v967_v40 = vrot.slane %v882_v37, 4  ;;  %v9841_v41 = vpop.f32.mrb[7].mxu1  ;;  %v9852_v42 = vpop.f32.mrb[9].mxu0 }
 0x5f6   :  { %v959_v43 = vadd.f32 %v957_v39, %v12195_v27  ;;  %968 = vrot.lane.b32.xlu1 %v967_v40, %s11979_s27 }
 0x5f8   :  { %v9078_v44 = vmul.f32 -1.442695, %v959_v43 }
 0x5fa   :  { %11522 = vpow2.f32 %v9078_v44 }
 0x5fb   :  { %v952_v45 = vpop.f32.mrb[8].mxu1 }
 0x5fc   :  { %v9863_v46 = vpop.f32.mrb[9].mxu1  ;;  %v953_v49 = vadd.f32 %v12201_v38, %v952_v45 }
 0x5fe   :  { %v979_v50 = vrot.slane %v953_v49, 4 }
 0x604   :  { %v11523_v47 = vpop.eup %11522 }
 0x605   :  { %v963_v48 = vadd.f32 1.0, %v11523_v47 }
 0x607   :  { %11524 = vrcp.f32 %v963_v48 }
 0x611   :  { %v11525_v51 = vpop.eup %11524 }
 0x612   :  { %v981_v52 = vmul.f32 %v11525_v51, %v979_v50 }
 0x614   :  { %983 = vrot.lane.b32.xlu0 %v981_v52, %s11978_s23 }
 0x668   :  { %v969_v56 = vpop.permute.xlu1 %968 }
 0x669   :  { %v971_v57 = vadd.f32 %v969_v56, %v12195_v27 }
 0x66b   :  { %v9079_v58 = vmul.f32 -1.442695, %v971_v57 }
 0x686   :  { %v984_v53 = vpop.permute.xlu0 %983 }
 0x687   :  { %v986_v54 = vadd.f32 %v984_v53, %v12195_v27 }
 0x689   :  { %11526 = vtanh.f32 %v986_v54 }
 0x68a   :  { %11528 = vpow2.f32 %v9079_v58 }
 0x693   :  { %v11527_v55 = vpop.eup %11526 }
 0x694   :  { %990 = vrot.lane.b32.xlu0 %v11527_v55, %s11980_s29  ;;  %v11529_v59 = vpop.eup %11528 }
 0x695   :  { %v975_v60 = vadd.f32 1.0, %v11529_v59 }
 0x697   :  { %11530 = vrcp.f32 %v975_v60 }
 0x6a1   :  { %v11531_v61 = vpop.eup %11530 }
 0x6a2   :  { %v988_v62 = vsub.f32 1.0, %v11531_v61  ;;  %v996_v1 = vmul.f32 %v11531_v61, %v994_v63 }
 0x706   :  { %v991_v0 = vpop.permute.xlu0 %990 }
 0x707   :  { %v993_v2 = vmul.f32 %v991_v0, %v988_v62 }
 0x709   :  { %v12272_v5 = vadd.f32 %v996_v1, %v993_v2 }
 0x70b   :  { %v1004_v6 = vrot.slane %v12272_v5, 4  ;;  %v1257_v43 = vrot.slane %v12272_v5, 6 }
 0x70d   :  { %1005 = vrot.lane.b32.xlu1 %v1004_v6, %s11980_s29 }
 0x77f   :  { %v1006_v7 = vpop.permute.xlu1 %1005 }
 0x780   :  { %9873 = vmatmul.mubr.msk.f32.vlgmr.msra.gmra.mrb[10].mxu0 %vm222_vm3, %v1006_v7  ;;  %9884 = vmatmul.mubr.msk.f32.vlgmr.msra.gmra.mrb[10].mxu1 %vm222_vm3, %v1006_v7 }
 0x781   :  { %10944 = vmatpush3.bf16.msra.mxu0 %v12158_v18  ;;  %9894 = vmatprep.mubr.msk.f32.mxu0 %vm11976_vm1, %v11977_v11 }
 0x782   :  { %10945 = vmatprep.subr.bf16.mxu0 %v11975_v3  ;;  %10950 = vmatpush3.bf16.msra.mxu1 %v12138_v4 }
 0x783   :  { %10951 = vmatprep.subr.bf16.mxu1 %v11975_v3  ;;  %9905 = vmatprep.mubr.msk.f32.mxu1 %vm11976_vm1, %v11977_v11 }
 0x785   :  { %10947 = vmatpush3.bf16.msra.mxu0 %v12167_v22 }
 0x786   :  { %10954 = vmatprep.subr.bf16.mxu0 %v11975_v3  ;;  %10953 = vmatpush3.bf16.msra.mxu1 %v12147_v9 }
 0x787   :  { %10960 = vmatprep.subr.bf16.mxu1 %v11975_v3 }
 0x788   :  { %9895 = vmatmul.mubr.msk.f32.vlgmr.msra.gmra.mrb[12].mxu0 %vm222_vm3, %v1006_v7 }
 0x789   :  { %10956 = vmatpush3.bf16.msra.mxu0 %v12153_v15  ;;  %9916 = vmatprep.mubr.msk.f32.mxu0 %vm11976_vm1, %v11977_v11 }
 0x78a   :  { %10957 = vmatprep.subr.bf16.mxu0 %v11975_v3 }
 0x78d   :  { %10959 = vmatpush3.bf16.msra.mxu0 %v12163_v21 }
 0x78e   :  { %10966 = vmatprep.subr.bf16.mxu0 %v11975_v3 }
 0x853   :  { %v1075_v8 = vpop.f32.mrb[10].mxu0  ;;  %v1145_v10 = vpop.f32.mrb[10].mxu1 }
 0x854   :  { %v1220_v12 = vrot.slane %v1075_v8, 2  ;;  %v1230_v13 = vrot.slane %v1145_v10, 2  ;;  %v9874_v14 = vpop.f32.mrb[11].mxu0  ;;  %v9885_v16 = vpop.f32.mrb[11].mxu1 }
 0x856   :  { %v1222_v17 = vadd.f32 %v1220_v12, %v12195_v27  ;;  %1231 = vrot.lane.b32.xlu1 %v1230_v13, %s11979_s27 }
 0x858   :  { %v9083_v19 = vmul.f32 -1.442695, %v1222_v17 }
 0x85a   :  { %11532 = vpow2.f32 %v9083_v19 }
 0x85b   :  { %v1215_v20 = vpop.f32.mrb[12].mxu0 }
 0x85c   :  { %v9896_v23 = vpop.f32.mrb[13].mxu0  ;;  %v1216_v28 = vadd.f32 %v12201_v38, %v1215_v20 }
 0x85e   :  { %v1242_v29 = vrot.slane %v1216_v28, 2 }
 0x864   :  { %v11533_v24 = vpop.eup %11532 }
 0x865   :  { %v1226_v26 = vadd.f32 1.0, %v11533_v24 }
 0x867   :  { %11534 = vrcp.f32 %v1226_v26 }
 0x871   :  { %v11535_v30 = vpop.eup %11534 }
 0x872   :  { %v1244_v31 = vmul.f32 %v11535_v30, %v1242_v29 }
 0x874   :  { %1246 = vrot.lane.b32.xlu0 %v1244_v31, %s11978_s23 }
 0x8c8   :  { %v1232_v36 = vpop.permute.xlu1 %1231 }
 0x8c9   :  { %v1234_v37 = vadd.f32 %v1232_v36, %v12195_v27 }
 0x8cb   :  { %v9084_v39 = vmul.f32 -1.442695, %v1234_v37 }
 0x8e6   :  { %v1247_v32 = vpop.permute.xlu0 %1246 }
 0x8e7   :  { %v1249_v34 = vadd.f32 %v1247_v32, %v12195_v27 }
 0x8e9   :  { %11536 = vtanh.f32 %v1249_v34 }
 0x8ea   :  { %11538 = vpow2.f32 %v9084_v39 }
 0x8f3   :  { %v11537_v35 = vpop.eup %11536 }
 0x8f4   :  { %1253 = vrot.lane.b32.xlu0 %v11537_v35, %s11980_s29  ;;  %v11539_v40 = vpop.eup %11538 }
 0x8f5   :  { %v1238_v41 = vadd.f32 1.0, %v11539_v40 }
 0x8f7   :  { %11540 = vrcp.f32 %v1238_v41 }
 0x901   :  { %v11541_v42 = vpop.eup %11540 }
 0x902   :  { %v1251_v44 = vsub.f32 1.0, %v11541_v42  ;;  %v1259_v47 = vmul.f32 %v11541_v42, %v1257_v43 }
 0x966   :  { %v1254_v45 = vpop.permute.xlu0 %1253 }
 0x967   :  { %v1256_v46 = vmul.f32 %v1254_v45, %v1251_v44 }
 0x969   :  { %v12305_v48 = vadd.f32 %v1259_v47, %v1256_v46 }
 0x96b   :  { %v1267_v49 = vrot.slane %v12305_v48, 6 }
 0x96d   :  { %1268 = vrot.lane.b32.xlu1 %v1267_v49, %s11980_s29 }
 0x9df   :  { %v1269_v50 = vpop.permute.xlu1 %1268 }
 0x9e0   :  { %9906 = vmatmul.mubr.msk.f32.vlgmr.msra.gmra.mrb[12].mxu1 %vm222_vm3, %v1269_v50  ;;  %9917 = vmatmul.mubr.msk.f32.vlgmr.msra.gmra.mrb[14].mxu0 %vm222_vm3, %v1269_v50 }
 0x9e1   :  { %10962 = vmatpush3.bf16.msra.mxu1 %v12158_v18  ;;  %9927 = vmatprep.mubr.msk.f32.mxu1 %vm11976_vm1, %v11977_v11 }
 0x9e2   :  { %10963 = vmatprep.subr.bf16.mxu1 %v11975_v3  ;;  %10968 = vmatpush3.bf16.msra.mxu0 %v12138_v4 }
 0x9e3   :  { %10969 = vmatprep.subr.bf16.mxu0 %v11975_v3  ;;  %9938 = vmatprep.mubr.msk.f32.mxu0 %vm11976_vm1, %v11977_v11 }
 0x9e5   :  { %10965 = vmatpush3.bf16.msra.mxu1 %v12167_v22 }
 0x9e6   :  { %10972 = vmatprep.subr.bf16.mxu1 %v11975_v3  ;;  %10971 = vmatpush3.bf16.msra.mxu0 %v12147_v9 }
 0x9e7   :  { %10978 = vmatprep.subr.bf16.mxu0 %v11975_v3 }
 0x9e8   :  { %9928 = vmatmul.mubr.msk.f32.vlgmr.msra.gmra.mrb[14].mxu1 %vm222_vm3, %v1269_v50 }
 0x9e9   :  { %10974 = vmatpush3.bf16.msra.mxu1 %v12153_v15  ;;  %9949 = vmatprep.mubr.msk.f32.mxu1 %vm11976_vm1, %v11977_v11 }
 0x9ea   :  { %10975 = vmatprep.subr.bf16.mxu1 %v11975_v3 }
 0x9ed   :  { %10977 = vmatpush3.bf16.msra.mxu1 %v12163_v21 }
 0x9ee   :  { %10984 = vmatprep.subr.bf16.mxu1 %v11975_v3 }
 0xab3   :  { %v1338_v27 = vpop.f32.mrb[12].mxu1  ;;  %v1408_v51 = vpop.f32.mrb[14].mxu0 }
 0xab4   :  { %v1482_v52 = vadd.f32 %v1338_v27, %v12193_v25  ;;  %1490 = vrot.lane.b32.xlu1 %v1408_v51, %s11979_s27  ;;  %v9907_v53 = vpop.f32.mrb[13].mxu1  ;;  %v9918_v54 = vpop.f32.mrb[15].mxu0 }
 0xab6   :  { %v9088_v55 = vmul.f32 -1.442695, %v1482_v52 }
 0xab8   :  { %11542 = vpow2.f32 %v9088_v55 }
 0xabb   :  { %v1478_v56 = vpop.f32.mrb[14].mxu1 }
 0xabc   :  { %v9929_v57 = vpop.f32.mrb[15].mxu1  ;;  %v1479_v60 = vadd.f32 %v12201_v38, %v1478_v56 }
 0xac2   :  { %v11543_v58 = vpop.eup %11542 }
 0xac3   :  { %v1486_v59 = vadd.f32 1.0, %v11543_v58 }
 0xac5   :  { %11544 = vrcp.f32 %v1486_v59 }
 0xacf   :  { %v11545_v61 = vpop.eup %11544 }
 0xad0   :  { %v1500_v62 = vmul.f32 %v11545_v61, %v1479_v60 }
 0xad2   :  { %1502 = vrot.lane.b32.xlu0 %v1500_v62, %s11978_s23 }
 0xb26   :  { %v1491_v2 = vpop.permute.xlu1 %1490 }
 0xb27   :  { %v1493_v6 = vadd.f32 %v1491_v2, %v12193_v25 }
 0xb29   :  { %v9089_v7 = vmul.f32 -1.442695, %v1493_v6 }
 0xb44   :  { %v1503_v63 = vpop.permute.xlu0 %1502 }
 0xb45   :  { %v1505_v0 = vadd.f32 %v1503_v63, %v12193_v25 }
 0xb47   :  { %11546 = vtanh.f32 %v1505_v0 }
 0xb48   :  { %11548 = vpow2.f32 %v9089_v7 }
 0xb51   :  { %v11547_v1 = vpop.eup %11546 }
 0xb52   :  { %1509 = vrot.lane.b32.xlu0 %v11547_v1, %s11980_s29  ;;  %v11549_v8 = vpop.eup %11548 }
 0xb53   :  { %v1497_v10 = vadd.f32 1.0, %v11549_v8 }
 0xb55   :  { %11550 = vrcp.f32 %v1497_v10 }
 0xb5f   :  { %v11551_v12 = vpop.eup %11550 }
 0xb60   :  { %v1507_v13 = vsub.f32 1.0, %v11551_v12  ;;  %v1514_v16 = vmul.f32 %v11551_v12, %v1267_v49 }
 0xbc4   :  { %v1510_v14 = vpop.permute.xlu0 %1509 }
 0xbc5   :  { %v1512_v17 = vmul.f32 %v1510_v14, %v1507_v13 }
 0xbc7   :  { %v1515_v19 = vadd.f32 %v1514_v16, %v1512_v17 }
 0xbc9   :  { %1517 = vrot.lane.b32.xlu1 %v1515_v19, %s11980_s29  ;;  %v1771_v52 = vrot.slane %v1515_v19, 6 }
 0xc3b   :  { %v1518_v20 = vpop.permute.xlu1 %1517 }
 0xc3c   :  { %1520 = vst.msk [vmem:[#allocation2 + $0x8] sm:$0x3] %vm479_vm2, %v1518_v20  ;;  %9939 = vmatmul.mubr.msk.f32.vlgmr.msra.gmra.mrb[16].mxu0 %vm222_vm3, %v1518_v20  ;;  %9950 = vmatmul.mubr.msk.f32.vlgmr.msra.gmra.mrb[16].mxu1 %vm222_vm3, %v1518_v20 }
 0xc3d   :  { %10980 = vmatpush3.bf16.msra.mxu0 %v12158_v18  ;;  %9960 = vmatprep.mubr.msk.f32.mxu0 %vm11976_vm1, %v11977_v11 }
 0xc3e   :  { %10981 = vmatprep.subr.bf16.mxu0 %v11975_v3  ;;  %10986 = vmatpush3.bf16.msra.mxu1 %v12138_v4 }
 0xc3f   :  { %10987 = vmatprep.subr.bf16.mxu1 %v11975_v3  ;;  %9971 = vmatprep.mubr.msk.f32.mxu1 %vm11976_vm1, %v11977_v11 }
 0xc41   :  { %10983 = vmatpush3.bf16.msra.mxu0 %v12167_v22 }
 0xc42   :  { %10990 = vmatprep.subr.bf16.mxu0 %v11975_v3  ;;  %10989 = vmatpush3.bf16.msra.mxu1 %v12147_v9 }
 0xc43   :  { %10996 = vmatprep.subr.bf16.mxu1 %v11975_v3 }
 0xc44   :  { %9961 = vmatmul.mubr.msk.f32.vlgmr.msra.gmra.mrb[18].mxu0 %vm222_vm3, %v1518_v20 }
 0xc45   :  { %10992 = vmatpush3.bf16.msra.mxu0 %v12153_v15  ;;  %9982 = vmatprep.mubr.msk.f32.mxu0 %vm11976_vm1, %v11977_v11 }
 0xc46   :  { %10993 = vmatprep.subr.bf16.mxu0 %v11975_v3 }
 0xc49   :  { %10995 = vmatpush3.bf16.msra.mxu0 %v12163_v21 }
 0xc4a   :  { %11002 = vmatprep.subr.bf16.mxu0 %v11975_v3 }
 0xd0f   :  { %v1589_v23 = vpop.f32.mrb[16].mxu0  ;;  %v1659_v24 = vpop.f32.mrb[16].mxu1 }
 0xd10   :  { %v1734_v26 = vrot.slane %v1589_v23, 6  ;;  %v1744_v28 = vrot.slane %v1659_v24, 6  ;;  %v9940_v29 = vpop.f32.mrb[17].mxu0  ;;  %v9951_v30 = vpop.f32.mrb[17].mxu1 }
 0xd12   :  { %v1736_v31 = vadd.f32 %v1734_v26, %v12193_v25  ;;  %1745 = vrot.lane.b32.xlu1 %v1744_v28, %s11979_s27 }
 0xd14   :  { %v9093_v32 = vmul.f32 -1.442695, %v1736_v31 }
 0xd16   :  { %11552 = vpow2.f32 %v9093_v32 }
 0xd17   :  { %v1729_v34 = vpop.f32.mrb[18].mxu0 }
 0xd18   :  { %v9962_v35 = vpop.f32.mrb[19].mxu0  ;;  %v1730_v39 = vadd.f32 %v12201_v38, %v1729_v34 }
 0xd1a   :  { %v1756_v40 = vrot.slane %v1730_v39, 6 }
 0xd20   :  { %v11553_v36 = vpop.eup %11552 }
 0xd21   :  { %v1740_v37 = vadd.f32 1.0, %v11553_v36 }
 0xd23   :  { %11554 = vrcp.f32 %v1740_v37 }
 0xd2d   :  { %v11555_v41 = vpop.eup %11554 }
 0xd2e   :  { %v1758_v42 = vmul.f32 %v11555_v41, %v1756_v40 }
 0xd30   :  { %1760 = vrot.lane.b32.xlu0 %v1758_v42, %s11978_s23 }
 0xd84   :  { %v1746_v46 = vpop.permute.xlu1 %1745 }
 0xd85   :  { %v1748_v47 = vadd.f32 %v1746_v46, %v12193_v25 }
 0xd87   :  { %v9094_v49 = vmul.f32 -1.442695, %v1748_v47 }
 0xda2   :  { %v1761_v43 = vpop.permute.xlu0 %1760 }
 0xda3   :  { %v1763_v44 = vadd.f32 %v1761_v43, %v12193_v25 }
 0xda5   :  { %11556 = vtanh.f32 %v1763_v44 }
 0xda6   :  { %11558 = vpow2.f32 %v9094_v49 }
 0xdaf   :  { %v11557_v45 = vpop.eup %11556 }
 0xdb0   :  { %1767 = vrot.lane.b32.xlu0 %v11557_v45, %s11980_s29  ;;  %v11559_v50 = vpop.eup %11558 }
 0xdb1   :  { %v1752_v27 = vadd.f32 1.0, %v11559_v50 }
 0xdb3   :  { %11560 = vrcp.f32 %v1752_v27 }
 0xdbd   :  { %v11561_v51 = vpop.eup %11560 }
 0xdbe   :  { %v1765_v53 = vsub.f32 1.0, %v11561_v51  ;;  %v1773_v56 = vmul.f32 %v11561_v51, %v1771_v52 }
 0xe22   :  { %v1768_v54 = vpop.permute.xlu0 %1767 }
 0xe23   :  { %v1770_v55 = vmul.f32 %v1768_v54, %v1765_v53 }
 0xe25   :  { %v12367_v57 = vadd.f32 %v1773_v56, %v1770_v55  ;;  %v2311_v56 = vld [vmem:[%s13378_s2] sm:$0xff] }
 0xe27   :  { %v1780_v58 = vrot.slane %v12367_v57, 2  ;;  %v2033_v29 = vrot.slane %v12367_v57, 6 }
 0xe29   :  { %1781 = vrot.lane.b32.xlu1 %v1780_v58, %s11980_s29  ;;  %v2312_v58 = vld [vmem:[%s13378_s2 + $0x8] sm:$0xff] }
 0xe9b   :  { %v1782_v59 = vpop.permute.xlu1 %1781 }
 0xe9c   :  { %9972 = vmatmul.mubr.msk.f32.vlgmr.msra.gmra.mrb[18].mxu1 %vm222_vm3, %v1782_v59  ;;  %9983 = vmatmul.mubr.msk.f32.vlgmr.msra.gmra.mrb[20].mxu0 %vm222_vm3, %v1782_v59 }
 0xe9d   :  { %10998 = vmatpush3.bf16.msra.mxu1 %v12158_v18  ;;  %9993 = vmatprep.mubr.msk.f32.mxu1 %vm11976_vm1, %v11977_v11 }
 0xe9e   :  { %10999 = vmatprep.subr.bf16.mxu1 %v11975_v3  ;;  %11004 = vmatpush3.bf16.msra.mxu0 %v12138_v4 }
 0xe9f   :  { %11005 = vmatprep.subr.bf16.mxu0 %v11975_v3  ;;  %10004 = vmatprep.mubr.msk.f32.mxu0 %vm11976_vm1, %v11977_v11 }
 0xea1   :  { %11001 = vmatpush3.bf16.msra.mxu1 %v12167_v22 }
 0xea2   :  { %11008 = vmatprep.subr.bf16.mxu1 %v11975_v3  ;;  %11007 = vmatpush3.bf16.msra.mxu0 %v12147_v9 }
 0xea3   :  { %11014 = vmatprep.subr.bf16.mxu0 %v11975_v3 }
 0xea4   :  { %9994 = vmatmul.mubr.msk.f32.vlgmr.msra.gmra.mrb[20].mxu1 %vm222_vm3, %v1782_v59  ;;  %v11020_v59 = vpack.c.bf16 %v2312_v58, %v2311_v56 }
 0xea5   :  { %11010 = vmatpush3.bf16.msra.mxu1 %v12153_v15  ;;  %10015 = vmatprep.mubr.msk.f32.mxu1 %vm11976_vm1, %v11977_v11 }
 0xea6   :  { %11011 = vmatprep.subr.bf16.mxu1 %v11975_v3 }
 0xea9   :  { %11013 = vmatpush3.bf16.msra.mxu1 %v12163_v21 }
 0xeaa   :  { %11021 = vmatprep.subr.bf16.mxu1 %v11020_v59 }
 0xf6f   :  { %v1851_v4 = vpop.f32.mrb[18].mxu1  ;;  %v1921_v60 = vpop.f32.mrb[20].mxu0 }
 0xf70   :  { %v1996_v61 = vrot.slane %v1851_v4, 4  ;;  %v2006_v62 = vrot.slane %v1921_v60, 4  ;;  %v9973_v63 = vpop.f32.mrb[19].mxu1  ;;  %v9984_v0 = vpop.f32.mrb[21].mxu0 }
 0xf71   :  { %v2313_v63 = vld [vmem:[%s13378_s2 + $0x10] sm:$0xff]  ;;  %v2314_v0 = vld [vmem:[%s13378_s2 + $0x18] sm:$0xff] }
 0xf72   :  { %v1998_v9 = vadd.f32 %v1996_v61, %v12193_v25  ;;  %2007 = vrot.lane.b32.xlu1 %v2006_v62, %s11979_s27 }
 0xf74   :  { %v9098_v1 = vmul.f32 -1.442695, %v1998_v9  ;;  %v2405_v9 = vld [vmem:[#allocation5 + $0x20] sm:$0xff] }
 0xf76   :  { %11562 = vpow2.f32 %v9098_v1  ;;  %v2406_v1 = vld [vmem:[#allocation5 + $0x28] sm:$0xff] }
 0xf77   :  { %v1991_v15 = vpop.f32.mrb[20].mxu1 }
 0xf78   :  { %v9995_v2 = vpop.f32.mrb[21].mxu1  ;;  %v1992_v8 = vadd.f32 %v12201_v38, %v1991_v15  ;;  %v2407_v15 = vld [vmem:[#allocation5 + $0x30] sm:$0xff] }
 0xf79   :  { %v12446_v2 = vpack.c.bf16 %v2406_v1, %v2405_v9 }
 0xf7a   :  { %v2018_v21 = vrot.slane %v1992_v8, 4 }
 0xf80   :  { %v11563_v6 = vpop.eup %11562 }
 0xf81   :  { %v2002_v7 = vadd.f32 1.0, %v11563_v6 }
 0xf83   :  { %11564 = vrcp.f32 %v2002_v7 }
 0xf8d   :  { %v11565_v10 = vpop.eup %11564 }
 0xf8e   :  { %v2020_v12 = vmul.f32 %v11565_v10, %v2018_v21 }
 0xf90   :  { %2022 = vrot.lane.b32.xlu0 %v2020_v12, %s11978_s23 }
 0xfe4   :  { %v2008_v17 = vpop.permute.xlu1 %2007 }
 0xfe5   :  { %v2010_v19 = vadd.f32 %v2008_v17, %v12193_v25  ;;  %v2415_v17 = vld [vmem:[#allocation11 + $0x20] sm:$0xff] }
 0xfe7   :  { %v9099_v20 = vmul.f32 -1.442695, %v2010_v19  ;;  %v2416_v19 = vld [vmem:[#allocation11 + $0x28] sm:$0xff] }
0x1002   :  { %v2023_v13 = vpop.permute.xlu0 %2022 }
0x1003   :  { %v2025_v14 = vadd.f32 %v2023_v13, %v12193_v25 }
0x1005   :  { %11566 = vtanh.f32 %v2025_v14 }
0x1006   :  { %11568 = vpow2.f32 %v9099_v20  ;;  %v2417_v20 = vld [vmem:[#allocation11 + $0x30] sm:$0xff] }
0x100f   :  { %v11567_v16 = vpop.eup %11566 }
0x1010   :  { %2029 = vrot.lane.b32.xlu0 %v11567_v16, %s11980_s29  ;;  %v11569_v23 = vpop.eup %11568 }
0x1011   :  { %v2014_v24 = vadd.f32 1.0, %v11569_v23  ;;  %v12465_v23 = vpack.c.bf16 %v2416_v19, %v2415_v17 }
0x1013   :  { %11570 = vrcp.f32 %v2014_v24  ;;  %v2418_v24 = vld [vmem:[#allocation11 + $0x38] sm:$0xff] }
0x101d   :  { %v11571_v26 = vpop.eup %11570 }
0x101e   :  { %v2027_v28 = vsub.f32 1.0, %v11571_v26  ;;  %v2035_v31 = vmul.f32 %v11571_v26, %v2033_v29  ;;  %v12468_v26 = vpack.c.bf16 %v2418_v24, %v2417_v20  ;;  %v2410_v29 = vld [vmem:[#allocation9 + $0x20] sm:$0xff] }
0x1082   :  { %v2030_v30 = vpop.permute.xlu0 %2029 }
0x1083   :  { %v2032_v32 = vmul.f32 %v2030_v30, %v2027_v28  ;;  %v2411_v30 = vld [vmem:[#allocation9 + $0x28] sm:$0xff] }
0x1085   :  { %v12399_v34 = vadd.f32 %v2035_v31, %v2032_v32  ;;  %v12474_v31 = vpack.c.bf16 %v2411_v30, %v2410_v29  ;;  %v2412_v32 = vld [vmem:[#allocation9 + $0x30] sm:$0xff] }
0x1087   :  { %v2042_v35 = vrot.slane %v12399_v34, 4  ;;  %v2295_v7 = vrot.slane %v12399_v34, 6 }
0x1089   :  { %2043 = vrot.lane.b32.xlu1 %v2042_v35, %s11980_s29 }
0x10fb   :  { %v2044_v36 = vpop.permute.xlu1 %2043 }
0x10fc   :  { %10005 = vmatmul.mubr.msk.f32.vlgmr.msra.gmra.mrb[22].mxu0 %vm222_vm3, %v2044_v36  ;;  %10016 = vmatmul.mubr.msk.f32.vlgmr.msra.gmra.mrb[22].mxu1 %vm222_vm3, %v2044_v36 }
0x10fd   :  { %11016 = vmatpush3.bf16.msra.mxu0 %v12158_v18  ;;  %10026 = vmatprep.mubr.msk.f32.mxu0 %vm11976_vm1, %v11977_v11 }
0x10fe   :  { %11017 = vmatprep.subr.bf16.mxu0 %v11975_v3  ;;  %11023 = vmatpush3.bf16.msra.mxu1 %v11020_v59 }
0x1101   :  { %11019 = vmatpush3.bf16.msra.mxu0 %v12167_v22 }
0x1102   :  { %11028 = vmatprep.subr.bf16.mxu0 %v11975_v3 }
0x1104   :  { %10027 = vmatmul.mubr.msk.f32.vlgmr.msra.gmra.mrb[24].mxu0 %vm222_vm3, %v2044_v36 }
0x1105   :  { %10048 = vmatprep.mubr.msk.f32.mxu0 %vm11976_vm1, %v11977_v11  ;;  %11030 = vmatpush3.bf16.msra.mxu0 %v12446_v2 }
0x1106   :  { %11031 = vmatprep.subr.bf16.mxu0 %v11975_v3 }
0x11cf   :  { %v2113_v37 = vpop.f32.mrb[22].mxu0  ;;  %v2183_v39 = vpop.f32.mrb[22].mxu1 }
0x11d0   :  { %v2258_v40 = vrot.slane %v2113_v37, 2  ;;  %v2268_v41 = vrot.slane %v2183_v39, 2  ;;  %v10006_v42 = vpop.f32.mrb[23].mxu0  ;;  %v10017_v18 = vpop.f32.mrb[23].mxu1 }
0x11d1   :  { %v9106_v18 = vld [vmem:[%s13379_s3 + $0x1] ss:$0 sm:$0xff] }
0x11d2   :  { %v2260_v43 = vadd.f32 %v2258_v40, %v12193_v25  ;;  %2269 = vrot.lane.b32.xlu1 %v2268_v41, %s11979_s27 }
0x11d4   :  { %v9103_v44 = vmul.f32 -1.442695, %v2260_v43 }
0x11d6   :  { %11572 = vpow2.f32 %v9103_v44  ;;  %736 = vrot.lane.b32.xlu1 %v12239_v33, %s11980_s29 }
0x11d7   :  { %v2253_v22 = vpop.f32.mrb[24].mxu0 }
0x11d8   :  { %v10028_v45 = vpop.f32.mrb[25].mxu0  ;;  %v2254_v49 = vadd.f32 %v12201_v38, %v2253_v22 }
0x11da   :  { %1262 = vrot.lane.b32.xlu1 %v12305_v48, %s11980_s29  ;;  %v2280_v50 = vrot.slane %v2254_v49, 2 }
0x11de   :  { %2038 = vrot.lane.b32.xlu1 %v12399_v34, %s11980_s29  ;;  %v2413_v34 = vld [vmem:[#allocation9 + $0x38] sm:$0xff] }
0x11df   :  { %v12481_v35 = vpack.c.bf16 %v2413_v34, %v2412_v32 }
0x11e0   :  { %v11573_v46 = vpop.eup %11572 }
0x11e1   :  { %v2264_v47 = vadd.f32 1.0, %v11573_v46 }
0x11e3   :  { %11574 = vrcp.f32 %v2264_v47 }
0x11ed   :  { %v11575_v27 = vpop.eup %11574 }
0x11ee   :  { %v2282_v51 = vmul.f32 %v11575_v27, %v2280_v50 }
0x11f0   :  { %2284 = vrot.lane.b32.xlu0 %v2282_v51, %s11978_s23 }
0x1244   :  { %v2270_v52 = vpop.permute.xlu1 %2269 }
0x1245   :  { %v2272_v4 = vadd.f32 %v2270_v52, %v12193_v25  ;;  %v12512_v52 = vld [vmem:[%s13383_s7 + $0x1] ss:$0 sm:$0xff] }
0x1247   :  { %v9104_v60 = vmul.f32 -1.442695, %v2272_v4 }
0x1248   :  { %v737_v33 = vpop.permute.xlu1 %736 }
0x1249   :  { %740 = vst.msk [vmem:[#allocation2] sm:$0xc] %vm739_vm4, %v737_v33 }
0x124c   :  { %v1263_v48 = vpop.permute.xlu1 %1262 }
0x124d   :  { %1266 = vst.msk [vmem:[#allocation2] sm:$0xc0] %vm1265_vm5, %v1263_v48 }
0x1250   :  { %v2039_v53 = vpop.permute.xlu1 %2038 }
0x1251   :  { %2041 = vst.msk [vmem:[#allocation2 + $0x8] sm:$0x30] %vm1002_vm6, %v2039_v53 }
0x1262   :  { %v2285_v54 = vpop.permute.xlu0 %2284 }
0x1263   :  { %v2287_v38 = vadd.f32 %v2285_v54, %v12193_v25 }
0x1265   :  { %11576 = vtanh.f32 %v2287_v38 }
0x1266   :  { %11578 = vpow2.f32 %v9104_v60 }
0x126f   :  { %v11577_v55 = vpop.eup %11576 }
0x1270   :  { %2291 = vrot.lane.b32.xlu0 %v11577_v55, %s11980_s29  ;;  %v11579_v61 = vpop.eup %11578 }
0x1271   :  { %v2276_v62 = vadd.f32 1.0, %v11579_v61 }
0x1273   :  { %11580 = vrcp.f32 %v2276_v62 }
0x1274   :  { %999 = vrot.lane.b32.xlu0 %v12272_v5, %s11980_s29  ;;  %v11024_v5 = vpack.c.bf16 %v2314_v0, %v2313_v63 }
0x1276   :  { %11025 = vmatprep.subr.bf16.mxu1 %v11024_v5 }
0x1277   :  { %11027 = vmatpush3.bf16.msra.mxu1 %v11024_v5 }
0x1278   :  { %1776 = vrot.lane.b32.xlu0 %v12367_v57, %s11980_s29  ;;  %v2408_v57 = vld [vmem:[#allocation5 + $0x38] sm:$0xff]  ;;  %11034 = vmatprep.subr.bf16.mxu1 %v11975_v3 }
0x1279   :  { %v12449_v6 = vpack.c.bf16 %v2408_v57, %v2407_v15 }
0x127b   :  { %11033 = vmatpush3.bf16.msra.mxu0 %v12449_v6 }
0x127c   :  { %11040 = vmatprep.subr.bf16.mxu0 %v11975_v3 }
0x127d   :  { %v11581_v25 = vpop.eup %11580 }
0x127e   :  { %v2289_v8 = vsub.f32 1.0, %v11581_v25  ;;  %v2297_v12 = vmul.f32 %v11581_v25, %v2295_v7  ;;  %10049 = vmatmul.mubr.f32.vlgmr.msra.gmra.mrb[26].mxu0 %v11977_v11 }
0x127f   :  { %10070 = vmatprep.mubr.msk.f32.mxu0 %vm11976_vm1, %v11977_v11  ;;  %11042 = vmatpush3.bf16.msra.mxu0 %v12465_v23 }
0x1280   :  { %11043 = vmatprep.subr.bf16.mxu0 %v11975_v3 }
0x1283   :  { %11045 = vmatpush3.bf16.msra.mxu0 %v12468_v26 }
0x1284   :  { %11052 = vmatprep.subr.bf16.mxu0 %v11975_v3 }
0x1286   :  { %10071 = vmatmul.mubr.f32.vlgmr.msra.gmra.mrb[28].mxu0 %v11977_v11 }
0x1287   :  { %11054 = vmatpush3.bf16.msra.mxu0 %v12474_v31  ;;  %10092 = vmatprep.mubr.msk.f32.mxu0 %vm11976_vm1, %v11977_v11 }
0x1288   :  { %11055 = vmatprep.subr.bf16.mxu0 %v11975_v3 }
0x128b   :  { %11057 = vmatpush3.bf16.msra.mxu0 %v12481_v35 }
0x128c   :  { %11064 = vmatprep.subr.bf16.mxu0 %v11975_v3 }
0x12e2   :  { %v2292_v21 = vpop.permute.xlu0 %2291 }
0x12e3   :  { %v2294_v10 = vmul.f32 %v2292_v21, %v2289_v8 }
0x12e5   :  { %v12456_v13 = vadd.f32 %v2297_v12, %v2294_v10 }
0x12e6   :  { %v1000_v14 = vpop.permute.xlu0 %999 }
0x12e7   :  { %1003 = vst.msk [vmem:[#allocation2] sm:$0x30] %vm1002_vm6, %v1000_v14  ;;  %2300 = vrot.lane.b32.xlu0 %v12456_v13, %s11980_s29 }
0x12ea   :  { %v1777_v16 = vpop.permute.xlu0 %1776 }
0x12eb   :  { %1779 = vst.msk [vmem:[#allocation2 + $0x8] sm:$0xc] %vm739_vm4, %v1777_v16 }
0x12ee   :  { %v2309_v28 = vld [vmem:[#allocation2] sm:$0xff] }
0x12ef   :  { %10037 = vmatprep.mubr.msk.f32.mxu1 %vm222_vm3, %v2309_v28 }
0x1351   :  { %v2487_v39 = vpop.f32.mrb[26].mxu0 }
0x1352   :  { %v10050_v40 = vpop.f32.mrb[27].mxu0 }
0x1359   :  { %v2301_v36 = vpop.permute.xlu0 %2300  ;;  %v2633_v41 = vpop.f32.mrb[28].mxu0 }
0x135a   :  { %2303 = vst.msk [vmem:[#allocation2 + $0x8] sm:$0xc0] %vm1265_vm5, %v2301_v36  ;;  %v10072_v42 = vpop.f32.mrb[29].mxu0  ;;  %v2634_v33 = vadd.f32 %v12512_v52, %v2633_v41 }
0x1361   :  { %v2310_v37 = vld [vmem:[#allocation2 + $0x8] sm:$0xff] }
0x1362   :  { %10038 = vmatmul.mubr.msk.f32.vlgmr.msra.gmra.mrb[24].mxu1 %vm222_vm3, %v2310_v37 }
0x1363   :  { %11036 = vmatpush3.bf16.msra.mxu1 %v12474_v31  ;;  %10059 = vmatprep.mubr.msk.f32.mxu1 %vm11976_vm1, %v11977_v11 }
0x1364   :  { %11037 = vmatprep.subr.bf16.mxu1 %v11975_v3 }
0x1367   :  { %11039 = vmatpush3.bf16.msra.mxu1 %v12481_v35 }
0x1368   :  { %11046 = vmatprep.subr.bf16.mxu1 %v11975_v3 }
0x136a   :  { %10060 = vmatmul.mubr.f32.vlgmr.msra.gmra.mrb[26].mxu1 %v11977_v11 }
0x136b   :  { %11048 = vmatpush3.bf16.msra.mxu1 %v12446_v2  ;;  %10081 = vmatprep.mubr.msk.f32.mxu1 %vm11976_vm1, %v11977_v11 }
0x136c   :  { %11049 = vmatprep.subr.bf16.mxu1 %v11975_v3 }
0x136f   :  { %11051 = vmatpush3.bf16.msra.mxu1 %v12449_v6 }
0x1370   :  { %11058 = vmatprep.subr.bf16.mxu1 %v11975_v3 }
0x1435   :  { %v10039_v43 = vpop.f32.mrb[24].mxu1 }
0x1436   :  { %v12503_v44 = vadd.f32 %v10039_v43, %v9106_v18  ;;  %v2395_v22 = vpop.f32.mrb[25].mxu1 }
0x1437   :  { %v12505_v45 = vadd.f32 %v9106_v18, %v2395_v22 }
0x1439   :  { %v2637_v46 = vadd.f32 %v2487_v39, %v12505_v45 }
0x143b   :  { %v9111_v47 = vmul.f32 -1.442695, %v2637_v46 }
0x143d   :  { %11582 = vpow2.f32 %v9111_v47  ;;  %v2557_v49 = vpop.f32.mrb[26].mxu1 }
0x143e   :  { %2645 = vrot.lane.b32.xlu0 %v2557_v49, %s11979_s27  ;;  %v10061_v50 = vpop.f32.mrb[27].mxu1 }
0x1447   :  { %v11583_v27 = vpop.eup %11582 }
0x1448   :  { %v2641_v51 = vadd.f32 1.0, %v11583_v27 }
0x144a   :  { %11584 = vrcp.f32 %v2641_v51 }
0x1454   :  { %v11585_v48 = vpop.eup %11584 }
0x1455   :  { %v2655_v53 = vmul.f32 %v11585_v48, %v2634_v33 }
0x1457   :  { %2657 = vrot.lane.b32.xlu1 %v2655_v53, %s11978_s23 }
0x14b0   :  { %v2646_v56 = vpop.permute.xlu0 %2645 }
0x14b1   :  { %v2648_v58 = vadd.f32 %v2646_v56, %v12505_v45 }
0x14b3   :  { %v9112_v59 = vmul.f32 -1.442695, %v2648_v58 }
0x14c9   :  { %v2658_v54 = vpop.permute.xlu1 %2657 }
0x14ca   :  { %v2660_v38 = vadd.f32 %v2658_v54, %v12505_v45 }
0x14cc   :  { %11586 = vtanh.f32 %v2660_v38 }
0x14cd   :  { %11588 = vpow2.f32 %v9112_v59 }
0x14d6   :  { %v11587_v55 = vpop.eup %11586 }
0x14d7   :  { %2664 = vrot.lane.b32.xlu1 %v11587_v55, %s11980_s29  ;;  %v11589_v4 = vpop.eup %11588 }
0x14d8   :  { %v2652_v60 = vadd.f32 1.0, %v11589_v4 }
0x14da   :  { %11590 = vrcp.f32 %v2652_v60 }
0x14e4   :  { %v11591_v61 = vpop.eup %11590 }
0x14e5   :  { %v2662_v62 = vsub.f32 1.0, %v11591_v61  ;;  %v2668_v0 = vmul.f32 0.0, %v11591_v61 }
0x1549   :  { %v2665_v63 = vpop.permute.xlu1 %2664 }
0x154a   :  { %v2667_v9 = vmul.f32 %v2665_v63, %v2662_v62 }
0x154c   :  { %v2669_v5 = vadd.f32 %v2668_v0, %v2667_v9 }
0x154e   :  { %2671 = vrot.lane.b32.xlu0 %v2669_v5, %s11980_s29  ;;  %v2925_v18 = vrot.slane %v2669_v5, 6 }
0x15c0   :  { %v2672_v1 = vpop.permute.xlu0 %2671 }
0x15c1   :  { %2674 = vst.msk [vmem:[#allocation3] sm:$0x3] %vm479_vm2, %v2672_v1  ;;  %10082 = vmatmul.mubr.msk.f32.vlgmr.msra.gmra.mrb[28].mxu1 %vm222_vm3, %v2672_v1  ;;  %10093 = vmatmul.mubr.msk.f32.vlgmr.msra.gmra.mrb[30].mxu0 %vm222_vm3, %v2672_v1 }
0x15c2   :  { %11060 = vmatpush3.bf16.msra.mxu1 %v12465_v23  ;;  %10103 = vmatprep.mubr.msk.f32.mxu1 %vm11976_vm1, %v11977_v11 }
0x15c3   :  { %11061 = vmatprep.subr.bf16.mxu1 %v11975_v3  ;;  %11066 = vmatpush3.bf16.msra.mxu0 %v12446_v2 }
0x15c4   :  { %11067 = vmatprep.subr.bf16.mxu0 %v11975_v3  ;;  %10114 = vmatprep.mubr.msk.f32.mxu0 %vm11976_vm1, %v11977_v11 }
0x15c6   :  { %11063 = vmatpush3.bf16.msra.mxu1 %v12468_v26 }
0x15c7   :  { %11070 = vmatprep.subr.bf16.mxu1 %v11975_v3  ;;  %11069 = vmatpush3.bf16.msra.mxu0 %v12449_v6 }
0x15c8   :  { %11076 = vmatprep.subr.bf16.mxu0 %v11975_v3 }
0x15c9   :  { %10104 = vmatmul.mubr.msk.f32.vlgmr.msra.gmra.mrb[30].mxu1 %vm222_vm3, %v2672_v1 }
0x15ca   :  { %11072 = vmatpush3.bf16.msra.mxu1 %v12474_v31  ;;  %10125 = vmatprep.mubr.msk.f32.mxu1 %vm11976_vm1, %v11977_v11 }
0x15cb   :  { %11073 = vmatprep.subr.bf16.mxu1 %v11975_v3 }
0x15ce   :  { %11075 = vmatpush3.bf16.msra.mxu1 %v12481_v35 }
0x15cf   :  { %11082 = vmatprep.subr.bf16.mxu1 %v11975_v3 }
0x1694   :  { %v2743_v15 = vpop.f32.mrb[28].mxu1  ;;  %v2813_v57 = vpop.f32.mrb[30].mxu0 }
0x1695   :  { %v2888_v25 = vrot.slane %v2743_v15, 6  ;;  %v2898_v7 = vrot.slane %v2813_v57, 6  ;;  %v10083_v8 = vpop.f32.mrb[29].mxu1  ;;  %v10094_v21 = vpop.f32.mrb[31].mxu0 }
0x1697   :  { %v2890_v10 = vadd.f32 %v2888_v25, %v12505_v45  ;;  %2899 = vrot.lane.b32.xlu0 %v2898_v7, %s11979_s27 }
0x1699   :  { %v9116_v12 = vmul.f32 -1.442695, %v2890_v10 }
0x169b   :  { %11592 = vpow2.f32 %v9116_v12 }
0x169c   :  { %v2883_v14 = vpop.f32.mrb[30].mxu1 }
0x169d   :  { %v10105_v16 = vpop.f32.mrb[31].mxu1  ;;  %v2884_v20 = vadd.f32 %v12512_v52, %v2883_v14 }
0x169f   :  { %v2910_v24 = vrot.slane %v2884_v20, 6 }
0x16a5   :  { %v11593_v17 = vpop.eup %11592 }
0x16a6   :  { %v2894_v19 = vadd.f32 1.0, %v11593_v17 }
0x16a8   :  { %11594 = vrcp.f32 %v2894_v19 }
0x16b2   :  { %v11595_v28 = vpop.eup %11594 }
0x16b3   :  { %v2912_v29 = vmul.f32 %v11595_v28, %v2910_v24 }
0x16b5   :  { %2914 = vrot.lane.b32.xlu1 %v2912_v29, %s11978_s23 }
0x1709   :  { %v2900_v36 = vpop.permute.xlu0 %2899 }
0x170a   :  { %v2902_v37 = vadd.f32 %v2900_v36, %v12505_v45 }
0x170c   :  { %v9117_v39 = vmul.f32 -1.442695, %v2902_v37 }
0x1727   :  { %v2915_v30 = vpop.permute.xlu1 %2914 }
0x1728   :  { %v2917_v32 = vadd.f32 %v2915_v30, %v12505_v45 }
0x172a   :  { %11596 = vtanh.f32 %v2917_v32 }
0x172b   :  { %11598 = vpow2.f32 %v9117_v39 }
0x1734   :  { %v11597_v34 = vpop.eup %11596 }
0x1735   :  { %2921 = vrot.lane.b32.xlu1 %v11597_v34, %s11980_s29  ;;  %v11599_v40 = vpop.eup %11598 }
0x1736   :  { %v2906_v41 = vadd.f32 1.0, %v11599_v40 }
0x1738   :  { %11600 = vrcp.f32 %v2906_v41 }
0x1742   :  { %v11601_v42 = vpop.eup %11600 }
0x1743   :  { %v2919_v43 = vsub.f32 1.0, %v11601_v42  ;;  %v2927_v47 = vmul.f32 %v11601_v42, %v2925_v18 }
0x17a7   :  { %v2922_v22 = vpop.permute.xlu1 %2921 }
0x17a8   :  { %v2924_v46 = vmul.f32 %v2922_v22, %v2919_v43 }
0x17aa   :  { %v12549_v49 = vadd.f32 %v2927_v47, %v2924_v46 }
0x17ac   :  { %v2934_v50 = vrot.slane %v12549_v49, 2  ;;  %v3187_v12 = vrot.slane %v12549_v49, 6 }
0x17ae   :  { %2935 = vrot.lane.b32.xlu0 %v2934_v50, %s11980_s29 }
0x1820   :  { %v2936_v27 = vpop.permute.xlu0 %2935 }
0x1821   :  { %10115 = vmatmul.mubr.msk.f32.vlgmr.msra.gmra.mrb[32].mxu0 %vm222_vm3, %v2936_v27  ;;  %10126 = vmatmul.mubr.msk.f32.vlgmr.msra.gmra.mrb[32].mxu1 %vm222_vm3, %v2936_v27 }
0x1822   :  { %11078 = vmatpush3.bf16.msra.mxu0 %v12465_v23  ;;  %10136 = vmatprep.mubr.msk.f32.mxu0 %vm11976_vm1, %v11977_v11 }
0x1823   :  { %11079 = vmatprep.subr.bf16.mxu0 %v11975_v3  ;;  %11084 = vmatpush3.bf16.msra.mxu1 %v12446_v2 }
0x1824   :  { %11085 = vmatprep.subr.bf16.mxu1 %v11975_v3  ;;  %10147 = vmatprep.mubr.msk.f32.mxu1 %vm11976_vm1, %v11977_v11 }
0x1826   :  { %11081 = vmatpush3.bf16.msra.mxu0 %v12468_v26 }
0x1827   :  { %11088 = vmatprep.subr.bf16.mxu0 %v11975_v3  ;;  %11087 = vmatpush3.bf16.msra.mxu1 %v12449_v6 }
0x1828   :  { %11094 = vmatprep.subr.bf16.mxu1 %v11975_v3 }
0x1829   :  { %10137 = vmatmul.mubr.msk.f32.vlgmr.msra.gmra.mrb[34].mxu0 %vm222_vm3, %v2936_v27 }
0x182a   :  { %11090 = vmatpush3.bf16.msra.mxu0 %v12474_v31  ;;  %10158 = vmatprep.mubr.msk.f32.mxu0 %vm11976_vm1, %v11977_v11 }
0x182b   :  { %11091 = vmatprep.subr.bf16.mxu0 %v11975_v3 }
0x182e   :  { %11093 = vmatpush3.bf16.msra.mxu0 %v12481_v35 }
0x182f   :  { %11100 = vmatprep.subr.bf16.mxu0 %v11975_v3 }
0x18f4   :  { %v3005_v51 = vpop.f32.mrb[32].mxu0  ;;  %v3075_v33 = vpop.f32.mrb[32].mxu1 }
0x18f5   :  { %v3150_v48 = vrot.slane %v3005_v51, 4  ;;  %v3160_v53 = vrot.slane %v3075_v33, 4  ;;  %v10116_v54 = vpop.f32.mrb[33].mxu0  ;;  %v10127_v38 = vpop.f32.mrb[33].mxu1 }
0x18f7   :  { %v3152_v55 = vadd.f32 %v3150_v48, %v12505_v45  ;;  %3161 = vrot.lane.b32.xlu0 %v3160_v53, %s11979_s27 }
0x18f9   :  { %v9121_v56 = vmul.f32 -1.442695, %v3152_v55 }
0x18fb   :  { %11602 = vpow2.f32 %v9121_v56 }
0x18fc   :  { %v3145_v58 = vpop.f32.mrb[34].mxu0 }
0x18fd   :  { %v10138_v59 = vpop.f32.mrb[35].mxu0  ;;  %v3146_v61 = vadd.f32 %v12512_v52, %v3145_v58 }
0x18ff   :  { %v3172_v62 = vrot.slane %v3146_v61, 4 }
0x1905   :  { %v11603_v4 = vpop.eup %11602 }
0x1906   :  { %v3156_v60 = vadd.f32 1.0, %v11603_v4 }
0x1908   :  { %11604 = vrcp.f32 %v3156_v60 }
0x1912   :  { %v11605_v63 = vpop.eup %11604 }
0x1913   :  { %v3174_v0 = vmul.f32 %v11605_v63, %v3172_v62 }
0x1915   :  { %3176 = vrot.lane.b32.xlu1 %v3174_v0, %s11978_s23 }
0x1969   :  { %v3162_v15 = vpop.permute.xlu0 %3161 }
0x196a   :  { %v3164_v57 = vadd.f32 %v3162_v15, %v12505_v45 }
0x196c   :  { %v9122_v25 = vmul.f32 -1.442695, %v3164_v57 }
0x1987   :  { %v3177_v9 = vpop.permute.xlu1 %3176 }
0x1988   :  { %v3179_v5 = vadd.f32 %v3177_v9, %v12505_v45 }
0x198a   :  { %11606 = vtanh.f32 %v3179_v5 }
0x198b   :  { %11608 = vpow2.f32 %v9122_v25 }
0x1994   :  { %v11607_v1 = vpop.eup %11606 }
0x1995   :  { %3183 = vrot.lane.b32.xlu1 %v11607_v1, %s11980_s29  ;;  %v11609_v7 = vpop.eup %11608 }
0x1996   :  { %v3168_v8 = vadd.f32 1.0, %v11609_v7 }
0x1998   :  { %11610 = vrcp.f32 %v3168_v8 }
0x19a2   :  { %v11611_v21 = vpop.eup %11610 }
0x19a3   :  { %v3181_v10 = vsub.f32 1.0, %v11611_v21  ;;  %v3189_v16 = vmul.f32 %v11611_v21, %v3187_v12 }
0x1a07   :  { %v3184_v14 = vpop.permute.xlu1 %3183 }
0x1a08   :  { %v3186_v17 = vmul.f32 %v3184_v14, %v3181_v10 }
0x1a0a   :  { %v12582_v19 = vadd.f32 %v3189_v16, %v3186_v17 }
0x1a0c   :  { %v3196_v20 = vrot.slane %v12582_v19, 4  ;;  %v3449_v56 = vrot.slane %v12582_v19, 6 }
0x1a0e   :  { %3197 = vrot.lane.b32.xlu0 %v3196_v20, %s11980_s29 }
0x1a80   :  { %v3198_v24 = vpop.permute.xlu0 %3197 }
0x1a81   :  { %10148 = vmatmul.mubr.msk.f32.vlgmr.msra.gmra.mrb[34].mxu1 %vm222_vm3, %v3198_v24  ;;  %10159 = vmatmul.mubr.msk.f32.vlgmr.msra.gmra.mrb[36].mxu0 %vm222_vm3, %v3198_v24 }
0x1a82   :  { %11096 = vmatpush3.bf16.msra.mxu1 %v12465_v23  ;;  %10169 = vmatprep.mubr.msk.f32.mxu1 %vm11976_vm1, %v11977_v11 }
0x1a83   :  { %11097 = vmatprep.subr.bf16.mxu1 %v11975_v3  ;;  %11102 = vmatpush3.bf16.msra.mxu0 %v12446_v2 }
0x1a84   :  { %11103 = vmatprep.subr.bf16.mxu0 %v11975_v3  ;;  %10180 = vmatprep.mubr.msk.f32.mxu0 %vm11976_vm1, %v11977_v11 }
0x1a86   :  { %11099 = vmatpush3.bf16.msra.mxu1 %v12468_v26 }
0x1a87   :  { %11106 = vmatprep.subr.bf16.mxu1 %v11975_v3  ;;  %11105 = vmatpush3.bf16.msra.mxu0 %v12449_v6 }
0x1a88   :  { %11112 = vmatprep.subr.bf16.mxu0 %v11975_v3 }
0x1a89   :  { %10170 = vmatmul.mubr.msk.f32.vlgmr.msra.gmra.mrb[36].mxu1 %vm222_vm3, %v3198_v24 }
0x1a8a   :  { %11108 = vmatpush3.bf16.msra.mxu1 %v12474_v31  ;;  %10191 = vmatprep.mubr.msk.f32.mxu1 %vm11976_vm1, %v11977_v11 }
0x1a8b   :  { %11109 = vmatprep.subr.bf16.mxu1 %v11975_v3 }
0x1a8e   :  { %11111 = vmatpush3.bf16.msra.mxu1 %v12481_v35 }
0x1a8f   :  { %11118 = vmatprep.subr.bf16.mxu1 %v11975_v3 }
0x1b54   :  { %v3267_v28 = vpop.f32.mrb[34].mxu1  ;;  %v3337_v29 = vpop.f32.mrb[36].mxu0 }
0x1b55   :  { %v3412_v30 = vrot.slane %v3267_v28, 2  ;;  %v3422_v32 = vrot.slane %v3337_v29, 2  ;;  %v10149_v34 = vpop.f32.mrb[35].mxu1  ;;  %v10160_v36 = vpop.f32.mrb[37].mxu0 }
0x1b57   :  { %v3414_v37 = vadd.f32 %v3412_v30, %v12505_v45  ;;  %3423 = vrot.lane.b32.xlu0 %v3422_v32, %s11979_s27 }
0x1b59   :  { %v9126_v39 = vmul.f32 -1.442695, %v3414_v37 }
0x1b5b   :  { %11612 = vpow2.f32 %v9126_v39 }
0x1b5c   :  { %v3407_v40 = vpop.f32.mrb[36].mxu1 }
0x1b5d   :  { %v10171_v41 = vpop.f32.mrb[37].mxu1  ;;  %v3408_v43 = vadd.f32 %v12512_v52, %v3407_v40 }
0x1b5f   :  { %v3434_v22 = vrot.slane %v3408_v43, 2 }
0x1b65   :  { %v11613_v42 = vpop.eup %11612 }
0x1b66   :  { %v3418_v18 = vadd.f32 1.0, %v11613_v42 }
0x1b68   :  { %11614 = vrcp.f32 %v3418_v18 }
0x1b72   :  { %v11615_v46 = vpop.eup %11614 }
0x1b73   :  { %v3436_v47 = vmul.f32 %v11615_v46, %v3434_v22 }
0x1b75   :  { %3438 = vrot.lane.b32.xlu1 %v3436_v47, %s11978_s23 }
0x1bc9   :  { %v3424_v33 = vpop.permute.xlu0 %3423 }
0x1bca   :  { %v3426_v48 = vadd.f32 %v3424_v33, %v12505_v45 }
0x1bcc   :  { %v9127_v53 = vmul.f32 -1.442695, %v3426_v48 }
0x1be7   :  { %v3439_v50 = vpop.permute.xlu1 %3438 }
0x1be8   :  { %v3441_v27 = vadd.f32 %v3439_v50, %v12505_v45 }
0x1bea   :  { %11616 = vtanh.f32 %v3441_v27 }
0x1beb   :  { %11618 = vpow2.f32 %v9127_v53 }
0x1bf4   :  { %v11617_v51 = vpop.eup %11616 }
0x1bf5   :  { %3445 = vrot.lane.b32.xlu1 %v11617_v51, %s11980_s29  ;;  %v11619_v54 = vpop.eup %11618 }
0x1bf6   :  { %v3430_v38 = vadd.f32 1.0, %v11619_v54 }
0x1bf8   :  { %11620 = vrcp.f32 %v3430_v38 }
0x1c02   :  { %v11621_v55 = vpop.eup %11620 }
0x1c03   :  { %v3443_v58 = vsub.f32 1.0, %v11621_v55  ;;  %v3451_v60 = vmul.f32 %v11621_v55, %v3449_v56 }
0x1c67   :  { %v3446_v59 = vpop.permute.xlu1 %3445 }
0x1c68   :  { %v3448_v4 = vmul.f32 %v3446_v59, %v3443_v58 }
0x1c6a   :  { %v12615_v61 = vadd.f32 %v3451_v60, %v3448_v4 }
0x1c6c   :  { %v3458_v62 = vrot.slane %v12615_v61, 6 }
0x1c6e   :  { %3459 = vrot.lane.b32.xlu0 %v3458_v62, %s11980_s29 }
0x1ce0   :  { %v3460_v63 = vpop.permute.xlu0 %3459 }
0x1ce1   :  { %10181 = vmatmul.mubr.msk.f32.vlgmr.msra.gmra.mrb[38].mxu0 %vm222_vm3, %v3460_v63  ;;  %10192 = vmatmul.mubr.msk.f32.vlgmr.msra.gmra.mrb[38].mxu1 %vm222_vm3, %v3460_v63 }
0x1ce2   :  { %11114 = vmatpush3.bf16.msra.mxu0 %v12465_v23  ;;  %10202 = vmatprep.mubr.msk.f32.mxu0 %vm11976_vm1, %v11977_v11 }
0x1ce3   :  { %11115 = vmatprep.subr.bf16.mxu0 %v11975_v3  ;;  %11120 = vmatpush3.bf16.msra.mxu1 %v12446_v2 }
0x1ce4   :  { %11121 = vmatprep.subr.bf16.mxu1 %v11975_v3  ;;  %10213 = vmatprep.mubr.msk.f32.mxu1 %vm11976_vm1, %v11977_v11 }
0x1ce6   :  { %11117 = vmatpush3.bf16.msra.mxu0 %v12468_v26 }
0x1ce7   :  { %11124 = vmatprep.subr.bf16.mxu0 %v11975_v3  ;;  %11123 = vmatpush3.bf16.msra.mxu1 %v12449_v6 }
0x1ce8   :  { %11130 = vmatprep.subr.bf16.mxu1 %v11975_v3 }
0x1ce9   :  { %10203 = vmatmul.mubr.msk.f32.vlgmr.msra.gmra.mrb[40].mxu0 %vm222_vm3, %v3460_v63 }
0x1cea   :  { %11126 = vmatpush3.bf16.msra.mxu0 %v12474_v31  ;;  %10224 = vmatprep.mubr.msk.f32.mxu0 %vm11976_vm1, %v11977_v11 }
0x1ceb   :  { %11127 = vmatprep.subr.bf16.mxu0 %v11975_v3 }
0x1cee   :  { %11129 = vmatpush3.bf16.msra.mxu0 %v12481_v35 }
0x1cef   :  { %11136 = vmatprep.subr.bf16.mxu0 %v11975_v3 }
0x1db4   :  { %v3529_v45 = vpop.f32.mrb[38].mxu0  ;;  %v3599_v0 = vpop.f32.mrb[38].mxu1 }
0x1db5   :  { %v3673_v9 = vadd.f32 %v3529_v45, %v12503_v44  ;;  %3681 = vrot.lane.b32.xlu0 %v3599_v0, %s11979_s27  ;;  %v10182_v5 = vpop.f32.mrb[39].mxu0  ;;  %v10193_v1 = vpop.f32.mrb[39].mxu1 }
0x1db7   :  { %v9131_v15 = vmul.f32 -1.442695, %v3673_v9 }
0x1db9   :  { %11622 = vpow2.f32 %v9131_v15 }
0x1dbc   :  { %v3669_v57 = vpop.f32.mrb[40].mxu0 }
0x1dbd   :  { %v10204_v25 = vpop.f32.mrb[41].mxu0  ;;  %v3670_v21 = vadd.f32 %v12512_v52, %v3669_v57 }
0x1dc3   :  { %v11623_v7 = vpop.eup %11622 }
0x1dc4   :  { %v3677_v8 = vadd.f32 1.0, %v11623_v7 }
0x1dc6   :  { %11624 = vrcp.f32 %v3677_v8 }
0x1dd0   :  { %v11625_v10 = vpop.eup %11624 }
0x1dd1   :  { %v3691_v12 = vmul.f32 %v11625_v10, %v3670_v21 }
0x1dd3   :  { %3693 = vrot.lane.b32.xlu1 %v3691_v12, %s11978_s23 }
0x1e27   :  { %v3682_v20 = vpop.permute.xlu0 %3681 }
0x1e28   :  { %v3684_v24 = vadd.f32 %v3682_v20, %v12503_v44 }
0x1e2a   :  { %v9132_v28 = vmul.f32 -1.442695, %v3684_v24 }
0x1e45   :  { %v3694_v14 = vpop.permute.xlu1 %3693 }
0x1e46   :  { %v3696_v16 = vadd.f32 %v3694_v14, %v12503_v44 }
0x1e48   :  { %11626 = vtanh.f32 %v3696_v16 }
0x1e49   :  { %11628 = vpow2.f32 %v9132_v28 }
0x1e52   :  { %v11627_v17 = vpop.eup %11626 }
0x1e53   :  { %3700 = vrot.lane.b32.xlu1 %v11627_v17, %s11980_s29  ;;  %v11629_v29 = vpop.eup %11628 }
0x1e54   :  { %v3688_v30 = vadd.f32 1.0, %v11629_v29 }
0x1e56   :  { %11630 = vrcp.f32 %v3688_v30 }
0x1e60   :  { %v11631_v32 = vpop.eup %11630 }
0x1e61   :  { %v3698_v34 = vsub.f32 1.0, %v11631_v32  ;;  %v3705_v37 = vmul.f32 %v11631_v32, %v3458_v62 }
0x1ec5   :  { %v3701_v36 = vpop.permute.xlu1 %3700 }
0x1ec6   :  { %v3703_v39 = vmul.f32 %v3701_v36, %v3698_v34 }
0x1ec8   :  { %v3706_v40 = vadd.f32 %v3705_v37, %v3703_v39 }
0x1eca   :  { %3708 = vrot.lane.b32.xlu0 %v3706_v40, %s11980_s29  ;;  %v3962_v5 = vrot.slane %v3706_v40, 6 }
0x1f3c   :  { %v3709_v41 = vpop.permute.xlu0 %3708 }
0x1f3d   :  { %3711 = vst.msk [vmem:[#allocation3 + $0x8] sm:$0x3] %vm479_vm2, %v3709_v41  ;;  %10214 = vmatmul.mubr.msk.f32.vlgmr.msra.gmra.mrb[40].mxu1 %vm222_vm3, %v3709_v41  ;;  %10225 = vmatmul.mubr.msk.f32.vlgmr.msra.gmra.mrb[42].mxu0 %vm222_vm3, %v3709_v41 }
0x1f3e   :  { %11132 = vmatpush3.bf16.msra.mxu1 %v12465_v23  ;;  %10235 = vmatprep.mubr.msk.f32.mxu1 %vm11976_vm1, %v11977_v11 }
0x1f3f   :  { %11133 = vmatprep.subr.bf16.mxu1 %v11975_v3  ;;  %11138 = vmatpush3.bf16.msra.mxu0 %v12446_v2 }
0x1f40   :  { %11139 = vmatprep.subr.bf16.mxu0 %v11975_v3  ;;  %10246 = vmatprep.mubr.msk.f32.mxu0 %vm11976_vm1, %v11977_v11 }
0x1f42   :  { %11135 = vmatpush3.bf16.msra.mxu1 %v12468_v26 }
0x1f43   :  { %11142 = vmatprep.subr.bf16.mxu1 %v11975_v3  ;;  %11141 = vmatpush3.bf16.msra.mxu0 %v12449_v6 }
0x1f44   :  { %11148 = vmatprep.subr.bf16.mxu0 %v11975_v3 }
0x1f45   :  { %10236 = vmatmul.mubr.msk.f32.vlgmr.msra.gmra.mrb[42].mxu1 %vm222_vm3, %v3709_v41 }
0x1f46   :  { %11144 = vmatpush3.bf16.msra.mxu1 %v12474_v31  ;;  %10257 = vmatprep.mubr.msk.f32.mxu1 %vm11976_vm1, %v11977_v11 }
0x1f47   :  { %11145 = vmatprep.subr.bf16.mxu1 %v11975_v3 }
0x1f4a   :  { %11147 = vmatpush3.bf16.msra.mxu1 %v12481_v35 }
0x1f4b   :  { %11154 = vmatprep.subr.bf16.mxu1 %v11975_v3 }
0x2010   :  { %v3780_v42 = vpop.f32.mrb[40].mxu1  ;;  %v3850_v18 = vpop.f32.mrb[42].mxu0 }
0x2011   :  { %v3925_v43 = vrot.slane %v3780_v42, 6  ;;  %v3935_v22 = vrot.slane %v3850_v18, 6  ;;  %v10215_v46 = vpop.f32.mrb[41].mxu1  ;;  %v10226_v47 = vpop.f32.mrb[43].mxu0 }
0x2013   :  { %v3927_v50 = vadd.f32 %v3925_v43, %v12503_v44  ;;  %3936 = vrot.lane.b32.xlu0 %v3935_v22, %s11979_s27 }
0x2015   :  { %v9136_v27 = vmul.f32 -1.442695, %v3927_v50 }
0x2017   :  { %11632 = vpow2.f32 %v9136_v27 }
0x2018   :  { %v3920_v51 = vpop.f32.mrb[42].mxu1 }
0x2019   :  { %v10237_v33 = vpop.f32.mrb[43].mxu1  ;;  %v3921_v54 = vadd.f32 %v12512_v52, %v3920_v51 }
0x201b   :  { %v3947_v38 = vrot.slane %v3921_v54, 6 }
0x2021   :  { %v11633_v48 = vpop.eup %11632 }
0x2022   :  { %v3931_v53 = vadd.f32 1.0, %v11633_v48 }
0x2024   :  { %11634 = vrcp.f32 %v3931_v53 }
0x202e   :  { %v11635_v55 = vpop.eup %11634 }
0x202f   :  { %v3949_v56 = vmul.f32 %v11635_v55, %v3947_v38 }
0x2031   :  { %3951 = vrot.lane.b32.xlu1 %v3949_v56, %s11978_s23 }
0x2085   :  { %v3937_v60 = vpop.permute.xlu0 %3936 }
0x2086   :  { %v3939_v62 = vadd.f32 %v3937_v60, %v12503_v44 }
0x2088   :  { %v9137_v63 = vmul.f32 -1.442695, %v3939_v62 }
0x20a3   :  { %v3952_v58 = vpop.permute.xlu1 %3951 }
0x20a4   :  { %v3954_v59 = vadd.f32 %v3952_v58, %v12503_v44 }
0x20a6   :  { %11636 = vtanh.f32 %v3954_v59 }
0x20a7   :  { %11638 = vpow2.f32 %v9137_v63 }
0x20b0   :  { %v11637_v4 = vpop.eup %11636 }
0x20b1   :  { %3958 = vrot.lane.b32.xlu1 %v11637_v4, %s11980_s29  ;;  %v11639_v45 = vpop.eup %11638 }
0x20b2   :  { %v3943_v0 = vadd.f32 1.0, %v11639_v45 }
0x20b4   :  { %11640 = vrcp.f32 %v3943_v0 }
0x20be   :  { %v11641_v9 = vpop.eup %11640 }
0x20bf   :  { %v3956_v1 = vsub.f32 1.0, %v11641_v9  ;;  %v3964_v25 = vmul.f32 %v11641_v9, %v3962_v5 }
0x2123   :  { %v3959_v15 = vpop.permute.xlu1 %3958 }
0x2124   :  { %v3961_v57 = vmul.f32 %v3959_v15, %v3956_v1 }
0x2126   :  { %v12677_v7 = vadd.f32 %v3964_v25, %v3961_v57 }
0x2128   :  { %v3971_v8 = vrot.slane %v12677_v7, 2  ;;  %v4224_v47 = vrot.slane %v12677_v7, 6 }
0x212a   :  { %3972 = vrot.lane.b32.xlu0 %v3971_v8, %s11980_s29  ;;  %v9149_v8 = vld [vmem:[%s13378_s2 + $0x20] sm:$0xff] }
0x219c   :  { %v3973_v21 = vpop.permute.xlu0 %3972 }
0x219d   :  { %10247 = vmatmul.mubr.msk.f32.vlgmr.msra.gmra.mrb[44].mxu0 %vm222_vm3, %v3973_v21  ;;  %10258 = vmatmul.mubr.msk.f32.vlgmr.msra.gmra.mrb[44].mxu1 %vm222_vm3, %v3973_v21 }
0x219e   :  { %11150 = vmatpush3.bf16.msra.mxu0 %v12465_v23  ;;  %10268 = vmatprep.mubr.msk.f32.mxu0 %vm11976_vm1, %v11977_v11 }
0x219f   :  { %11151 = vmatprep.subr.bf16.mxu0 %v11975_v3  ;;  %11156 = vmatpush3.bf16.msra.mxu1 %v12446_v2 }
0x21a0   :  { %11157 = vmatprep.subr.bf16.mxu1 %v11975_v3  ;;  %10279 = vmatprep.mubr.msk.f32.mxu1 %vm11976_vm1, %v11977_v11 }
0x21a2   :  { %11153 = vmatpush3.bf16.msra.mxu0 %v12468_v26 }
0x21a3   :  { %11160 = vmatprep.subr.bf16.mxu0 %v11975_v3  ;;  %11159 = vmatpush3.bf16.msra.mxu1 %v12449_v6 }
0x21a4   :  { %11166 = vmatprep.subr.bf16.mxu1 %v11975_v3 }
0x21a5   :  { %10269 = vmatmul.mubr.msk.f32.vlgmr.msra.gmra.mrb[46].mxu0 %vm222_vm3, %v3973_v21  ;;  %v9150_v21 = vld [vmem:[%s13378_s2 + $0x28] sm:$0xff] }
0x21a6   :  { %11162 = vmatpush3.bf16.msra.mxu0 %v12474_v31  ;;  %10290 = vmatprep.mubr.msk.f32.mxu0 %vm11976_vm1, %v11977_v11 }
0x21a7   :  { %11163 = vmatprep.subr.bf16.mxu0 %v11975_v3 }
0x21aa   :  { %11165 = vmatpush3.bf16.msra.mxu0 %v12481_v35 }
0x2270   :  { %v4042_v2 = vpop.f32.mrb[44].mxu0  ;;  %v4112_v10 = vpop.f32.mrb[44].mxu1 }
0x2271   :  { %v4187_v12 = vrot.slane %v4042_v2, 4  ;;  %v4197_v14 = vrot.slane %v4112_v10, 4  ;;  %v10248_v16 = vpop.f32.mrb[45].mxu0  ;;  %v10259_v17 = vpop.f32.mrb[45].mxu1  ;;  %v11172_v2 = vpack.c.bf16 %v9150_v21, %v9149_v8  ;;  %v12822_v8 = vld [vmem:[%s13383_s7 + $0x2] ss:$0 sm:$0xff] }
0x2272   :  { %v9151_v17 = vld [vmem:[%s13378_s2 + $0x30] sm:$0xff] }
0x2273   :  { %v4189_v6 = vadd.f32 %v4187_v12, %v12503_v44  ;;  %4198 = vrot.lane.b32.xlu0 %v4197_v14, %s11979_s27  ;;  %11173 = vmatprep.subr.bf16.mxu0 %v11172_v2 }
0x2275   :  { %v9141_v20 = vmul.f32 -1.442695, %v4189_v6  ;;  %v4597_v6 = vld [vmem:[#allocation5 + $0x40] sm:$0xff] }
0x2277   :  { %11642 = vpow2.f32 %v9141_v20 }
0x2278   :  { %v4182_v31 = vpop.f32.mrb[46].mxu0 }
0x2279   :  { %v10270_v24 = vpop.f32.mrb[47].mxu0  ;;  %v4183_v30 = vadd.f32 %v12512_v52, %v4182_v31  ;;  %v4598_v31 = vld [vmem:[#allocation5 + $0x48] sm:$0xff] }
0x227a   :  { %v4599_v24 = vld [vmem:[#allocation5 + $0x50] sm:$0xff] }
0x227b   :  { %v4209_v35 = vrot.slane %v4183_v30, 4 }
0x2281   :  { %v11643_v28 = vpop.eup %11642 }
0x2282   :  { %v4193_v29 = vadd.f32 1.0, %v11643_v28  ;;  %v12756_v28 = vpack.c.bf16 %v4598_v31, %v4597_v6 }
0x2284   :  { %11644 = vrcp.f32 %v4193_v29 }
0x228e   :  { %v11645_v32 = vpop.eup %11644 }
0x228f   :  { %v4211_v34 = vmul.f32 %v11645_v32, %v4209_v35 }
0x2291   :  { %4213 = vrot.lane.b32.xlu1 %v4211_v34, %s11978_s23 }
0x22e5   :  { %v4199_v40 = vpop.permute.xlu0 %4198 }
0x22e6   :  { %v4201_v41 = vadd.f32 %v4199_v40, %v12503_v44 }
0x22e8   :  { %v9142_v42 = vmul.f32 -1.442695, %v4201_v41  ;;  %v4607_v41 = vld [vmem:[#allocation11 + $0x40] sm:$0xff] }
0x2303   :  { %v4214_v36 = vpop.permute.xlu1 %4213 }
0x2304   :  { %v4216_v37 = vadd.f32 %v4214_v36, %v12503_v44 }
0x2306   :  { %11646 = vtanh.f32 %v4216_v37 }
0x2307   :  { %11648 = vpow2.f32 %v9142_v42  ;;  %v4608_v42 = vld [vmem:[#allocation11 + $0x48] sm:$0xff] }
0x2310   :  { %v11647_v39 = vpop.eup %11646 }
0x2311   :  { %4220 = vrot.lane.b32.xlu1 %v11647_v39, %s11980_s29  ;;  %v11649_v18 = vpop.eup %11648 }
0x2312   :  { %v4205_v43 = vadd.f32 1.0, %v11649_v18  ;;  %v4609_v18 = vld [vmem:[#allocation11 + $0x50] sm:$0xff] }
0x2314   :  { %11650 = vrcp.f32 %v4205_v43  ;;  %v4610_v43 = vld [vmem:[#allocation11 + $0x58] sm:$0xff] }
0x231e   :  { %v11651_v22 = vpop.eup %11650 }
0x231f   :  { %v4218_v46 = vsub.f32 1.0, %v11651_v22  ;;  %v4226_v27 = vmul.f32 %v11651_v22, %v4224_v47  ;;  %v12776_v22 = vpack.c.bf16 %v4610_v43, %v4609_v18 }
0x2383   :  { %v4221_v50 = vpop.permute.xlu1 %4220 }
0x2384   :  { %v4223_v51 = vmul.f32 %v4221_v50, %v4218_v46  ;;  %v4497_v50 = vstv %s9148_s15 }
0x2386   :  { %v12709_v33 = vadd.f32 %v4226_v27, %v4223_v51  ;;  %v2306_v27 = vstv %s2305_s17  ;;  %v4602_v51 = vld [vmem:[#allocation9 + $0x40] sm:$0xff] }
0x2388   :  { %v4233_v48 = vrot.slane %v12709_v33, 4  ;;  %v4486_v30 = vrot.slane %v12709_v33, 6 }
0x238a   :  { %4234 = vrot.lane.b32.xlu0 %v4233_v48, %s11980_s29 }
0x23fc   :  { %v4235_v53 = vpop.permute.xlu0 %4234 }
0x23fd   :  { %10280 = vmatmul.mubr.msk.f32.vlgmr.msra.gmra.mrb[46].mxu1 %vm222_vm3, %v4235_v53  ;;  %10291 = vmatmul.mubr.msk.f32.vlgmr.msra.gmra.mrb[48].mxu0 %vm222_vm3, %v4235_v53 }
0x23fe   :  { %11168 = vmatpush3.bf16.msra.mxu1 %v12465_v23  ;;  %10301 = vmatprep.mubr.msk.f32.mxu1 %vm11976_vm1, %v11977_v11 }
0x23ff   :  { %11169 = vmatprep.subr.bf16.mxu1 %v11975_v3  ;;  %11175 = vmatpush3.bf16.msra.mxu0 %v11172_v2 }
0x2402   :  { %11171 = vmatpush3.bf16.msra.mxu1 %v12468_v26 }
0x2403   :  { %11180 = vmatprep.subr.bf16.mxu1 %v11975_v3 }
0x2405   :  { %10302 = vmatmul.mubr.msk.f32.vlgmr.msra.gmra.mrb[48].mxu1 %vm222_vm3, %v4235_v53 }
0x2406   :  { %10323 = vmatprep.mubr.msk.f32.mxu1 %vm11976_vm1, %v11977_v11  ;;  %11182 = vmatpush3.bf16.msra.mxu1 %v12756_v28 }
0x2407   :  { %11183 = vmatprep.subr.bf16.mxu1 %v11975_v3 }
0x24d0   :  { %v4304_v54 = vpop.f32.mrb[46].mxu1  ;;  %v4374_v38 = vpop.f32.mrb[48].mxu0 }
0x24d1   :  { %v4449_v55 = vrot.slane %v4304_v54, 2  ;;  %v4459_v56 = vrot.slane %v4374_v38, 2  ;;  %v10281_v58 = vpop.f32.mrb[47].mxu1  ;;  %v10292_v23 = vpop.f32.mrb[49].mxu0 }
0x24d3   :  { %v4451_v59 = vadd.f32 %v4449_v55, %v12503_v44  ;;  %4460 = vrot.lane.b32.xlu0 %v4459_v56, %s11979_s27  ;;  %v4604_v55 = vld [vmem:[#allocation9 + $0x50] sm:$0xff]  ;;  %v4605_v56 = vld [vmem:[#allocation9 + $0x58] sm:$0xff] }
0x24d4   :  { %v12791_v23 = vpack.c.bf16 %v4605_v56, %v4604_v55 }
0x24d5   :  { %v9146_v4 = vmul.f32 -1.442695, %v4451_v59 }
0x24d7   :  { %11652 = vpow2.f32 %v9146_v4  ;;  %2930 = vrot.lane.b32.xlu0 %v12549_v49, %s11980_s29 }
0x24d8   :  { %v4444_v26 = vpop.f32.mrb[48].mxu1 }
0x24d9   :  { %v10303_v60 = vpop.f32.mrb[49].mxu1  ;;  %v4445_v45 = vadd.f32 %v12512_v52, %v4444_v26 }
0x24db   :  { %3454 = vrot.lane.b32.xlu0 %v12615_v61, %s11980_s29  ;;  %v4471_v0 = vrot.slane %v4445_v45, 2  ;;  %v9154_v45 = vld [vmem:[%s13379_s3 + $0x2] ss:$0 sm:$0xff] }
0x24df   :  { %4229 = vrot.lane.b32.xlu0 %v12709_v33, %s11980_s29  ;;  %v4603_v33 = vld [vmem:[#allocation9 + $0x48] sm:$0xff] }
0x24e0   :  { %v12782_v38 = vpack.c.bf16 %v4603_v33, %v4602_v51 }
0x24e1   :  { %v11653_v62 = vpop.eup %11652 }
0x24e2   :  { %v4455_v63 = vadd.f32 1.0, %v11653_v62 }
0x24e4   :  { %11654 = vrcp.f32 %v4455_v63 }
0x24ee   :  { %v11655_v9 = vpop.eup %11654 }
0x24ef   :  { %v4473_v5 = vmul.f32 %v11655_v9, %v4471_v0 }
0x24f1   :  { %4475 = vrot.lane.b32.xlu1 %v4473_v5, %s11978_s23 }
0x2545   :  { %v4461_v1 = vpop.permute.xlu0 %4460 }
0x2546   :  { %v4463_v10 = vadd.f32 %v4461_v1, %v12503_v44 }
0x2548   :  { %v9147_v12 = vmul.f32 -1.442695, %v4463_v10 }
0x2549   :  { %v2931_v49 = vpop.permute.xlu0 %2930 }
0x254a   :  { %2933 = vst.msk [vmem:[#allocation3] sm:$0xc] %vm739_vm4, %v2931_v49 }
0x254d   :  { %v3455_v15 = vpop.permute.xlu0 %3454 }
0x254e   :  { %3457 = vst.msk [vmem:[#allocation3] sm:$0xc0] %vm1265_vm5, %v3455_v15 }
0x2551   :  { %v4230_v61 = vpop.permute.xlu0 %4229 }
0x2552   :  { %4232 = vst.msk [vmem:[#allocation3 + $0x8] sm:$0x30] %vm1002_vm6, %v4230_v61 }
0x2563   :  { %v4476_v57 = vpop.permute.xlu1 %4475 }
0x2564   :  { %v4478_v25 = vadd.f32 %v4476_v57, %v12503_v44 }
0x2566   :  { %11656 = vtanh.f32 %v4478_v25 }
0x2567   :  { %11658 = vpow2.f32 %v9147_v12 }
0x2570   :  { %v11657_v52 = vpop.eup %11656 }
0x2571   :  { %4482 = vrot.lane.b32.xlu1 %v11657_v52, %s11980_s29  ;;  %v11659_v14 = vpop.eup %11658 }
0x2572   :  { %v4467_v16 = vadd.f32 1.0, %v11659_v14 }
0x2574   :  { %11660 = vrcp.f32 %v4467_v16 }
0x2575   :  { %3192 = vrot.lane.b32.xlu1 %v12582_v19, %s11980_s29  ;;  %v9152_v19 = vld [vmem:[%s13378_s2 + $0x38] sm:$0xff]  ;;  %11662 = vtanh.f32 %v12456_v13  ;;  %v12773_v13 = vpack.c.bf16 %v4608_v42, %v4607_v41 }
0x2576   :  { %v11176_v20 = vpack.c.bf16 %v9152_v19, %v9151_v17 }
0x2578   :  { %11177 = vmatprep.subr.bf16.mxu0 %v11176_v20 }
0x2579   :  { %3967 = vrot.lane.b32.xlu1 %v12677_v7, %s11980_s29  ;;  %v4600_v7 = vld [vmem:[#allocation5 + $0x58] sm:$0xff]  ;;  %11179 = vmatpush3.bf16.msra.mxu0 %v11176_v20 }
0x257a   :  { %v12759_v29 = vpack.c.bf16 %v4600_v7, %v4599_v24  ;;  %11186 = vmatprep.subr.bf16.mxu0 %v11975_v3 }
0x257c   :  { %11185 = vmatpush3.bf16.msra.mxu1 %v12759_v29 }
0x257d   :  { %11192 = vmatprep.subr.bf16.mxu1 %v11975_v3 }
0x257e   :  { %v11661_v44 = vpop.eup %11660 }
0x257f   :  { %v4480_v35 = vsub.f32 1.0, %v11661_v44  ;;  %v4488_v36 = vmul.f32 %v11661_v44, %v4486_v30  ;;  %10324 = vmatmul.mubr.f32.vlgmr.msra.gmra.mrb[50].mxu1 %v11977_v11  ;;  %v11663_v47 = vpop.eup %11662 }
0x2580   :  { %10345 = vmatprep.mubr.msk.f32.mxu1 %vm11976_vm1, %v11977_v11  ;;  %11194 = vmatpush3.bf16.msra.mxu1 %v12773_v13  ;;  %v2307_v54 = vmul.f32 %v11663_v47, %v2306_v27 }
0x2581   :  { %11195 = vmatprep.subr.bf16.mxu1 %v11975_v3 }
0x2584   :  { %11197 = vmatpush3.bf16.msra.mxu1 %v12776_v22 }
0x2585   :  { %11204 = vmatprep.subr.bf16.mxu1 %v11975_v3 }
0x2587   :  { %10346 = vmatmul.mubr.f32.vlgmr.msra.gmra.mrb[52].mxu1 %v11977_v11 }
0x2588   :  { %11206 = vmatpush3.bf16.msra.mxu1 %v12782_v38  ;;  %10367 = vmatprep.mubr.msk.f32.mxu1 %vm11976_vm1, %v11977_v11 }
0x2589   :  { %11207 = vmatprep.subr.bf16.mxu1 %v11975_v3 }
0x258c   :  { %11209 = vmatpush3.bf16.msra.mxu1 %v12791_v23 }
0x258d   :  { %11216 = vmatprep.subr.bf16.mxu1 %v11975_v3 }
0x25e3   :  { %v4483_v32 = vpop.permute.xlu1 %4482 }
0x25e4   :  { %v4485_v34 = vmul.f32 %v4483_v32, %v4480_v35 }
0x25e6   :  { %v4489_v37 = vadd.f32 %v4488_v36, %v4485_v34 }
0x25e7   :  { %v3193_v39 = vpop.permute.xlu1 %3192 }
0x25e8   :  { %11664 = vtanh.f32 %v4489_v37  ;;  %3195 = vst.msk [vmem:[#allocation3] sm:$0x30] %vm1002_vm6, %v3193_v39  ;;  %4491 = vrot.lane.b32.xlu1 %v4489_v37, %s11980_s29 }
0x25eb   :  { %v3968_v40 = vpop.permute.xlu1 %3967 }
0x25ec   :  { %3970 = vst.msk [vmem:[#allocation3 + $0x8] sm:$0xc] %vm739_vm4, %v3968_v40 }
0x25ef   :  { %v4500_v46 = vld [vmem:[#allocation3] sm:$0xff] }
0x25f0   :  { %10312 = vmatprep.mubr.msk.f32.mxu0 %vm222_vm3, %v4500_v46 }
0x25f2   :  { %v11665_v48 = vpop.eup %11664 }
0x25f3   :  { %v4498_v53 = vmul.f32 %v11665_v48, %v4497_v50 }
0x25f5   :  { %v12785_v58 = vadd.f32 %v4498_v53, %v2307_v54 }
0x2652   :  { %v4679_v26 = vpop.f32.mrb[50].mxu1 }
0x2653   :  { %v10325_v60 = vpop.f32.mrb[51].mxu1 }
0x265a   :  { %v4492_v59 = vpop.permute.xlu1 %4491  ;;  %v4825_v62 = vpop.f32.mrb[52].mxu1 }
0x265b   :  { %4494 = vst.msk [vmem:[#allocation3 + $0x8] sm:$0xc0] %vm1265_vm5, %v4492_v59  ;;  %v10347_v63 = vpop.f32.mrb[53].mxu1  ;;  %v4826_v21 = vadd.f32 %v12822_v8, %v4825_v62 }
0x2662   :  { %v4501_v4 = vld [vmem:[#allocation3 + $0x8] sm:$0xff] }
0x2663   :  { %10313 = vmatmul.mubr.msk.f32.vlgmr.msra.gmra.mrb[50].mxu0 %vm222_vm3, %v4501_v4 }
0x2664   :  { %11188 = vmatpush3.bf16.msra.mxu0 %v12782_v38  ;;  %10334 = vmatprep.mubr.msk.f32.mxu0 %vm11976_vm1, %v11977_v11 }
0x2665   :  { %11189 = vmatprep.subr.bf16.mxu0 %v11975_v3 }
0x2668   :  { %11191 = vmatpush3.bf16.msra.mxu0 %v12791_v23 }
0x2669   :  { %11198 = vmatprep.subr.bf16.mxu0 %v11975_v3 }
0x266b   :  { %10335 = vmatmul.mubr.f32.vlgmr.msra.gmra.mrb[52].mxu0 %v11977_v11 }
0x266c   :  { %11200 = vmatpush3.bf16.msra.mxu0 %v12756_v28  ;;  %10356 = vmatprep.mubr.msk.f32.mxu0 %vm11976_vm1, %v11977_v11 }
0x266d   :  { %11201 = vmatprep.subr.bf16.mxu0 %v11975_v3 }
0x2670   :  { %11203 = vmatpush3.bf16.msra.mxu0 %v12759_v29 }
0x2671   :  { %11210 = vmatprep.subr.bf16.mxu0 %v11975_v3 }
0x2736   :  { %v10314_v0 = vpop.f32.mrb[50].mxu0 }
0x2737   :  { %v12813_v9 = vadd.f32 %v10314_v0, %v9154_v45  ;;  %v4587_v5 = vpop.f32.mrb[51].mxu0 }
0x2738   :  { %v12815_v1 = vadd.f32 %v9154_v45, %v4587_v5 }
0x273a   :  { %v4829_v49 = vadd.f32 %v4679_v26, %v12815_v1 }
0x273c   :  { %v9159_v15 = vmul.f32 -1.442695, %v4829_v49 }
0x273e   :  { %11666 = vpow2.f32 %v9159_v15  ;;  %v4749_v61 = vpop.f32.mrb[52].mxu0 }
0x273f   :  { %4837 = vrot.lane.b32.xlu1 %v4749_v61, %s11979_s27  ;;  %v10336_v57 = vpop.f32.mrb[53].mxu0 }
0x2748   :  { %v11667_v25 = vpop.eup %11666 }
0x2749   :  { %v4833_v52 = vadd.f32 1.0, %v11667_v25 }
0x274b   :  { %11668 = vrcp.f32 %v4833_v52 }
0x2755   :  { %v11669_v2 = vpop.eup %11668 }
0x2756   :  { %v4847_v10 = vmul.f32 %v11669_v2, %v4826_v21 }
0x2758   :  { %4849 = vrot.lane.b32.xlu0 %v4847_v10, %s11978_s23 }
0x27b1   :  { %v4838_v17 = vpop.permute.xlu1 %4837 }
0x27b2   :  { %v4840_v19 = vadd.f32 %v4838_v17, %v12815_v1 }
0x27b4   :  { %v9160_v6 = vmul.f32 -1.442695, %v4840_v19 }
0x27ca   :  { %v4850_v12 = vpop.permute.xlu0 %4849 }
0x27cb   :  { %v4852_v14 = vadd.f32 %v4850_v12, %v12815_v1 }
0x27cd   :  { %11670 = vtanh.f32 %v4852_v14 }
0x27ce   :  { %11672 = vpow2.f32 %v9160_v6 }
0x27d7   :  { %v11671_v16 = vpop.eup %11670 }
0x27d8   :  { %4856 = vrot.lane.b32.xlu0 %v11671_v16, %s11980_s29  ;;  %v11673_v20 = vpop.eup %11672 }
0x27d9   :  { %v4844_v31 = vadd.f32 1.0, %v11673_v20 }
0x27db   :  { %11674 = vrcp.f32 %v4844_v31 }
0x27e5   :  { %v11675_v24 = vpop.eup %11674 }
0x27e6   :  { %v4854_v7 = vsub.f32 1.0, %v11675_v24  ;;  %v4860_v30 = vmul.f32 0.0, %v11675_v24 }
0x284a   :  { %v4857_v44 = vpop.permute.xlu0 %4856 }
0x284b   :  { %v4859_v35 = vmul.f32 %v4857_v44, %v4854_v7 }
0x284d   :  { %v4861_v32 = vadd.f32 %v4860_v30, %v4859_v35 }
0x284f   :  { %4863 = vrot.lane.b32.xlu1 %v4861_v32, %s11980_s29  ;;  %v5117_v45 = vrot.slane %v4861_v32, 6 }
0x28c1   :  { %v4864_v34 = vpop.permute.xlu1 %4863 }
0x28c2   :  { %4866 = vst.msk [vmem:[#allocation2] sm:$0x3] %vm479_vm2, %v4864_v34  ;;  %10357 = vmatmul.mubr.msk.f32.vlgmr.msra.gmra.mrb[54].mxu0 %vm222_vm3, %v4864_v34  ;;  %10368 = vmatmul.mubr.msk.f32.vlgmr.msra.gmra.mrb[54].mxu1 %vm222_vm3, %v4864_v34 }
0x28c3   :  { %11212 = vmatpush3.bf16.msra.mxu0 %v12773_v13  ;;  %10378 = vmatprep.mubr.msk.f32.mxu0 %vm11976_vm1, %v11977_v11 }
0x28c4   :  { %11213 = vmatprep.subr.bf16.mxu0 %v11975_v3  ;;  %11218 = vmatpush3.bf16.msra.mxu1 %v12756_v28 }
0x28c5   :  { %11219 = vmatprep.subr.bf16.mxu1 %v11975_v3  ;;  %10389 = vmatprep.mubr.msk.f32.mxu1 %vm11976_vm1, %v11977_v11 }
0x28c7   :  { %11215 = vmatpush3.bf16.msra.mxu0 %v12776_v22 }
0x28c8   :  { %11222 = vmatprep.subr.bf16.mxu0 %v11975_v3  ;;  %11221 = vmatpush3.bf16.msra.mxu1 %v12759_v29 }
0x28c9   :  { %11228 = vmatprep.subr.bf16.mxu1 %v11975_v3 }
0x28ca   :  { %10379 = vmatmul.mubr.msk.f32.vlgmr.msra.gmra.mrb[56].mxu0 %vm222_vm3, %v4864_v34 }
0x28cb   :  { %11224 = vmatpush3.bf16.msra.mxu0 %v12782_v38  ;;  %10400 = vmatprep.mubr.msk.f32.mxu0 %vm11976_vm1, %v11977_v11 }
0x28cc   :  { %11225 = vmatprep.subr.bf16.mxu0 %v11975_v3 }
0x28cf   :  { %11227 = vmatpush3.bf16.msra.mxu0 %v12791_v23 }
0x28d0   :  { %11234 = vmatprep.subr.bf16.mxu0 %v11975_v3 }
0x2995   :  { %v4935_v36 = vpop.f32.mrb[54].mxu0  ;;  %v5005_v37 = vpop.f32.mrb[54].mxu1 }
0x2996   :  { %v5080_v39 = vrot.slane %v4935_v36, 6  ;;  %v5090_v40 = vrot.slane %v5005_v37, 6  ;;  %v10358_v41 = vpop.f32.mrb[55].mxu0  ;;  %v10369_v42 = vpop.f32.mrb[55].mxu1 }
0x2998   :  { %v5082_v18 = vadd.f32 %v5080_v39, %v12815_v1  ;;  %5091 = vrot.lane.b32.xlu1 %v5090_v40, %s11979_s27 }
0x299a   :  { %v9164_v43 = vmul.f32 -1.442695, %v5082_v18 }
0x299c   :  { %11676 = vpow2.f32 %v9164_v43 }
0x299d   :  { %v5075_v46 = vpop.f32.mrb[56].mxu0 }
0x299e   :  { %v10380_v47 = vpop.f32.mrb[57].mxu0  ;;  %v5076_v51 = vadd.f32 %v12822_v8, %v5075_v46 }
0x29a0   :  { %v5102_v33 = vrot.slane %v5076_v51, 6 }
0x29a6   :  { %v11677_v50 = vpop.eup %11676 }
0x29a7   :  { %v5086_v27 = vadd.f32 1.0, %v11677_v50 }
0x29a9   :  { %11678 = vrcp.f32 %v5086_v27 }
0x29b3   :  { %v11679_v48 = vpop.eup %11678 }
0x29b4   :  { %v5104_v53 = vmul.f32 %v11679_v48, %v5102_v33 }
0x29b6   :  { %5106 = vrot.lane.b32.xlu0 %v5104_v53, %s11978_s23 }
0x2a0a   :  { %v5092_v59 = vpop.permute.xlu1 %5091 }
0x2a0b   :  { %v5094_v4 = vadd.f32 %v5092_v59, %v12815_v1 }
0x2a0d   :  { %v9165_v26 = vmul.f32 -1.442695, %v5094_v4 }
0x2a28   :  { %v5107_v54 = vpop.permute.xlu0 %5106 }
0x2a29   :  { %v5109_v55 = vadd.f32 %v5107_v54, %v12815_v1 }
0x2a2b   :  { %11680 = vtanh.f32 %v5109_v55 }
0x2a2c   :  { %11682 = vpow2.f32 %v9165_v26 }
0x2a35   :  { %v11681_v56 = vpop.eup %11680 }
0x2a36   :  { %5113 = vrot.lane.b32.xlu0 %v11681_v56, %s11980_s29  ;;  %v11683_v60 = vpop.eup %11682 }
0x2a37   :  { %v5098_v62 = vadd.f32 1.0, %v11683_v60 }
0x2a39   :  { %11684 = vrcp.f32 %v5098_v62 }
0x2a43   :  { %v11685_v63 = vpop.eup %11684 }
0x2a44   :  { %v5111_v0 = vsub.f32 1.0, %v11685_v63  ;;  %v5119_v15 = vmul.f32 %v11685_v63, %v5117_v45 }
0x2aa8   :  { %v5114_v5 = vpop.permute.xlu0 %5113 }
0x2aa9   :  { %v5116_v49 = vmul.f32 %v5114_v5, %v5111_v0 }
0x2aab   :  { %v12859_v61 = vadd.f32 %v5119_v15, %v5116_v49 }
0x2aad   :  { %v5126_v57 = vrot.slane %v12859_v61, 2  ;;  %v5379_v43 = vrot.slane %v12859_v61, 6 }
0x2aaf   :  { %5127 = vrot.lane.b32.xlu1 %v5126_v57, %s11980_s29 }
0x2b21   :  { %v5128_v25 = vpop.permute.xlu1 %5127 }
0x2b22   :  { %10390 = vmatmul.mubr.msk.f32.vlgmr.msra.gmra.mrb[56].mxu1 %vm222_vm3, %v5128_v25  ;;  %10401 = vmatmul.mubr.msk.f32.vlgmr.msra.gmra.mrb[58].mxu0 %vm222_vm3, %v5128_v25 }
0x2b23   :  { %11230 = vmatpush3.bf16.msra.mxu1 %v12773_v13  ;;  %10411 = vmatprep.mubr.msk.f32.mxu1 %vm11976_vm1, %v11977_v11 }
0x2b24   :  { %11231 = vmatprep.subr.bf16.mxu1 %v11975_v3  ;;  %11236 = vmatpush3.bf16.msra.mxu0 %v12756_v28 }
0x2b25   :  { %11237 = vmatprep.subr.bf16.mxu0 %v11975_v3  ;;  %10422 = vmatprep.mubr.msk.f32.mxu0 %vm11976_vm1, %v11977_v11 }
0x2b27   :  { %11233 = vmatpush3.bf16.msra.mxu1 %v12776_v22 }
0x2b28   :  { %11240 = vmatprep.subr.bf16.mxu1 %v11975_v3  ;;  %11239 = vmatpush3.bf16.msra.mxu0 %v12759_v29 }
0x2b29   :  { %11246 = vmatprep.subr.bf16.mxu0 %v11975_v3 }
0x2b2a   :  { %10412 = vmatmul.mubr.msk.f32.vlgmr.msra.gmra.mrb[58].mxu1 %vm222_vm3, %v5128_v25 }
0x2b2b   :  { %11242 = vmatpush3.bf16.msra.mxu1 %v12782_v38  ;;  %10433 = vmatprep.mubr.msk.f32.mxu1 %vm11976_vm1, %v11977_v11 }
0x2b2c   :  { %11243 = vmatprep.subr.bf16.mxu1 %v11975_v3 }
0x2b2f   :  { %11245 = vmatpush3.bf16.msra.mxu1 %v12791_v23 }
0x2b30   :  { %11252 = vmatprep.subr.bf16.mxu1 %v11975_v3 }
0x2bf5   :  { %v5197_v52 = vpop.f32.mrb[56].mxu1  ;;  %v5267_v21 = vpop.f32.mrb[58].mxu0 }
0x2bf6   :  { %v5342_v2 = vrot.slane %v5197_v52, 4  ;;  %v5352_v10 = vrot.slane %v5267_v21, 4  ;;  %v10391_v12 = vpop.f32.mrb[57].mxu1  ;;  %v10402_v14 = vpop.f32.mrb[59].mxu0 }
0x2bf8   :  { %v5344_v16 = vadd.f32 %v5342_v2, %v12815_v1  ;;  %5353 = vrot.lane.b32.xlu1 %v5352_v10, %s11979_s27 }
0x2bfa   :  { %v9169_v17 = vmul.f32 -1.442695, %v5344_v16 }
0x2bfc   :  { %11686 = vpow2.f32 %v9169_v17 }
0x2bfd   :  { %v5337_v19 = vpop.f32.mrb[58].mxu1 }
0x2bfe   :  { %v10413_v6 = vpop.f32.mrb[59].mxu1  ;;  %v5338_v24 = vadd.f32 %v12822_v8, %v5337_v19 }
0x2c00   :  { %v5364_v7 = vrot.slane %v5338_v24, 4 }
0x2c06   :  { %v11687_v20 = vpop.eup %11686 }
0x2c07   :  { %v5348_v31 = vadd.f32 1.0, %v11687_v20 }
0x2c09   :  { %11688 = vrcp.f32 %v5348_v31 }
0x2c13   :  { %v11689_v44 = vpop.eup %11688 }
0x2c14   :  { %v5366_v30 = vmul.f32 %v11689_v44, %v5364_v7 }
0x2c16   :  { %5368 = vrot.lane.b32.xlu0 %v5366_v30, %s11978_s23 }
0x2c6a   :  { %v5354_v36 = vpop.permute.xlu1 %5353 }
0x2c6b   :  { %v5356_v37 = vadd.f32 %v5354_v36, %v12815_v1 }
0x2c6d   :  { %v9170_v39 = vmul.f32 -1.442695, %v5356_v37 }
0x2c88   :  { %v5369_v35 = vpop.permute.xlu0 %5368 }
0x2c89   :  { %v5371_v32 = vadd.f32 %v5369_v35, %v12815_v1 }
0x2c8b   :  { %11690 = vtanh.f32 %v5371_v32 }
0x2c8c   :  { %11692 = vpow2.f32 %v9170_v39 }
0x2c95   :  { %v11691_v34 = vpop.eup %11690 }
0x2c96   :  { %5375 = vrot.lane.b32.xlu0 %v11691_v34, %s11980_s29  ;;  %v11693_v40 = vpop.eup %11692 }
0x2c97   :  { %v5360_v41 = vadd.f32 1.0, %v11693_v40 }
0x2c99   :  { %11694 = vrcp.f32 %v5360_v41 }
0x2ca3   :  { %v11695_v42 = vpop.eup %11694 }
0x2ca4   :  { %v5373_v18 = vsub.f32 1.0, %v11695_v42  ;;  %v5381_v47 = vmul.f32 %v11695_v42, %v5379_v43 }
0x2d08   :  { %v5376_v46 = vpop.permute.xlu0 %5375 }
0x2d09   :  { %v5378_v50 = vmul.f32 %v5376_v46, %v5373_v18 }
0x2d0b   :  { %v12892_v27 = vadd.f32 %v5381_v47, %v5378_v50 }
0x2d0d   :  { %v5388_v51 = vrot.slane %v12892_v27, 4  ;;  %v5641_v17 = vrot.slane %v12892_v27, 6 }
0x2d0f   :  { %5389 = vrot.lane.b32.xlu1 %v5388_v51, %s11980_s29 }
0x2d81   :  { %v5390_v33 = vpop.permute.xlu1 %5389 }
0x2d82   :  { %10423 = vmatmul.mubr.msk.f32.vlgmr.msra.gmra.mrb[60].mxu0 %vm222_vm3, %v5390_v33  ;;  %10434 = vmatmul.mubr.msk.f32.vlgmr.msra.gmra.mrb[60].mxu1 %vm222_vm3, %v5390_v33 }
0x2d83   :  { %11248 = vmatpush3.bf16.msra.mxu0 %v12773_v13  ;;  %10444 = vmatprep.mubr.msk.f32.mxu0 %vm11976_vm1, %v11977_v11 }
0x2d84   :  { %11249 = vmatprep.subr.bf16.mxu0 %v11975_v3  ;;  %11254 = vmatpush3.bf16.msra.mxu1 %v12756_v28 }
0x2d85   :  { %11255 = vmatprep.subr.bf16.mxu1 %v11975_v3  ;;  %10455 = vmatprep.mubr.msk.f32.mxu1 %vm11976_vm1, %v11977_v11 }
0x2d87   :  { %11251 = vmatpush3.bf16.msra.mxu0 %v12776_v22 }
0x2d88   :  { %11258 = vmatprep.subr.bf16.mxu0 %v11975_v3  ;;  %11257 = vmatpush3.bf16.msra.mxu1 %v12759_v29 }
0x2d89   :  { %11264 = vmatprep.subr.bf16.mxu1 %v11975_v3 }
0x2d8a   :  { %10445 = vmatmul.mubr.msk.f32.vlgmr.msra.gmra.mrb[62].mxu0 %vm222_vm3, %v5390_v33 }
0x2d8b   :  { %11260 = vmatpush3.bf16.msra.mxu0 %v12782_v38  ;;  %10466 = vmatprep.mubr.msk.f32.mxu0 %vm11976_vm1, %v11977_v11 }
0x2d8c   :  { %11261 = vmatprep.subr.bf16.mxu0 %v11975_v3 }
0x2d8f   :  { %11263 = vmatpush3.bf16.msra.mxu0 %v12791_v23 }
0x2d90   :  { %11270 = vmatprep.subr.bf16.mxu0 %v11975_v3 }
0x2e55   :  { %v5459_v48 = vpop.f32.mrb[60].mxu0  ;;  %v5529_v53 = vpop.f32.mrb[60].mxu1 }
0x2e56   :  { %v5604_v54 = vrot.slane %v5459_v48, 2  ;;  %v5614_v55 = vrot.slane %v5529_v53, 2  ;;  %v10424_v56 = vpop.f32.mrb[61].mxu0  ;;  %v10435_v59 = vpop.f32.mrb[61].mxu1 }
0x2e58   :  { %v5606_v4 = vadd.f32 %v5604_v54, %v12815_v1  ;;  %5615 = vrot.lane.b32.xlu1 %v5614_v55, %s11979_s27 }
0x2e5a   :  { %v9174_v26 = vmul.f32 -1.442695, %v5606_v4 }
0x2e5c   :  { %11696 = vpow2.f32 %v9174_v26 }
0x2e5d   :  { %v5599_v60 = vpop.f32.mrb[62].mxu0 }
0x2e5e   :  { %v10446_v62 = vpop.f32.mrb[63].mxu0  ;;  %v5600_v0 = vadd.f32 %v12822_v8, %v5599_v60 }
0x2e60   :  { %v5626_v5 = vrot.slane %v5600_v0, 2 }
0x2e66   :  { %v11697_v63 = vpop.eup %11696 }
0x2e67   :  { %v5610_v45 = vadd.f32 1.0, %v11697_v63 }
0x2e69   :  { %11698 = vrcp.f32 %v5610_v45 }
0x2e73   :  { %v11699_v49 = vpop.eup %11698 }
0x2e74   :  { %v5628_v15 = vmul.f32 %v11699_v49, %v5626_v5 }
0x2e76   :  { %5630 = vrot.lane.b32.xlu0 %v5628_v15, %s11978_s23 }
0x2eca   :  { %v5616_v21 = vpop.permute.xlu1 %5615 }
0x2ecb   :  { %v5618_v2 = vadd.f32 %v5616_v21, %v12815_v1 }
0x2ecd   :  { %v9175_v10 = vmul.f32 -1.442695, %v5618_v2 }
0x2ee8   :  { %v5631_v57 = vpop.permute.xlu0 %5630 }
0x2ee9   :  { %v5633_v25 = vadd.f32 %v5631_v57, %v12815_v1 }
0x2eeb   :  { %11700 = vtanh.f32 %v5633_v25 }
0x2eec   :  { %11702 = vpow2.f32 %v9175_v10 }
0x2ef5   :  { %v11701_v52 = vpop.eup %11700 }
0x2ef6   :  { %5637 = vrot.lane.b32.xlu0 %v11701_v52, %s11980_s29  ;;  %v11703_v12 = vpop.eup %11702 }
0x2ef7   :  { %v5622_v14 = vadd.f32 1.0, %v11703_v12 }
0x2ef9   :  { %11704 = vrcp.f32 %v5622_v14 }
0x2f03   :  { %v11705_v16 = vpop.eup %11704 }
0x2f04   :  { %v5635_v19 = vsub.f32 1.0, %v11705_v16  ;;  %v5643_v31 = vmul.f32 %v11705_v16, %v5641_v17 }
0x2f68   :  { %v5638_v6 = vpop.permute.xlu0 %5637 }
0x2f69   :  { %v5640_v20 = vmul.f32 %v5638_v6, %v5635_v19 }
0x2f6b   :  { %v12925_v24 = vadd.f32 %v5643_v31, %v5640_v20 }
0x2f6d   :  { %v5650_v7 = vrot.slane %v12925_v24, 6 }
0x2f6f   :  { %5651 = vrot.lane.b32.xlu1 %v5650_v7, %s11980_s29 }
0x2fe1   :  { %v5652_v44 = vpop.permute.xlu1 %5651 }
0x2fe2   :  { %10456 = vmatmul.mubr.msk.f32.vlgmr.msra.gmra.mrb[62].mxu1 %vm222_vm3, %v5652_v44  ;;  %10467 = vmatmul.mubr.msk.f32.vlgmr.msra.gmra.mrb[64].mxu0 %vm222_vm3, %v5652_v44 }
0x2fe3   :  { %11266 = vmatpush3.bf16.msra.mxu1 %v12773_v13  ;;  %10477 = vmatprep.mubr.msk.f32.mxu1 %vm11976_vm1, %v11977_v11 }
0x2fe4   :  { %11267 = vmatprep.subr.bf16.mxu1 %v11975_v3  ;;  %11272 = vmatpush3.bf16.msra.mxu0 %v12756_v28 }
0x2fe5   :  { %11273 = vmatprep.subr.bf16.mxu0 %v11975_v3  ;;  %10488 = vmatprep.mubr.msk.f32.mxu0 %vm11976_vm1, %v11977_v11 }
0x2fe7   :  { %11269 = vmatpush3.bf16.msra.mxu1 %v12776_v22 }
0x2fe8   :  { %11276 = vmatprep.subr.bf16.mxu1 %v11975_v3  ;;  %11275 = vmatpush3.bf16.msra.mxu0 %v12759_v29 }
0x2fe9   :  { %11282 = vmatprep.subr.bf16.mxu0 %v11975_v3 }
0x2fea   :  { %10478 = vmatmul.mubr.msk.f32.vlgmr.msra.gmra.mrb[64].mxu1 %vm222_vm3, %v5652_v44 }
0x2feb   :  { %11278 = vmatpush3.bf16.msra.mxu1 %v12782_v38  ;;  %10499 = vmatprep.mubr.msk.f32.mxu1 %vm11976_vm1, %v11977_v11 }
0x2fec   :  { %11279 = vmatprep.subr.bf16.mxu1 %v11975_v3 }
0x2fef   :  { %11281 = vmatpush3.bf16.msra.mxu1 %v12791_v23 }
0x2ff0   :  { %11288 = vmatprep.subr.bf16.mxu1 %v11975_v3 }
0x30b5   :  { %v5721_v1 = vpop.f32.mrb[62].mxu1  ;;  %v5791_v30 = vpop.f32.mrb[64].mxu0 }
0x30b6   :  { %v5865_v35 = vadd.f32 %v5721_v1, %v12813_v9  ;;  %5873 = vrot.lane.b32.xlu1 %v5791_v30, %s11979_s27  ;;  %v10457_v32 = vpop.f32.mrb[63].mxu1  ;;  %v10468_v34 = vpop.f32.mrb[65].mxu0 }
0x30b8   :  { %v9179_v36 = vmul.f32 -1.442695, %v5865_v35 }
0x30ba   :  { %11706 = vpow2.f32 %v9179_v36 }
0x30bd   :  { %v5861_v37 = vpop.f32.mrb[64].mxu1 }
0x30be   :  { %v10479_v39 = vpop.f32.mrb[65].mxu1  ;;  %v5862_v42 = vadd.f32 %v12822_v8, %v5861_v37 }
0x30c4   :  { %v11707_v40 = vpop.eup %11706 }
0x30c5   :  { %v5869_v41 = vadd.f32 1.0, %v11707_v40 }
0x30c7   :  { %11708 = vrcp.f32 %v5869_v41 }
0x30d1   :  { %v11709_v18 = vpop.eup %11708 }
0x30d2   :  { %v5883_v43 = vmul.f32 %v11709_v18, %v5862_v42 }
0x30d4   :  { %5885 = vrot.lane.b32.xlu0 %v5883_v43, %s11978_s23 }
0x3128   :  { %v5874_v51 = vpop.permute.xlu1 %5873 }
0x3129   :  { %v5876_v33 = vadd.f32 %v5874_v51, %v12813_v9 }
0x312b   :  { %v9180_v48 = vmul.f32 -1.442695, %v5876_v33 }
0x3146   :  { %v5886_v46 = vpop.permute.xlu0 %5885 }
0x3147   :  { %v5888_v47 = vadd.f32 %v5886_v46, %v12813_v9 }
0x3149   :  { %11710 = vtanh.f32 %v5888_v47 }
0x314a   :  { %11712 = vpow2.f32 %v9180_v48 }
0x3153   :  { %v11711_v50 = vpop.eup %11710 }
0x3154   :  { %5892 = vrot.lane.b32.xlu0 %v11711_v50, %s11980_s29  ;;  %v11713_v53 = vpop.eup %11712 }
0x3155   :  { %v5880_v54 = vadd.f32 1.0, %v11713_v53 }
0x3157   :  { %11714 = vrcp.f32 %v5880_v54 }
0x3161   :  { %v11715_v55 = vpop.eup %11714 }
0x3162   :  { %v5890_v56 = vsub.f32 1.0, %v11715_v55  ;;  %v5897_v4 = vmul.f32 %v11715_v55, %v5650_v7 }
0x31c6   :  { %v5893_v59 = vpop.permute.xlu0 %5892 }
0x31c7   :  { %v5895_v26 = vmul.f32 %v5893_v59, %v5890_v56 }
0x31c9   :  { %v5898_v60 = vadd.f32 %v5897_v4, %v5895_v26 }
0x31cb   :  { %5900 = vrot.lane.b32.xlu1 %v5898_v60, %s11980_s29  ;;  %v6154_v32 = vrot.slane %v5898_v60, 6 }
0x323d   :  { %v5901_v62 = vpop.permute.xlu1 %5900 }
0x323e   :  { %5903 = vst.msk [vmem:[#allocation2 + $0x8] sm:$0x3] %vm479_vm2, %v5901_v62  ;;  %10489 = vmatmul.mubr.msk.f32.vlgmr.msra.gmra.mrb[66].mxu0 %vm222_vm3, %v5901_v62  ;;  %10500 = vmatmul.mubr.msk.f32.vlgmr.msra.gmra.mrb[66].mxu1 %vm222_vm3, %v5901_v62 }
0x323f   :  { %11284 = vmatpush3.bf16.msra.mxu0 %v12773_v13  ;;  %10510 = vmatprep.mubr.msk.f32.mxu0 %vm11976_vm1, %v11977_v11 }
0x3240   :  { %11285 = vmatprep.subr.bf16.mxu0 %v11975_v3  ;;  %11290 = vmatpush3.bf16.msra.mxu1 %v12756_v28 }
0x3241   :  { %11291 = vmatprep.subr.bf16.mxu1 %v11975_v3  ;;  %10521 = vmatprep.mubr.msk.f32.mxu1 %vm11976_vm1, %v11977_v11 }
0x3243   :  { %11287 = vmatpush3.bf16.msra.mxu0 %v12776_v22 }
0x3244   :  { %11294 = vmatprep.subr.bf16.mxu0 %v11975_v3  ;;  %11293 = vmatpush3.bf16.msra.mxu1 %v12759_v29 }
0x3245   :  { %11300 = vmatprep.subr.bf16.mxu1 %v11975_v3 }
0x3246   :  { %10511 = vmatmul.mubr.msk.f32.vlgmr.msra.gmra.mrb[68].mxu0 %vm222_vm3, %v5901_v62 }
0x3247   :  { %11296 = vmatpush3.bf16.msra.mxu0 %v12782_v38  ;;  %10532 = vmatprep.mubr.msk.f32.mxu0 %vm11976_vm1, %v11977_v11 }
0x3248   :  { %11297 = vmatprep.subr.bf16.mxu0 %v11975_v3 }
0x324b   :  { %11299 = vmatpush3.bf16.msra.mxu0 %v12791_v23 }
0x324c   :  { %11306 = vmatprep.subr.bf16.mxu0 %v11975_v3 }
0x3311   :  { %v5972_v63 = vpop.f32.mrb[66].mxu0  ;;  %v6042_v45 = vpop.f32.mrb[66].mxu1 }
0x3312   :  { %v6117_v0 = vrot.slane %v5972_v63, 6  ;;  %v6127_v5 = vrot.slane %v6042_v45, 6  ;;  %v10490_v49 = vpop.f32.mrb[67].mxu0  ;;  %v10501_v15 = vpop.f32.mrb[67].mxu1 }
0x3314   :  { %v6119_v57 = vadd.f32 %v6117_v0, %v12813_v9  ;;  %6128 = vrot.lane.b32.xlu1 %v6127_v5, %s11979_s27 }
0x3316   :  { %v9184_v25 = vmul.f32 -1.442695, %v6119_v57 }
0x3318   :  { %11716 = vpow2.f32 %v9184_v25 }
0x3319   :  { %v6112_v52 = vpop.f32.mrb[68].mxu0 }
0x331a   :  { %v10512_v21 = vpop.f32.mrb[69].mxu0  ;;  %v6113_v12 = vadd.f32 %v12822_v8, %v6112_v52 }
0x331c   :  { %v6139_v14 = vrot.slane %v6113_v12, 6 }
0x3322   :  { %v11717_v2 = vpop.eup %11716 }
0x3323   :  { %v6123_v10 = vadd.f32 1.0, %v11717_v2 }
0x3325   :  { %11718 = vrcp.f32 %v6123_v10 }
0x332f   :  { %v11719_v16 = vpop.eup %11718 }
0x3330   :  { %v6141_v17 = vmul.f32 %v11719_v16, %v6139_v14 }
0x3332   :  { %6143 = vrot.lane.b32.xlu0 %v6141_v17, %s11978_s23 }
0x3386   :  { %v6129_v31 = vpop.permute.xlu1 %6128 }
0x3387   :  { %v6131_v7 = vadd.f32 %v6129_v31, %v12813_v9 }
0x3389   :  { %v9185_v44 = vmul.f32 -1.442695, %v6131_v7 }
0x33a4   :  { %v6144_v19 = vpop.permute.xlu0 %6143 }
0x33a5   :  { %v6146_v6 = vadd.f32 %v6144_v19, %v12813_v9 }
0x33a7   :  { %11720 = vtanh.f32 %v6146_v6 }
0x33a8   :  { %11722 = vpow2.f32 %v9185_v44 }
0x33b1   :  { %v11721_v20 = vpop.eup %11720 }
0x33b2   :  { %6150 = vrot.lane.b32.xlu0 %v11721_v20, %s11980_s29  ;;  %v11723_v1 = vpop.eup %11722 }
0x33b3   :  { %v6135_v30 = vadd.f32 1.0, %v11723_v1 }
0x33b5   :  { %11724 = vrcp.f32 %v6135_v30 }
0x33bf   :  { %v11725_v35 = vpop.eup %11724 }
0x33c0   :  { %v6148_v34 = vsub.f32 1.0, %v11725_v35  ;;  %v6156_v39 = vmul.f32 %v11725_v35, %v6154_v32 }
0x3424   :  { %v6151_v36 = vpop.permute.xlu0 %6150 }
0x3425   :  { %v6153_v37 = vmul.f32 %v6151_v36, %v6148_v34 }
0x3427   :  { %v12987_v40 = vadd.f32 %v6156_v39, %v6153_v37 }
0x3429   :  { %v6163_v41 = vrot.slane %v12987_v40, 2  ;;  %v6416_v15 = vrot.slane %v12987_v40, 6 }
0x342b   :  { %6164 = vrot.lane.b32.xlu1 %v6163_v41, %s11980_s29  ;;  %v9197_v41 = vld [vmem:[%s13378_s2 + $0x40] sm:$0xff] }
0x349d   :  { %v6165_v42 = vpop.permute.xlu1 %6164 }
0x349e   :  { %10522 = vmatmul.mubr.msk.f32.vlgmr.msra.gmra.mrb[68].mxu1 %vm222_vm3, %v6165_v42  ;;  %10533 = vmatmul.mubr.msk.f32.vlgmr.msra.gmra.mrb[70].mxu0 %vm222_vm3, %v6165_v42 }
0x349f   :  { %11302 = vmatpush3.bf16.msra.mxu1 %v12773_v13  ;;  %10543 = vmatprep.mubr.msk.f32.mxu1 %vm11976_vm1, %v11977_v11 }
0x34a0   :  { %11303 = vmatprep.subr.bf16.mxu1 %v11975_v3  ;;  %11308 = vmatpush3.bf16.msra.mxu0 %v12756_v28 }
0x34a1   :  { %11309 = vmatprep.subr.bf16.mxu0 %v11975_v3  ;;  %10554 = vmatprep.mubr.msk.f32.mxu0 %vm11976_vm1, %v11977_v11 }
0x34a3   :  { %11305 = vmatpush3.bf16.msra.mxu1 %v12776_v22 }
0x34a4   :  { %11312 = vmatprep.subr.bf16.mxu1 %v11975_v3  ;;  %11311 = vmatpush3.bf16.msra.mxu0 %v12759_v29 }
0x34a5   :  { %11318 = vmatprep.subr.bf16.mxu0 %v11975_v3 }
0x34a6   :  { %10544 = vmatmul.mubr.msk.f32.vlgmr.msra.gmra.mrb[70].mxu1 %vm222_vm3, %v6165_v42  ;;  %v9198_v42 = vld [vmem:[%s13378_s2 + $0x48] sm:$0xff] }
0x34a7   :  { %11314 = vmatpush3.bf16.msra.mxu1 %v12782_v38  ;;  %10565 = vmatprep.mubr.msk.f32.mxu1 %vm11976_vm1, %v11977_v11 }
0x34a8   :  { %11315 = vmatprep.subr.bf16.mxu1 %v11975_v3 }
0x34ab   :  { %11317 = vmatpush3.bf16.msra.mxu1 %v12791_v23 }
0x3571   :  { %v6234_v28 = vpop.f32.mrb[68].mxu1  ;;  %v6304_v18 = vpop.f32.mrb[70].mxu0 }
0x3572   :  { %v6379_v43 = vrot.slane %v6234_v28, 4  ;;  %v6389_v46 = vrot.slane %v6304_v18, 4  ;;  %v10523_v47 = vpop.f32.mrb[69].mxu1  ;;  %v10534_v50 = vpop.f32.mrb[71].mxu0  ;;  %v11324_v28 = vpack.c.bf16 %v9198_v42, %v9197_v41 }
0x3573   :  { %v9199_v50 = vld [vmem:[%s13378_s2 + $0x50] sm:$0xff] }
0x3574   :  { %v6381_v29 = vadd.f32 %v6379_v43, %v12813_v9  ;;  %6390 = vrot.lane.b32.xlu1 %v6389_v46, %s11979_s27  ;;  %11325 = vmatprep.subr.bf16.mxu1 %v11324_v28 }
0x3576   :  { %v9189_v51 = vmul.f32 -1.442695, %v6381_v29  ;;  %v9200_v29 = vld [vmem:[%s13378_s2 + $0x58] sm:$0xff]  ;;  %s9196_s2 = sld [smem:[#allocation14 + $0x2]] }
0x3578   :  { %11726 = vpow2.f32 %v9189_v51  ;;  %v6789_v51 = vld [vmem:[#allocation5 + $0x60] sm:$0xff] }
0x3579   :  { %v6374_v38 = vpop.f32.mrb[70].mxu1 }
0x357a   :  { %v10545_v33 = vpop.f32.mrb[71].mxu1  ;;  %v6375_v54 = vadd.f32 %v12822_v8, %v6374_v38  ;;  %v6790_v38 = vld [vmem:[#allocation5 + $0x68] sm:$0xff] }
0x357b   :  { %v6791_v33 = vld [vmem:[#allocation5 + $0x70] sm:$0xff] }
0x357c   :  { %v6401_v23 = vrot.slane %v6375_v54, 4 }
0x3582   :  { %v11727_v48 = vpop.eup %11726 }
0x3583   :  { %v6385_v53 = vadd.f32 1.0, %v11727_v48  ;;  %v13066_v48 = vpack.c.bf16 %v6790_v38, %v6789_v51 }
0x3585   :  { %11728 = vrcp.f32 %v6385_v53 }
0x358f   :  { %v11729_v55 = vpop.eup %11728 }
0x3590   :  { %v6403_v56 = vmul.f32 %v11729_v55, %v6401_v23 }
0x3592   :  { %6405 = vrot.lane.b32.xlu0 %v6403_v56, %s11978_s23 }
0x35e6   :  { %v6391_v60 = vpop.permute.xlu1 %6390 }
0x35e7   :  { %v6393_v62 = vadd.f32 %v6391_v60, %v12813_v9 }
0x35e9   :  { %v9190_v63 = vmul.f32 -1.442695, %v6393_v62  ;;  %v6799_v62 = vld [vmem:[#allocation11 + $0x60] sm:$0xff] }
0x3604   :  { %v6406_v59 = vpop.permute.xlu0 %6405 }
0x3605   :  { %v6408_v4 = vadd.f32 %v6406_v59, %v12813_v9 }
0x3607   :  { %11730 = vtanh.f32 %v6408_v4 }
0x3608   :  { %11732 = vpow2.f32 %v9190_v63  ;;  %v6800_v63 = vld [vmem:[#allocation11 + $0x68] sm:$0xff] }
0x3611   :  { %v11731_v26 = vpop.eup %11730 }
0x3612   :  { %6412 = vrot.lane.b32.xlu0 %v11731_v26, %s11980_s29  ;;  %v11733_v45 = vpop.eup %11732 }
0x3613   :  { %v6397_v0 = vadd.f32 1.0, %v11733_v45  ;;  %v6801_v45 = vld [vmem:[#allocation11 + $0x70] sm:$0xff] }
0x3615   :  { %11734 = vrcp.f32 %v6397_v0  ;;  %v13082_v0 = vpack.c.bf16 %v6800_v63, %v6799_v62 }
0x361f   :  { %v11735_v5 = vpop.eup %11734 }
0x3620   :  { %v6410_v49 = vsub.f32 1.0, %v11735_v5  ;;  %v6418_v25 = vmul.f32 %v11735_v5, %v6416_v15  ;;  %v6802_v5 = vld [vmem:[#allocation11 + $0x78] sm:$0xff] }
0x3684   :  { %v6413_v57 = vpop.permute.xlu0 %6412 }
0x3685   :  { %v6415_v52 = vmul.f32 %v6413_v57, %v6410_v49  ;;  %v13085_v49 = vpack.c.bf16 %v6802_v5, %v6801_v45  ;;  %v6689_v57 = vstv %s9196_s2 }
0x3687   :  { %v13019_v21 = vadd.f32 %v6418_v25, %v6415_v52  ;;  %v6794_v25 = vld [vmem:[#allocation9 + $0x60] sm:$0xff]  ;;  %v6795_v52 = vld [vmem:[#allocation9 + $0x68] sm:$0xff] }
0x3689   :  { %v6425_v2 = vrot.slane %v13019_v21, 4  ;;  %v6678_v54 = vrot.slane %v13019_v21, 6 }
0x368b   :  { %6426 = vrot.lane.b32.xlu1 %v6425_v2, %s11980_s29 }
0x36fd   :  { %v6427_v10 = vpop.permute.xlu1 %6426 }
0x36fe   :  { %10555 = vmatmul.mubr.msk.f32.vlgmr.msra.gmra.mrb[72].mxu0 %vm222_vm3, %v6427_v10  ;;  %10566 = vmatmul.mubr.msk.f32.vlgmr.msra.gmra.mrb[72].mxu1 %vm222_vm3, %v6427_v10 }
0x36ff   :  { %11320 = vmatpush3.bf16.msra.mxu0 %v12773_v13  ;;  %10576 = vmatprep.mubr.msk.f32.mxu0 %vm11976_vm1, %v11977_v11 }
0x3700   :  { %11321 = vmatprep.subr.bf16.mxu0 %v11975_v3  ;;  %11327 = vmatpush3.bf16.msra.mxu1 %v11324_v28 }
0x3703   :  { %11323 = vmatpush3.bf16.msra.mxu0 %v12776_v22 }
0x3704   :  { %11332 = vmatprep.subr.bf16.mxu0 %v11975_v3 }
0x3706   :  { %10577 = vmatmul.mubr.msk.f32.vlgmr.msra.gmra.mrb[74].mxu0 %vm222_vm3, %v6427_v10  ;;  %v13091_v10 = vpack.c.bf16 %v6795_v52, %v6794_v25 }
0x3707   :  { %10598 = vmatprep.mubr.msk.f32.mxu0 %vm11976_vm1, %v11977_v11  ;;  %11334 = vmatpush3.bf16.msra.mxu0 %v13066_v48 }
0x3708   :  { %11335 = vmatprep.subr.bf16.mxu0 %v11975_v3 }
0x37d1   :  { %v6496_v12 = vpop.f32.mrb[72].mxu0  ;;  %v6566_v14 = vpop.f32.mrb[72].mxu1 }
0x37d2   :  { %v6641_v16 = vrot.slane %v6496_v12, 2  ;;  %v6651_v17 = vrot.slane %v6566_v14, 2  ;;  %v10556_v19 = vpop.f32.mrb[73].mxu0  ;;  %v10567_v13 = vpop.f32.mrb[73].mxu1  ;;  %v6796_v12 = vld [vmem:[#allocation9 + $0x70] sm:$0xff]  ;;  %v6797_v14 = vld [vmem:[#allocation9 + $0x78] sm:$0xff] }
0x37d4   :  { %v6643_v6 = vadd.f32 %v6641_v16, %v12813_v9  ;;  %6652 = vrot.lane.b32.xlu1 %v6651_v17, %s11979_s27  ;;  %v13101_v17 = vpack.c.bf16 %v6797_v14, %v6796_v12 }
0x37d6   :  { %v9194_v20 = vmul.f32 -1.442695, %v6643_v6 }
0x37d8   :  { %11736 = vpow2.f32 %v9194_v20  ;;  %5122 = vrot.lane.b32.xlu1 %v12859_v61, %s11980_s29 }
0x37d9   :  { %v6636_v22 = vpop.f32.mrb[74].mxu0 }
0x37da   :  { %v10578_v31 = vpop.f32.mrb[75].mxu0  ;;  %v6637_v1 = vadd.f32 %v12822_v8, %v6636_v22 }
0x37db   :  { %v9202_v31 = vld [vmem:[%s13379_s3 + $0x3] ss:$0 sm:$0xff]  ;;  %s9244_s3 = sld [smem:[#allocation14 + $0x3]] }
0x37dc   :  { %5646 = vrot.lane.b32.xlu1 %v12925_v24, %s11980_s29  ;;  %v6663_v30 = vrot.slane %v6637_v1, 2 }
0x37e0   :  { %6421 = vrot.lane.b32.xlu1 %v13019_v21, %s11980_s29 }
0x37e2   :  { %v11737_v7 = vpop.eup %11736 }
0x37e3   :  { %v6647_v44 = vadd.f32 1.0, %v11737_v7 }
0x37e5   :  { %11738 = vrcp.f32 %v6647_v44 }
0x37ef   :  { %v11739_v35 = vpop.eup %11738 }
0x37f0   :  { %v6665_v32 = vmul.f32 %v11739_v35, %v6663_v30 }
0x37f2   :  { %6667 = vrot.lane.b32.xlu0 %v6665_v32, %s11978_s23 }
0x3846   :  { %v6653_v34 = vpop.permute.xlu1 %6652 }
0x3847   :  { %v6655_v18 = vadd.f32 %v6653_v34, %v12813_v9 }
0x3849   :  { %v9195_v43 = vmul.f32 -1.442695, %v6655_v18 }
0x384a   :  { %v5123_v61 = vpop.permute.xlu1 %5122 }
0x384b   :  { %5125 = vst.msk [vmem:[#allocation2] sm:$0xc] %vm739_vm4, %v5123_v61 }
0x384e   :  { %v5647_v36 = vpop.permute.xlu1 %5646 }
0x384f   :  { %5649 = vst.msk [vmem:[#allocation2] sm:$0xc0] %vm1265_vm5, %v5647_v36 }
0x3852   :  { %v6422_v24 = vpop.permute.xlu1 %6421 }
0x3853   :  { %6424 = vst.msk [vmem:[#allocation2 + $0x8] sm:$0x30] %vm1002_vm6, %v6422_v24 }
0x3864   :  { %v6668_v37 = vpop.permute.xlu0 %6667 }
0x3865   :  { %v6670_v39 = vadd.f32 %v6668_v37, %v12813_v9  ;;  %v13132_v37 = vld [vmem:[%s13383_s7 + $0x3] ss:$0 sm:$0xff] }
0x3867   :  { %11740 = vtanh.f32 %v6670_v39 }
0x3868   :  { %11742 = vpow2.f32 %v9195_v43 }
0x3871   :  { %v11741_v8 = vpop.eup %11740 }
0x3872   :  { %6674 = vrot.lane.b32.xlu0 %v11741_v8, %s11980_s29  ;;  %v11743_v46 = vpop.eup %11742 }
0x3873   :  { %v6659_v47 = vadd.f32 1.0, %v11743_v46 }
0x3875   :  { %11744 = vrcp.f32 %v6659_v47 }
0x3876   :  { %5384 = vrot.lane.b32.xlu0 %v12892_v27, %s11980_s29  ;;  %v11328_v27 = vpack.c.bf16 %v9200_v29, %v9199_v50 }
0x3878   :  { %11329 = vmatprep.subr.bf16.mxu1 %v11328_v27 }
0x3879   :  { %11331 = vmatpush3.bf16.msra.mxu1 %v11328_v27 }
0x387a   :  { %6159 = vrot.lane.b32.xlu0 %v12987_v40, %s11980_s29  ;;  %v6792_v40 = vld [vmem:[#allocation5 + $0x78] sm:$0xff]  ;;  %11338 = vmatprep.subr.bf16.mxu1 %v11975_v3 }
0x387b   :  { %v13069_v53 = vpack.c.bf16 %v6792_v40, %v6791_v33 }
0x387d   :  { %11337 = vmatpush3.bf16.msra.mxu0 %v13069_v53 }
0x387e   :  { %11344 = vmatprep.subr.bf16.mxu0 %v11975_v3 }
0x387f   :  { %v11745_v9 = vpop.eup %11744 }
0x3880   :  { %v6672_v23 = vsub.f32 1.0, %v11745_v9  ;;  %v6680_v59 = vmul.f32 %v11745_v9, %v6678_v54  ;;  %10599 = vmatmul.mubr.f32.vlgmr.msra.gmra.mrb[76].mxu0 %v11977_v11 }
0x3881   :  { %10620 = vmatprep.mubr.msk.f32.mxu0 %vm11976_vm1, %v11977_v11  ;;  %11346 = vmatpush3.bf16.msra.mxu0 %v13082_v0 }
0x3882   :  { %11347 = vmatprep.subr.bf16.mxu0 %v11975_v3 }
0x3885   :  { %11349 = vmatpush3.bf16.msra.mxu0 %v13085_v49 }
0x3886   :  { %11356 = vmatprep.subr.bf16.mxu0 %v11975_v3 }
0x3888   :  { %10621 = vmatmul.mubr.f32.vlgmr.msra.gmra.mrb[78].mxu0 %v11977_v11 }
0x3889   :  { %11358 = vmatpush3.bf16.msra.mxu0 %v13091_v10  ;;  %10642 = vmatprep.mubr.msk.f32.mxu0 %vm11976_vm1, %v11977_v11 }
0x388a   :  { %11359 = vmatprep.subr.bf16.mxu0 %v11975_v3 }
0x388d   :  { %11361 = vmatpush3.bf16.msra.mxu0 %v13101_v17 }
0x388e   :  { %11368 = vmatprep.subr.bf16.mxu0 %v11975_v3 }
0x38e4   :  { %v6675_v55 = vpop.permute.xlu0 %6674 }
0x38e5   :  { %v6677_v56 = vmul.f32 %v6675_v55, %v6672_v23 }
0x38e7   :  { %v6681_v4 = vadd.f32 %v6680_v59, %v6677_v56 }
0x38e8   :  { %v5385_v26 = vpop.permute.xlu0 %5384 }
0x38e9   :  { %11746 = vtanh.f32 %v6681_v4  ;;  %5387 = vst.msk [vmem:[#allocation2] sm:$0x30] %vm1002_vm6, %v5385_v26  ;;  %6683 = vrot.lane.b32.xlu0 %v6681_v4, %s11980_s29 }
0x38ec   :  { %v6160_v60 = vpop.permute.xlu0 %6159 }
0x38ed   :  { %6162 = vst.msk [vmem:[#allocation2 + $0x8] sm:$0xc] %vm739_vm4, %v6160_v60 }
0x38f0   :  { %v6692_v15 = vld [vmem:[#allocation2] sm:$0xff] }
0x38f1   :  { %10587 = vmatprep.mubr.msk.f32.mxu1 %vm222_vm3, %v6692_v15 }
0x38f3   :  { %v11747_v21 = vpop.eup %11746 }
0x38f4   :  { %v6690_v2 = vmul.f32 %v11747_v21, %v6689_v57 }
0x38f6   :  { %v13095_v16 = vadd.f32 %v6690_v2, %v12785_v58 }
0x3953   :  { %v6871_v58 = vpop.f32.mrb[76].mxu0 }
0x3954   :  { %v10600_v6 = vpop.f32.mrb[77].mxu0 }
0x395b   :  { %v6684_v19 = vpop.permute.xlu0 %6683  ;;  %v7017_v20 = vpop.f32.mrb[78].mxu0 }
0x395c   :  { %6686 = vst.msk [vmem:[#allocation2 + $0x8] sm:$0xc0] %vm1265_vm5, %v6684_v19  ;;  %v10622_v22 = vpop.f32.mrb[79].mxu0  ;;  %v7018_v39 = vadd.f32 %v13132_v37, %v7017_v20 }
0x3963   :  { %v6693_v13 = vld [vmem:[#allocation2 + $0x8] sm:$0xff] }
0x3964   :  { %10588 = vmatmul.mubr.msk.f32.vlgmr.msra.gmra.mrb[74].mxu1 %vm222_vm3, %v6693_v13 }
0x3965   :  { %11340 = vmatpush3.bf16.msra.mxu1 %v13091_v10  ;;  %10609 = vmatprep.mubr.msk.f32.mxu1 %vm11976_vm1, %v11977_v11 }
0x3966   :  { %11341 = vmatprep.subr.bf16.mxu1 %v11975_v3 }
0x3969   :  { %11343 = vmatpush3.bf16.msra.mxu1 %v13101_v17 }
0x396a   :  { %11350 = vmatprep.subr.bf16.mxu1 %v11975_v3 }
0x396c   :  { %10610 = vmatmul.mubr.f32.vlgmr.msra.gmra.mrb[76].mxu1 %v11977_v11 }
0x396d   :  { %11352 = vmatpush3.bf16.msra.mxu1 %v13066_v48  ;;  %10631 = vmatprep.mubr.msk.f32.mxu1 %vm11976_vm1, %v11977_v11 }
0x396e   :  { %11353 = vmatprep.subr.bf16.mxu1 %v11975_v3 }
0x3971   :  { %11355 = vmatpush3.bf16.msra.mxu1 %v13069_v53 }
0x3972   :  { %11362 = vmatprep.subr.bf16.mxu1 %v11975_v3 }
0x3a37   :  { %v10589_v7 = vpop.f32.mrb[74].mxu1 }
0x3a38   :  { %v13123_v44 = vadd.f32 %v10589_v7, %v9202_v31  ;;  %v6779_v1 = vpop.f32.mrb[75].mxu1 }
0x3a39   :  { %v13125_v30 = vadd.f32 %v9202_v31, %v6779_v1 }
0x3a3b   :  { %v7021_v35 = vadd.f32 %v6871_v58, %v13125_v30 }
0x3a3d   :  { %v9207_v32 = vmul.f32 -1.442695, %v7021_v35 }
0x3a3f   :  { %11748 = vpow2.f32 %v9207_v32  ;;  %v6941_v34 = vpop.f32.mrb[76].mxu1 }
0x3a40   :  { %7029 = vrot.lane.b32.xlu0 %v6941_v34, %s11979_s27  ;;  %v10611_v61 = vpop.f32.mrb[77].mxu1 }
0x3a49   :  { %v11749_v36 = vpop.eup %11748 }
0x3a4a   :  { %v7025_v24 = vadd.f32 1.0, %v11749_v36 }
0x3a4c   :  { %11750 = vrcp.f32 %v7025_v24 }
0x3a56   :  { %v11751_v8 = vpop.eup %11750 }
0x3a57   :  { %v7039_v41 = vmul.f32 %v11751_v8, %v7018_v39 }
0x3a59   :  { %7041 = vrot.lane.b32.xlu1 %v7039_v41, %s11978_s23 }
0x3ab2   :  { %v7030_v43 = vpop.permute.xlu0 %7029 }
0x3ab3   :  { %v7032_v46 = vadd.f32 %v7030_v43, %v13125_v30 }
0x3ab5   :  { %v9208_v47 = vmul.f32 -1.442695, %v7032_v46 }
0x3acb   :  { %v7042_v42 = vpop.permute.xlu1 %7041 }
0x3acc   :  { %v7044_v28 = vadd.f32 %v7042_v42, %v13125_v30 }
0x3ace   :  { %11752 = vtanh.f32 %v7044_v28 }
0x3acf   :  { %11754 = vpow2.f32 %v9208_v47 }
0x3ad8   :  { %v11753_v18 = vpop.eup %11752 }
0x3ad9   :  { %7048 = vrot.lane.b32.xlu1 %v11753_v18, %s11980_s29  ;;  %v11755_v50 = vpop.eup %11754 }
0x3ada   :  { %v7036_v29 = vadd.f32 1.0, %v11755_v50 }
0x3adc   :  { %11756 = vrcp.f32 %v7036_v29 }
0x3ae6   :  { %v11757_v51 = vpop.eup %11756 }
0x3ae7   :  { %v7046_v27 = vsub.f32 1.0, %v11757_v51  ;;  %v7052_v33 = vmul.f32 0.0, %v11757_v51 }
0x3b4b   :  { %v7049_v38 = vpop.permute.xlu1 %7048 }
0x3b4c   :  { %v7051_v40 = vmul.f32 %v7049_v38, %v7046_v27 }
0x3b4e   :  { %v7053_v9 = vadd.f32 %v7052_v33, %v7051_v40 }
0x3b50   :  { %7055 = vrot.lane.b32.xlu0 %v7053_v9, %s11980_s29  ;;  %v7307_v31 = vrot.slane %v7053_v9, 6 }
0x3bc2   :  { %v7056_v54 = vpop.permute.xlu0 %7055 }
0x3bc3   :  { %10632 = vmatmul.mubr.msk.f32.vlgmr.msra.gmra.mrb[78].mxu1 %vm222_vm3, %v7056_v54  ;;  %10643 = vmatmul.mubr.msk.f32.vlgmr.msra.gmra.mrb[80].mxu0 %vm222_vm3, %v7056_v54 }
0x3bc4   :  { %11364 = vmatpush3.bf16.msra.mxu1 %v13082_v0  ;;  %10653 = vmatprep.mubr.msk.f32.mxu1 %vm11976_vm1, %v11977_v11 }
0x3bc5   :  { %11365 = vmatprep.subr.bf16.mxu1 %v11975_v3  ;;  %11370 = vmatpush3.bf16.msra.mxu0 %v13066_v48 }
0x3bc6   :  { %11371 = vmatprep.subr.bf16.mxu0 %v11975_v3  ;;  %10664 = vmatprep.mubr.msk.f32.mxu0 %vm11976_vm1, %v11977_v11 }
0x3bc8   :  { %11367 = vmatpush3.bf16.msra.mxu1 %v13085_v49 }
0x3bc9   :  { %11374 = vmatprep.subr.bf16.mxu1 %v11975_v3  ;;  %11373 = vmatpush3.bf16.msra.mxu0 %v13069_v53 }
0x3bca   :  { %11380 = vmatprep.subr.bf16.mxu0 %v11975_v3 }
0x3bcb   :  { %10654 = vmatmul.mubr.msk.f32.vlgmr.msra.gmra.mrb[80].mxu1 %vm222_vm3, %v7056_v54 }
0x3bcc   :  { %11376 = vmatpush3.bf16.msra.mxu1 %v13091_v10  ;;  %10675 = vmatprep.mubr.msk.f32.mxu1 %vm11976_vm1, %v11977_v11 }
0x3bcd   :  { %11377 = vmatprep.subr.bf16.mxu1 %v11975_v3 }
0x3bd0   :  { %11379 = vmatpush3.bf16.msra.mxu1 %v13101_v17 }
0x3bd1   :  { %11386 = vmatprep.subr.bf16.mxu1 %v11975_v3 }
0x3c96   :  { %v7125_v23 = vpop.f32.mrb[78].mxu1  ;;  %v7195_v55 = vpop.f32.mrb[80].mxu0 }
0x3c97   :  { %v7270_v56 = vrot.slane %v7125_v23, 6  ;;  %v7280_v59 = vrot.slane %v7195_v55, 6  ;;  %v10633_v4 = vpop.f32.mrb[79].mxu1  ;;  %v10644_v26 = vpop.f32.mrb[81].mxu0 }
0x3c99   :  { %v7272_v60 = vadd.f32 %v7270_v56, %v13125_v30  ;;  %7281 = vrot.lane.b32.xlu0 %v7280_v59, %s11979_s27 }
0x3c9b   :  { %v9212_v62 = vmul.f32 -1.442695, %v7272_v60 }
0x3c9d   :  { %11758 = vpow2.f32 %v9212_v62 }
0x3c9e   :  { %v7265_v63 = vpop.f32.mrb[80].mxu1 }
0x3c9f   :  { %v10655_v45 = vpop.f32.mrb[81].mxu1  ;;  %v7266_v57 = vadd.f32 %v13132_v37, %v7265_v63 }
0x3ca1   :  { %v7292_v25 = vrot.slane %v7266_v57, 6 }
0x3ca7   :  { %v11759_v5 = vpop.eup %11758 }
0x3ca8   :  { %v7276_v15 = vadd.f32 1.0, %v11759_v5 }
0x3caa   :  { %11760 = vrcp.f32 %v7276_v15 }
0x3cb4   :  { %v11761_v52 = vpop.eup %11760 }
0x3cb5   :  { %v7294_v21 = vmul.f32 %v11761_v52, %v7292_v25 }
0x3cb7   :  { %7296 = vrot.lane.b32.xlu1 %v7294_v21, %s11978_s23 }
0x3d0b   :  { %v7282_v19 = vpop.permute.xlu0 %7281 }
0x3d0c   :  { %v7284_v13 = vadd.f32 %v7282_v19, %v13125_v30 }
0x3d0e   :  { %v9213_v58 = vmul.f32 -1.442695, %v7284_v13 }
0x3d29   :  { %v7297_v2 = vpop.permute.xlu1 %7296 }
0x3d2a   :  { %v7299_v12 = vadd.f32 %v7297_v2, %v13125_v30 }
0x3d2c   :  { %11762 = vtanh.f32 %v7299_v12 }
0x3d2d   :  { %11764 = vpow2.f32 %v9213_v58 }
0x3d36   :  { %v11763_v14 = vpop.eup %11762 }
0x3d37   :  { %7303 = vrot.lane.b32.xlu1 %v11763_v14, %s11980_s29  ;;  %v11765_v6 = vpop.eup %11764 }
0x3d38   :  { %v7288_v20 = vadd.f32 1.0, %v11765_v6 }
0x3d3a   :  { %11766 = vrcp.f32 %v7288_v20 }
0x3d44   :  { %v11767_v22 = vpop.eup %11766 }
0x3d45   :  { %v7301_v7 = vsub.f32 1.0, %v11767_v22  ;;  %v7309_v32 = vmul.f32 %v11767_v22, %v7307_v31 }
0x3da9   :  { %v7304_v1 = vpop.permute.xlu1 %7303 }
0x3daa   :  { %v7306_v35 = vmul.f32 %v7304_v1, %v7301_v7 }
0x3dac   :  { %v7310_v34 = vadd.f32 %v7309_v32, %v7306_v35 }
0x3dae   :  { %v7312_v61 = vrot.slane %v7310_v34, 2  ;;  %v7565_v60 = vrot.slane %v7310_v34, 6 }
0x3db0   :  { %7313 = vrot.lane.b32.xlu0 %v7312_v61, %s11980_s29 }
0x3e22   :  { %v7314_v36 = vpop.permute.xlu0 %7313 }
0x3e23   :  { %10665 = vmatmul.mubr.msk.f32.vlgmr.msra.gmra.mrb[82].mxu0 %vm222_vm3, %v7314_v36  ;;  %10676 = vmatmul.mubr.msk.f32.vlgmr.msra.gmra.mrb[82].mxu1 %vm222_vm3, %v7314_v36 }
0x3e24   :  { %11382 = vmatpush3.bf16.msra.mxu0 %v13082_v0  ;;  %10686 = vmatprep.mubr.msk.f32.mxu0 %vm11976_vm1, %v11977_v11 }
0x3e25   :  { %11383 = vmatprep.subr.bf16.mxu0 %v11975_v3  ;;  %11388 = vmatpush3.bf16.msra.mxu1 %v13066_v48 }
0x3e26   :  { %11389 = vmatprep.subr.bf16.mxu1 %v11975_v3  ;;  %10697 = vmatprep.mubr.msk.f32.mxu1 %vm11976_vm1, %v11977_v11 }
0x3e28   :  { %11385 = vmatpush3.bf16.msra.mxu0 %v13085_v49 }
0x3e29   :  { %11392 = vmatprep.subr.bf16.mxu0 %v11975_v3  ;;  %11391 = vmatpush3.bf16.msra.mxu1 %v13069_v53 }
0x3e2a   :  { %11398 = vmatprep.subr.bf16.mxu1 %v11975_v3 }
0x3e2b   :  { %10687 = vmatmul.mubr.msk.f32.vlgmr.msra.gmra.mrb[84].mxu0 %vm222_vm3, %v7314_v36 }
0x3e2c   :  { %11394 = vmatpush3.bf16.msra.mxu0 %v13091_v10  ;;  %10708 = vmatprep.mubr.msk.f32.mxu0 %vm11976_vm1, %v11977_v11 }
0x3e2d   :  { %11395 = vmatprep.subr.bf16.mxu0 %v11975_v3 }
0x3e30   :  { %11397 = vmatpush3.bf16.msra.mxu0 %v13101_v17 }
0x3e31   :  { %11404 = vmatprep.subr.bf16.mxu0 %v11975_v3 }
0x3ef6   :  { %v7383_v24 = vpop.f32.mrb[82].mxu0  ;;  %v7453_v39 = vpop.f32.mrb[82].mxu1 }
0x3ef7   :  { %v7528_v8 = vrot.slane %v7383_v24, 4  ;;  %v7538_v41 = vrot.slane %v7453_v39, 4  ;;  %v10666_v42 = vpop.f32.mrb[83].mxu0  ;;  %v10677_v28 = vpop.f32.mrb[83].mxu1 }
0x3ef9   :  { %v7530_v18 = vadd.f32 %v7528_v8, %v13125_v30  ;;  %7539 = vrot.lane.b32.xlu0 %v7538_v41, %s11979_s27 }
0x3efb   :  { %v9217_v43 = vmul.f32 -1.442695, %v7530_v18 }
0x3efd   :  { %11768 = vpow2.f32 %v9217_v43 }
0x3efe   :  { %v7523_v46 = vpop.f32.mrb[84].mxu0 }
0x3eff   :  { %v10688_v47 = vpop.f32.mrb[85].mxu0  ;;  %v7524_v51 = vadd.f32 %v13132_v37, %v7523_v46 }
0x3f01   :  { %v7550_v27 = vrot.slane %v7524_v51, 4 }
0x3f07   :  { %v11769_v50 = vpop.eup %11768 }
0x3f08   :  { %v7534_v29 = vadd.f32 1.0, %v11769_v50 }
0x3f0a   :  { %11770 = vrcp.f32 %v7534_v29 }
0x3f14   :  { %v11771_v38 = vpop.eup %11770 }
0x3f15   :  { %v7552_v33 = vmul.f32 %v11771_v38, %v7550_v27 }
0x3f17   :  { %7554 = vrot.lane.b32.xlu1 %v7552_v33, %s11978_s23 }
0x3f6b   :  { %v7540_v23 = vpop.permute.xlu0 %7539 }
0x3f6c   :  { %v7542_v55 = vadd.f32 %v7540_v23, %v13125_v30 }
0x3f6e   :  { %v9218_v56 = vmul.f32 -1.442695, %v7542_v55 }
0x3f89   :  { %v7555_v40 = vpop.permute.xlu1 %7554 }
0x3f8a   :  { %v7557_v9 = vadd.f32 %v7555_v40, %v13125_v30 }
0x3f8c   :  { %11772 = vtanh.f32 %v7557_v9 }
0x3f8d   :  { %11774 = vpow2.f32 %v9218_v56 }
0x3f96   :  { %v11773_v54 = vpop.eup %11772 }
0x3f97   :  { %7561 = vrot.lane.b32.xlu1 %v11773_v54, %s11980_s29  ;;  %v11775_v59 = vpop.eup %11774 }
0x3f98   :  { %v7546_v4 = vadd.f32 1.0, %v11775_v59 }
0x3f9a   :  { %11776 = vrcp.f32 %v7546_v4 }
0x3fa4   :  { %v11777_v26 = vpop.eup %11776 }
0x3fa5   :  { %v7559_v62 = vsub.f32 1.0, %v11777_v26  ;;  %v7567_v45 = vmul.f32 %v11777_v26, %v7565_v60 }
0x4009   :  { %v7562_v63 = vpop.permute.xlu1 %7561 }
0x400a   :  { %v7564_v5 = vmul.f32 %v7562_v63, %v7559_v62 }
0x400c   :  { %v7568_v15 = vadd.f32 %v7567_v45, %v7564_v5 }
0x400e   :  { %v7570_v57 = vrot.slane %v7568_v15, 4  ;;  %v7823_v18 = vrot.slane %v7568_v15, 6 }
0x4010   :  { %7571 = vrot.lane.b32.xlu0 %v7570_v57, %s11980_s29 }
0x4082   :  { %v7572_v25 = vpop.permute.xlu0 %7571 }
0x4083   :  { %10698 = vmatmul.mubr.msk.f32.vlgmr.msra.gmra.mrb[84].mxu1 %vm222_vm3, %v7572_v25  ;;  %10709 = vmatmul.mubr.msk.f32.vlgmr.msra.gmra.mrb[86].mxu0 %vm222_vm3, %v7572_v25 }
0x4084   :  { %11400 = vmatpush3.bf16.msra.mxu1 %v13082_v0  ;;  %10719 = vmatprep.mubr.msk.f32.mxu1 %vm11976_vm1, %v11977_v11 }
0x4085   :  { %11401 = vmatprep.subr.bf16.mxu1 %v11975_v3  ;;  %11406 = vmatpush3.bf16.msra.mxu0 %v13066_v48 }
0x4086   :  { %11407 = vmatprep.subr.bf16.mxu0 %v11975_v3  ;;  %10730 = vmatprep.mubr.msk.f32.mxu0 %vm11976_vm1, %v11977_v11 }
0x4088   :  { %11403 = vmatpush3.bf16.msra.mxu1 %v13085_v49 }
0x4089   :  { %11410 = vmatprep.subr.bf16.mxu1 %v11975_v3  ;;  %11409 = vmatpush3.bf16.msra.mxu0 %v13069_v53 }
0x408a   :  { %11416 = vmatprep.subr.bf16.mxu0 %v11975_v3 }
0x408b   :  { %10720 = vmatmul.mubr.msk.f32.vlgmr.msra.gmra.mrb[86].mxu1 %vm222_vm3, %v7572_v25 }
0x408c   :  { %11412 = vmatpush3.bf16.msra.mxu1 %v13091_v10  ;;  %10741 = vmatprep.mubr.msk.f32.mxu1 %vm11976_vm1, %v11977_v11 }
0x408d   :  { %11413 = vmatprep.subr.bf16.mxu1 %v11975_v3 }
0x4090   :  { %11415 = vmatpush3.bf16.msra.mxu1 %v13101_v17 }
0x4091   :  { %11422 = vmatprep.subr.bf16.mxu1 %v11975_v3 }
0x4156   :  { %v7641_v52 = vpop.f32.mrb[84].mxu1  ;;  %v7711_v21 = vpop.f32.mrb[86].mxu0 }
0x4157   :  { %v7786_v2 = vrot.slane %v7641_v52, 2  ;;  %v7796_v12 = vrot.slane %v7711_v21, 2  ;;  %v10699_v14 = vpop.f32.mrb[85].mxu1  ;;  %v10710_v19 = vpop.f32.mrb[87].mxu0 }
0x4159   :  { %v7788_v13 = vadd.f32 %v7786_v2, %v13125_v30  ;;  %7797 = vrot.lane.b32.xlu0 %v7796_v12, %s11979_s27 }
0x415b   :  { %v9222_v58 = vmul.f32 -1.442695, %v7788_v13 }
0x415d   :  { %11778 = vpow2.f32 %v9222_v58 }
0x415e   :  { %v7781_v6 = vpop.f32.mrb[86].mxu1 }
0x415f   :  { %v10721_v20 = vpop.f32.mrb[87].mxu1  ;;  %v7782_v7 = vadd.f32 %v13132_v37, %v7781_v6 }
0x4161   :  { %v7808_v1 = vrot.slane %v7782_v7, 2 }
0x4167   :  { %v11779_v22 = vpop.eup %11778 }
0x4168   :  { %v7792_v31 = vadd.f32 1.0, %v11779_v22 }
0x416a   :  { %11780 = vrcp.f32 %v7792_v31 }
0x4174   :  { %v11781_v35 = vpop.eup %11780 }
0x4175   :  { %v7810_v32 = vmul.f32 %v11781_v35, %v7808_v1 }
0x4177   :  { %7812 = vrot.lane.b32.xlu1 %v7810_v32, %s11978_s23 }
0x41cb   :  { %v7798_v24 = vpop.permute.xlu0 %7797 }
0x41cc   :  { %v7800_v39 = vadd.f32 %v7798_v24, %v13125_v30 }
0x41ce   :  { %v9223_v8 = vmul.f32 -1.442695, %v7800_v39 }
0x41e9   :  { %v7813_v34 = vpop.permute.xlu1 %7812 }
0x41ea   :  { %v7815_v61 = vadd.f32 %v7813_v34, %v13125_v30 }
0x41ec   :  { %11782 = vtanh.f32 %v7815_v61 }
0x41ed   :  { %11784 = vpow2.f32 %v9223_v8 }
0x41f6   :  { %v11783_v36 = vpop.eup %11782 }
0x41f7   :  { %7819 = vrot.lane.b32.xlu1 %v11783_v36, %s11980_s29  ;;  %v11785_v41 = vpop.eup %11784 }
0x41f8   :  { %v7804_v42 = vadd.f32 1.0, %v11785_v41 }
0x41fa   :  { %11786 = vrcp.f32 %v7804_v42 }
0x4204   :  { %v11787_v28 = vpop.eup %11786 }
0x4205   :  { %v7817_v43 = vsub.f32 1.0, %v11787_v28  ;;  %v7825_v50 = vmul.f32 %v11787_v28, %v7823_v18 }
0x4269   :  { %v7820_v46 = vpop.permute.xlu1 %7819 }
0x426a   :  { %v7822_v47 = vmul.f32 %v7820_v46, %v7817_v43 }
0x426c   :  { %v7826_v29 = vadd.f32 %v7825_v50, %v7822_v47 }
0x426e   :  { %v7828_v51 = vrot.slane %v7826_v29, 6 }
0x4270   :  { %7829 = vrot.lane.b32.xlu0 %v7828_v51, %s11980_s29 }
0x42e2   :  { %v7830_v27 = vpop.permute.xlu0 %7829 }
0x42e3   :  { %10731 = vmatmul.mubr.msk.f32.vlgmr.msra.gmra.mrb[88].mxu0 %vm222_vm3, %v7830_v27  ;;  %10742 = vmatmul.mubr.msk.f32.vlgmr.msra.gmra.mrb[88].mxu1 %vm222_vm3, %v7830_v27 }
0x42e4   :  { %11418 = vmatpush3.bf16.msra.mxu0 %v13082_v0  ;;  %10752 = vmatprep.mubr.msk.f32.mxu0 %vm11976_vm1, %v11977_v11 }
0x42e5   :  { %11419 = vmatprep.subr.bf16.mxu0 %v11975_v3  ;;  %11424 = vmatpush3.bf16.msra.mxu1 %v13066_v48 }
0x42e6   :  { %11425 = vmatprep.subr.bf16.mxu1 %v11975_v3  ;;  %10763 = vmatprep.mubr.msk.f32.mxu1 %vm11976_vm1, %v11977_v11 }
0x42e8   :  { %11421 = vmatpush3.bf16.msra.mxu0 %v13085_v49 }
0x42e9   :  { %11428 = vmatprep.subr.bf16.mxu0 %v11975_v3  ;;  %11427 = vmatpush3.bf16.msra.mxu1 %v13069_v53 }
0x42ea   :  { %11434 = vmatprep.subr.bf16.mxu1 %v11975_v3 }
0x42eb   :  { %10753 = vmatmul.mubr.msk.f32.vlgmr.msra.gmra.mrb[90].mxu0 %vm222_vm3, %v7830_v27 }
0x42ec   :  { %11430 = vmatpush3.bf16.msra.mxu0 %v13091_v10  ;;  %10774 = vmatprep.mubr.msk.f32.mxu0 %vm11976_vm1, %v11977_v11 }
0x42ed   :  { %11431 = vmatprep.subr.bf16.mxu0 %v11975_v3 }
0x42f0   :  { %11433 = vmatpush3.bf16.msra.mxu0 %v13101_v17 }
0x42f1   :  { %11440 = vmatprep.subr.bf16.mxu0 %v11975_v3 }
0x43b6   :  { %v7899_v30 = vpop.f32.mrb[88].mxu0  ;;  %v7969_v38 = vpop.f32.mrb[88].mxu1 }
0x43b7   :  { %v8043_v33 = vadd.f32 %v7899_v30, %v13123_v44  ;;  %8051 = vrot.lane.b32.xlu0 %v7969_v38, %s11979_s27  ;;  %v10732_v40 = vpop.f32.mrb[89].mxu0  ;;  %v10743_v9 = vpop.f32.mrb[89].mxu1 }
0x43b9   :  { %v9227_v54 = vmul.f32 -1.442695, %v8043_v33 }
0x43bb   :  { %11788 = vpow2.f32 %v9227_v54 }
0x43be   :  { %v8039_v23 = vpop.f32.mrb[90].mxu0 }
0x43bf   :  { %v10754_v55 = vpop.f32.mrb[91].mxu0  ;;  %v8040_v4 = vadd.f32 %v13132_v37, %v8039_v23 }
0x43c5   :  { %v11789_v56 = vpop.eup %11788 }
0x43c6   :  { %v8047_v59 = vadd.f32 1.0, %v11789_v56 }
0x43c8   :  { %11790 = vrcp.f32 %v8047_v59 }
0x43d2   :  { %v11791_v26 = vpop.eup %11790 }
0x43d3   :  { %v8061_v60 = vmul.f32 %v11791_v26, %v8040_v4 }
0x43d5   :  { %8063 = vrot.lane.b32.xlu1 %v8061_v60, %s11978_s23 }
0x4429   :  { %v8052_v5 = vpop.permute.xlu0 %8051 }
0x442a   :  { %v8054_v15 = vadd.f32 %v8052_v5, %v13123_v44 }
0x442c   :  { %v9228_v57 = vmul.f32 -1.442695, %v8054_v15 }
0x4447   :  { %v8064_v62 = vpop.permute.xlu1 %8063 }
0x4448   :  { %v8066_v63 = vadd.f32 %v8064_v62, %v13123_v44 }
0x444a   :  { %11792 = vtanh.f32 %v8066_v63 }
0x444b   :  { %11794 = vpow2.f32 %v9228_v57 }
0x4454   :  { %v11793_v45 = vpop.eup %11792 }
0x4455   :  { %8070 = vrot.lane.b32.xlu1 %v11793_v45, %s11980_s29  ;;  %v11795_v25 = vpop.eup %11794 }
0x4456   :  { %v8058_v52 = vadd.f32 1.0, %v11795_v25 }
0x4458   :  { %11796 = vrcp.f32 %v8058_v52 }
0x4462   :  { %v11797_v21 = vpop.eup %11796 }
0x4463   :  { %v8068_v2 = vsub.f32 1.0, %v11797_v21  ;;  %v8075_v14 = vmul.f32 %v11797_v21, %v7828_v51 }
0x44c7   :  { %v8071_v12 = vpop.permute.xlu1 %8070 }
0x44c8   :  { %v8073_v19 = vmul.f32 %v8071_v12, %v8068_v2 }
0x44ca   :  { %v8076_v13 = vadd.f32 %v8075_v14, %v8073_v19 }
0x44cc   :  { %8078 = vrot.lane.b32.xlu0 %v8076_v13, %s11980_s29  ;;  %v8330_v30 = vrot.slane %v8076_v13, 6 }
0x453e   :  { %v8079_v58 = vpop.permute.xlu0 %8078 }
0x453f   :  { %10764 = vmatmul.mubr.msk.f32.vlgmr.msra.gmra.mrb[90].mxu1 %vm222_vm3, %v8079_v58  ;;  %10775 = vmatmul.mubr.msk.f32.vlgmr.msra.gmra.mrb[92].mxu0 %vm222_vm3, %v8079_v58 }
0x4540   :  { %11436 = vmatpush3.bf16.msra.mxu1 %v13082_v0  ;;  %10785 = vmatprep.mubr.msk.f32.mxu1 %vm11976_vm1, %v11977_v11 }
0x4541   :  { %11437 = vmatprep.subr.bf16.mxu1 %v11975_v3  ;;  %11442 = vmatpush3.bf16.msra.mxu0 %v13066_v48 }
0x4542   :  { %11443 = vmatprep.subr.bf16.mxu0 %v11975_v3  ;;  %10796 = vmatprep.mubr.msk.f32.mxu0 %vm11976_vm1, %v11977_v11 }
0x4544   :  { %11439 = vmatpush3.bf16.msra.mxu1 %v13085_v49 }
0x4545   :  { %11446 = vmatprep.subr.bf16.mxu1 %v11975_v3  ;;  %11445 = vmatpush3.bf16.msra.mxu0 %v13069_v53 }
0x4546   :  { %11452 = vmatprep.subr.bf16.mxu0 %v11975_v3 }
0x4547   :  { %10786 = vmatmul.mubr.msk.f32.vlgmr.msra.gmra.mrb[92].mxu1 %vm222_vm3, %v8079_v58 }
0x4548   :  { %11448 = vmatpush3.bf16.msra.mxu1 %v13091_v10  ;;  %10807 = vmatprep.mubr.msk.f32.mxu1 %vm11976_vm1, %v11977_v11 }
0x4549   :  { %11449 = vmatprep.subr.bf16.mxu1 %v11975_v3 }
0x454c   :  { %11451 = vmatpush3.bf16.msra.mxu1 %v13101_v17 }
0x454d   :  { %11458 = vmatprep.subr.bf16.mxu1 %v11975_v3 }
0x4612   :  { %v8148_v6 = vpop.f32.mrb[90].mxu1  ;;  %v8218_v20 = vpop.f32.mrb[92].mxu0 }
0x4613   :  { %v8293_v22 = vrot.slane %v8148_v6, 6  ;;  %v8303_v31 = vrot.slane %v8218_v20, 6  ;;  %v10765_v7 = vpop.f32.mrb[91].mxu1  ;;  %v10776_v1 = vpop.f32.mrb[93].mxu0 }
0x4615   :  { %v8295_v35 = vadd.f32 %v8293_v22, %v13123_v44  ;;  %8304 = vrot.lane.b32.xlu0 %v8303_v31, %s11979_s27 }
0x4617   :  { %v9232_v32 = vmul.f32 -1.442695, %v8295_v35 }
0x4619   :  { %11798 = vpow2.f32 %v9232_v32 }
0x461a   :  { %v8288_v34 = vpop.f32.mrb[92].mxu1 }
0x461b   :  { %v10787_v61 = vpop.f32.mrb[93].mxu1  ;;  %v8289_v39 = vadd.f32 %v13132_v37, %v8288_v34 }
0x461d   :  { %v8315_v8 = vrot.slane %v8289_v39, 6 }
0x4623   :  { %v11799_v36 = vpop.eup %11798 }
0x4624   :  { %v8299_v24 = vadd.f32 1.0, %v11799_v36 }
0x4626   :  { %11800 = vrcp.f32 %v8299_v24 }
0x4630   :  { %v11801_v41 = vpop.eup %11800 }
0x4631   :  { %v8317_v42 = vmul.f32 %v11801_v41, %v8315_v8 }
0x4633   :  { %8319 = vrot.lane.b32.xlu1 %v8317_v42, %s11978_s23 }
0x4687   :  { %v8305_v46 = vpop.permute.xlu0 %8304 }
0x4688   :  { %v8307_v47 = vadd.f32 %v8305_v46, %v13123_v44 }
0x468a   :  { %v9233_v50 = vmul.f32 -1.442695, %v8307_v47 }
0x46a5   :  { %v8320_v28 = vpop.permute.xlu1 %8319 }
0x46a6   :  { %v8322_v18 = vadd.f32 %v8320_v28, %v13123_v44 }
0x46a8   :  { %11802 = vtanh.f32 %v8322_v18 }
0x46a9   :  { %11804 = vpow2.f32 %v9233_v50 }
0x46b2   :  { %v11803_v43 = vpop.eup %11802 }
0x46b3   :  { %8326 = vrot.lane.b32.xlu1 %v11803_v43, %s11980_s29  ;;  %v11805_v29 = vpop.eup %11804 }
0x46b4   :  { %v8311_v51 = vadd.f32 1.0, %v11805_v29 }
0x46b6   :  { %11806 = vrcp.f32 %v8311_v51 }
0x46c0   :  { %v11807_v27 = vpop.eup %11806 }
0x46c1   :  { %v8324_v38 = vsub.f32 1.0, %v11807_v27  ;;  %v8332_v9 = vmul.f32 %v11807_v27, %v8330_v30  ;;  %v8858_v30 = vld [vmem:[#allocation12] sm:$0xff] }
0x4725   :  { %v8327_v33 = vpop.permute.xlu1 %8326 }
0x4726   :  { %v8329_v40 = vmul.f32 %v8327_v33, %v8324_v38  ;;  %v8859_v38 = vld [vmem:[#allocation12 + $0x8] sm:$0xff]  ;;  %v8860_v33 = vld [vmem:[#allocation12 + $0x10] sm:$0xff] }
0x4728   :  { %v8333_v54 = vadd.f32 %v8332_v9, %v8329_v40  ;;  %v11477_v40 = vpack.c.bf16 %v8859_v38, %v8858_v30  ;;  %v8861_v9 = vld [vmem:[#allocation12 + $0x18] sm:$0xff] }
0x472a   :  { %v8335_v23 = vrot.slane %v8333_v54, 2  ;;  %v8588_v20 = vrot.slane %v8333_v54, 6  ;;  %v11480_v54 = vpack.c.bf16 %v8861_v9, %v8860_v33 }
0x472c   :  { %8336 = vrot.lane.b32.xlu0 %v8335_v23, %s11980_s29 }
0x479e   :  { %v8337_v55 = vpop.permute.xlu0 %8336 }
0x479f   :  { %10797 = vmatmul.mubr.msk.f32.vlgmr.msra.gmra.mrb[94].mxu0 %vm222_vm3, %v8337_v55  ;;  %10808 = vmatmul.mubr.msk.f32.vlgmr.msra.gmra.mrb[94].mxu1 %vm222_vm3, %v8337_v55 }
0x47a0   :  { %11454 = vmatpush3.bf16.msra.mxu0 %v13082_v0  ;;  %10818 = vmatprep.mubr.msk.f32.mxu0 %vm11976_vm1, %v11977_v11 }
0x47a1   :  { %11455 = vmatprep.subr.bf16.mxu0 %v11975_v3  ;;  %11460 = vmatpush3.bf16.msra.mxu1 %v13066_v48 }
0x47a2   :  { %11461 = vmatprep.subr.bf16.mxu1 %v11975_v3  ;;  %10829 = vmatprep.mubr.msk.f32.mxu1 %vm11976_vm1, %v11977_v11 }
0x47a4   :  { %11457 = vmatpush3.bf16.msra.mxu0 %v13085_v49 }
0x47a5   :  { %11464 = vmatprep.subr.bf16.mxu0 %v11975_v3  ;;  %11463 = vmatpush3.bf16.msra.mxu1 %v13069_v53 }
0x47a6   :  { %11470 = vmatprep.subr.bf16.mxu1 %v11975_v3 }
0x47a7   :  { %10819 = vmatmul.mubr.msk.f32.vlgmr.msra.gmra.mrb[96].mxu0 %vm222_vm3, %v8337_v55 }
0x47a8   :  { %11466 = vmatpush3.bf16.msra.mxu0 %v13091_v10  ;;  %10840 = vmatprep.mubr.msk.f32.mxu0 %vm11976_vm1, %v11977_v11 }
0x47a9   :  { %11467 = vmatprep.subr.bf16.mxu0 %v11975_v3 }
0x47ac   :  { %11469 = vmatpush3.bf16.msra.mxu0 %v13101_v17 }
0x47ad   :  { %11476 = vmatprep.subr.bf16.mxu0 %v11975_v3 }
0x4872   :  { %v8406_v48 = vpop.f32.mrb[94].mxu0  ;;  %v8476_v56 = vpop.f32.mrb[94].mxu1 }
0x4873   :  { %v8551_v59 = vrot.slane %v8406_v48, 4  ;;  %v8561_v4 = vrot.slane %v8476_v56, 4  ;;  %v10798_v53 = vpop.f32.mrb[95].mxu0  ;;  %v10809_v26 = vpop.f32.mrb[95].mxu1 }
0x4875   :  { %v8553_v60 = vadd.f32 %v8551_v59, %v13123_v44  ;;  %8562 = vrot.lane.b32.xlu0 %v8561_v4, %s11979_s27 }
0x4877   :  { %v9237_v10 = vmul.f32 -1.442695, %v8553_v60 }
0x4879   :  { %11808 = vpow2.f32 %v9237_v10 }
0x487a   :  { %v8546_v62 = vpop.f32.mrb[96].mxu0 }
0x487b   :  { %v10820_v63 = vpop.f32.mrb[97].mxu0  ;;  %v8547_v17 = vadd.f32 %v13132_v37, %v8546_v62 }
0x487c   :  { %v8852_v63 = vstv %s9244_s3 }
0x487d   :  { %v8573_v15 = vrot.slane %v8547_v17, 4 }
0x4883   :  { %v11809_v45 = vpop.eup %11808 }
0x4884   :  { %v8557_v5 = vadd.f32 1.0, %v11809_v45 }
0x4886   :  { %11810 = vrcp.f32 %v8557_v5 }
0x4890   :  { %v11811_v57 = vpop.eup %11810 }
0x4891   :  { %v8575_v25 = vmul.f32 %v11811_v57, %v8573_v15 }
0x4893   :  { %8577 = vrot.lane.b32.xlu1 %v8575_v25, %s11978_s23 }
0x48e7   :  { %v8563_v12 = vpop.permute.xlu0 %8562 }
0x48e8   :  { %v8565_v14 = vadd.f32 %v8563_v12, %v13123_v44  ;;  %v8949_v12 = vld [vmem:[%s13386_s10 + $0x18] sm:$0xff] }
0x48ea   :  { %v9238_v19 = vmul.f32 -1.442695, %v8565_v14 }
0x4905   :  { %v8578_v52 = vpop.permute.xlu1 %8577 }
0x4906   :  { %v8580_v21 = vadd.f32 %v8578_v52, %v13123_v44  ;;  %v8946_v52 = vld [vmem:[%s13386_s10] sm:$0xff] }
0x4908   :  { %11812 = vtanh.f32 %v8580_v21  ;;  %v8947_v21 = vld [vmem:[%s13386_s10 + $0x8] sm:$0xff] }
0x4909   :  { %11814 = vpow2.f32 %v9238_v19  ;;  %v9245_v19 = vld [vmem:[%s13385_s9] ss:$0 sm:$0xff]  ;;  %s11981_s9 = smov [#allocation15]  }
0x4912   :  { %v11813_v2 = vpop.eup %11812 }
0x4913   :  { %8584 = vrot.lane.b32.xlu1 %v11813_v2, %s11980_s29  ;;  %v11815_v13 = vpop.eup %11814  ;;  %v8948_v2 = vld [vmem:[%s13386_s10 + $0x10] sm:$0xff]  ;;  %s9052_s10 = sshll.u32 %s11981_s9, 4  ;;  %s9053_s10 = int_to_ptr.vmem [resolvable:$true] %s9052_s10 }
0x4914   :  { %v8569_v58 = vadd.f32 1.0, %v11815_v13  ;;  %v11486_v14 = vpack.c.bf16 %v8949_v12, %v8948_v2  ;;  %p11941_p10 = scmp.lt.s32.totalorder %s9053_s10, %s9053_s10 }
0x4916   :  { %11816 = vrcp.f32 %v8569_v58 }
0x4920   :  { %v11817_v6 = vpop.eup %11816 }
0x4921   :  { %v8582_v22 = vsub.f32 1.0, %v11817_v6  ;;  %v8590_v7 = vmul.f32 %v11817_v6, %v8588_v20 }
0x4985   :  { %v8585_v31 = vpop.permute.xlu1 %8584 }
0x4986   :  { %v8587_v1 = vmul.f32 %v8585_v31, %v8582_v22  ;;  %v9247_v22 = vld [vmem:[%s13387_s11] ss:$0 sm:$0xff]  ;;  %s11936_s11 = scalar_lea.vmem %s9053_s10, 32 }
0x4987   :  { %p11937_p9 = scmp.ne.s32.totalorder %s9053_s10, %s11936_s11  ;;  %p11942_p11 = scmp.lt.s32.totalorder %s11936_s11, %s11936_s11 }
0x4988   :  { %v8591_v35 = vadd.f32 %v8590_v7, %v8587_v1 }
0x4989   :  { %p11943_p12 = por %p11942_p11, %p11941_p10 }
0x498a   :  { %v8593_v32 = vrot.slane %v8591_v35, 4  ;;  %v8846_v4 = vrot.slane %v8591_v35, 6 }
0x498b   :  { %p11944_p13 = pnand %p11943_p12, %p11937_p9 }
0x498c   :  { %8594 = vrot.lane.b32.xlu0 %v8593_v32, %s11980_s29 }
0x49fe   :  { %v8595_v34 = vpop.permute.xlu0 %8594 }
0x49ff   :  { %10830 = vmatmul.mubr.msk.f32.vlgmr.msra.gmra.mrb[96].mxu1 %vm222_vm3, %v8595_v34  ;;  %10841 = vmatmul.mubr.msk.f32.vlgmr.msra.gmra.mrb[98].mxu0 %vm222_vm3, %v8595_v34 }
0x4a00   :  { %11472 = vmatpush3.bf16.msra.mxu1 %v13082_v0  ;;  %10851 = vmatprep.mubr.msk.f32.mxu1 %vm11976_vm1, %v11977_v11 }
0x4a01   :  { %11473 = vmatprep.subr.bf16.mxu1 %v11975_v3  ;;  %10862 = vmatprep.mubr.msk.f32.mxu0 %vm11976_vm1, %v11977_v11 }
0x4a02   :  { %11478 = vmatpush3.bf16.msra.mxu0 %v11477_v40 }
0x4a03   :  { %11479 = vmatprep.subr.bf16.mxu0 %v11975_v3 }
0x4a04   :  { %11475 = vmatpush3.bf16.msra.mxu1 %v13085_v49 }
0x4a05   :  { %11482 = vmatprep.subr.bf16.mxu1 %v11975_v3 }
0x4a06   :  { %11481 = vmatpush3.bf16.msra.mxu0 %v11480_v54 }
0x4a07   :  { %10852 = vmatmul.mubr.msk.f32.vlgmr.msra.gmra.mrb[98].mxu1 %vm222_vm3, %v8595_v34 }
0x4a08   :  { %10873 = vmatprep.mubr.msk.f32.mxu1 %vm11976_vm1, %v11977_v11 }
0x4ad2   :  { %v8664_v61 = vpop.f32.mrb[96].mxu1  ;;  %v8734_v36 = vpop.f32.mrb[98].mxu0 }
0x4ad3   :  { %v8809_v0 = vrot.slane %v8664_v61, 2  ;;  %v8819_v24 = vrot.slane %v8734_v36, 2  ;;  %v10831_v39 = vpop.f32.mrb[97].mxu1  ;;  %v10842_v8 = vpop.f32.mrb[99].mxu0 }
0x4ad5   :  { %v8811_v41 = vadd.f32 %v8809_v0, %v13123_v44  ;;  %8820 = vrot.lane.b32.xlu0 %v8819_v24, %s11979_s27 }
0x4ad7   :  { %v9242_v42 = vmul.f32 -1.442695, %v8811_v41 }
0x4ad9   :  { %11818 = vpow2.f32 %v9242_v42 }
0x4ada   :  { %v8804_v49 = vpop.f32.mrb[98].mxu1 }
0x4adb   :  { %v10853_v28 = vpop.f32.mrb[99].mxu1  ;;  %v8805_v46 = vadd.f32 %v13132_v37, %v8804_v49 }
0x4add   :  { %v8831_v11 = vrot.slane %v8805_v46, 2 }
0x4ae3   :  { %v11819_v18 = vpop.eup %11818 }
0x4ae4   :  { %v8815_v43 = vadd.f32 1.0, %v11819_v18 }
0x4ae6   :  { %11820 = vrcp.f32 %v8815_v43 }
0x4af0   :  { %v11821_v47 = vpop.eup %11820 }
0x4af1   :  { %v8833_v50 = vmul.f32 %v11821_v47, %v8831_v11 }
0x4af3   :  { %8835 = vrot.lane.b32.xlu1 %v8833_v50, %s11978_s23 }
0x4b47   :  { %v8821_v37 = vpop.permute.xlu0 %8820 }
0x4b48   :  { %v8823_v23 = vadd.f32 %v8821_v37, %v13123_v44 }
0x4b4a   :  { %v9243_v55 = vmul.f32 -1.442695, %v8823_v23 }
0x4b65   :  { %v8836_v29 = vpop.permute.xlu1 %8835 }
0x4b66   :  { %v8838_v51 = vadd.f32 %v8836_v29, %v13123_v44  ;;  %v8856_v44 = vstv %s13389_s13 }
0x4b68   :  { %11822 = vtanh.f32 %v8838_v51 }
0x4b69   :  { %11824 = vpow2.f32 %v9243_v55 }
0x4b72   :  { %v11823_v27 = vpop.eup %11822 }
0x4b73   :  { %8842 = vrot.lane.b32.xlu1 %v11823_v27, %s11980_s29  ;;  %v11825_v48 = vpop.eup %11824 }
0x4b74   :  { %v8827_v56 = vadd.f32 1.0, %v11825_v48 }
0x4b76   :  { %11826 = vrcp.f32 %v8827_v56 }
0x4b80   :  { %v11827_v59 = vpop.eup %11826 }
0x4b81   :  { %v8840_v53 = vsub.f32 1.0, %v11827_v59  ;;  %v8848_v10 = vmul.f32 %v11827_v59, %v8846_v4 }
0x4be5   :  { %v8843_v26 = vpop.permute.xlu1 %8842 }
0x4be6   :  { %v8845_v60 = vmul.f32 %v8843_v26, %v8840_v53 }
0x4be8   :  { %v8849_v62 = vadd.f32 %v8848_v10, %v8845_v60 }
0x4bea   :  { %11828 = vtanh.f32 %v8849_v62 }
0x4bf4   :  { %v11829_v45 = vpop.eup %11828 }
0x4bf5   :  { %v8853_v5 = vmul.f32 %v11829_v45, %v8852_v63 }
0x4bf7   :  { %v8854_v17 = vadd.f32 %v8853_v5, %v13095_v16  ;;  %v11483_v16 = vpack.c.bf16 %v8947_v21, %v8946_v52 }
0x4bf9   :  { %v8857_v15 = vadd.f32 %v8856_v44, %v8854_v17  ;;  %11484 = vmatpush3.bf16.msra.mxu1 %v11483_v16 }
0x4bfa   :  { %11485 = vmatprep.subr.bf16.mxu1 %v11975_v3 }
0x4bfb   :  { %v8870_v57 = vrot.slane %v8857_v15, 6 }
0x4bfd   :  { %8871 = vrot.lane.b32.xlu0 %v8870_v57, %s11980_s29  ;;  %11487 = vmatpush3.bf16.msra.mxu1 %v11486_v14 }
0x4c6f   :  { %v8872_v25 = vpop.permute.xlu0 %8871 }
0x4c70   :  { %10863 = vmatmul.mubr.msk.f32.vlgmr.msra.gmra.mrb[100].mxu0 %vm222_vm3, %v8872_v25 }
0x4d43   :  { %v8941_v13 = vpop.f32.mrb[100].mxu0 }
0x4d44   :  { %v8942_v58 = vadd.f32 %v9245_v19, %v8941_v13  ;;  %v10864_v6 = vpop.f32.mrb[101].mxu0 }
0x4d46   :  { %11830 = vtanh.f32 %v8942_v58 }
0x4d50   :  { %v11831_v20 = vpop.eup %11830 }
0x4d51   :  { %10874 = vmatmul.mubr.msk.f32.vlgmr.msra.gmra.mrb[100].mxu1 %vm222_vm3, %v11831_v20 }
0x4e24   :  { %v9026_v31 = vpop.f32.mrb[100].mxu1 }
0x4e25   :  { %v9027_v7 = vadd.f32 %v9247_v22, %v9026_v31  ;;  %v10875_v3 = vpop.f32.mrb[101].mxu1 }
0x4e27   :  { %v9031_v1 = vsel %vm9030_vm7, %v9027_v7, -inf }
0x4e28   :  { %9032 = vmax.xlane.f32.xlu1 %v9031_v1 }
0x4eb5   :  { %v9033_v35 = vpop.xlane.xlu1 %9032 }
0x4eb6   :  { %v9034_v32 = vsub.f32 %v9027_v7, %v9033_v35 }
0x4eb8   :  { %v9035_v34 = vmul.f32 1.442695, %v9034_v32 }
0x4eba   :  { %11832 = vpow2.f32 %v9035_v34 }
0x4ec4   :  { %v11833_v61 = vpop.eup %11832 }
0x4ec5   :  { %v9037_v36 = vsel %vm9030_vm7, %v11833_v61, 0.0 }
0x4ec6   :  { %9038 = vadd.xlane.f32.xlu0 %v9037_v36 }
0x4f53   :  { %v9039_v0 = vpop.xlane.xlu0 %9038 }
0x4f54   :  { %11834 = vrcp.f32 %v9039_v0 }
0x4f5e   :  { %v11835_v24 = vpop.eup %11834 }
0x4f5f   :  { %v9041_v39 = vmul.f32 %v11835_v24, %v9039_v0 }
0x4f61   :  { %v9042_v8 = vsub.f32 2.0, %v9041_v39 }
0x4f63   :  { %v9043_v41 = vmul.f32 %v11835_v24, %v9042_v8 }
0x4f65   :  { %v9044_v42 = vmul.f32 %v11833_v61, %v9043_v41 }
0x4f67   :  { %9045 = vst.msk [vmem:[#allocation15] sm:$0x3] %vm9030_vm7, %v9044_v42 }
0x4f68   :  { %11947 = shalt.err (!%p11944_p13)
}
0x4f69   :  { %s11948_s16 = scalar_lea.hbm %s13390_s14, 32 }
0x4f6a   :  { %p11949_p0 = scmp.ne.s32.totalorder %s13390_s14, %s11948_s16  ;;  %p11952_p1 = scmp.lt.u32.totalorder %s11948_s16, %s13390_s14 }
0x4f6c   :  { %p11954_p2 = pnand %p11952_p1, %p11949_p0 }
0x4f6e   :  { %11957 = shalt.err (!%p11954_p2)
}
0x4f6f   :  { %9055 = dma.vmem_to_hbm [thread:$0]  %s9053_s10, 32, %s13390_s14, [#allocation7]  }
0x4f70   :  { %11966 = dma.done.wait [#allocation7], 32  }
0x4f71   :  { %11967 = vsyncadd [#allocation7], 4294967264 }
0x4f72   :  { %9059 = vsyncpa [#allocation6], 1 }
0x4f73   :  { %9060 = vsyncpa [#allocation10], 1 }
0x4f74   :  { %9061 = vsyncpa [#allocation13], 1 }
0x4f75   :  { %9062 = vsyncpa [#allocation7], 1 }
0x4f76   :  { %9063 = vsyncpa [#allocation8], 1 }

</bundles_post_ra>
